<compile_context>
chip_gen: v5e
topology: v5e:2x2
jax: 0.10.0
libtpu: 0.0.40
codegen_flags: <defaults>
</compile_context>

<pallas_src>
import functools

import jax
import jax.numpy as jnp
from jax import lax
from jax.experimental import pallas as pl
from jax.experimental.pallas import tpu as pltpu

MARLIN_TILE_SIZE = 16
FP8_E4M3_MAX = 448.0


def _round_up(x: int, m: int) -> int:
    return (x + m - 1) // m * m


# ----------------------------------------------------------------------------
# Packing helpers (plain-JAX glue, mirrors pack_fp8_as_int32 from the module).
# ----------------------------------------------------------------------------
def pack_fp8_as_int32(fp8_tensor: jax.Array) -> jax.Array:
    """Pack an fp8 (R, C) tensor into int32 (R//4, C), byte i -> bits [8i, 8i+8)."""
    assert fp8_tensor.dtype == jnp.float8_e4m3fn
    r, c = fp8_tensor.shape
    if r % 4 != 0:
        raise ValueError(f"Leading tensor dimension is not divisable by 4: {r}")
    byte_tensor = lax.bitcast_convert_type(fp8_tensor, jnp.uint8).reshape(r // 4, 4, c)
    packed = jnp.zeros((r // 4, c), dtype=jnp.uint32)
    for i in range(4):
        packed = packed | (byte_tensor[:, i].astype(jnp.uint32) << (8 * i))
    return lax.bitcast_convert_type(packed, jnp.int32)


def unpack_int32_to_fp8(packed: jax.Array) -> jax.Array:
    """Inverse of pack_fp8_as_int32: int32 (R//4, C) -> fp8 (R, C)."""
    rq, c = packed.shape
    bytes_ = lax.bitcast_convert_type(packed, jnp.uint8)       # (R//4, C, 4), LE
    bytes_ = jnp.transpose(bytes_, (0, 2, 1)).reshape(rq * 4, c)
    return lax.bitcast_convert_type(bytes_, jnp.float8_e4m3fn)


def fp8_quantize(weight: jax.Array):
    """Per-tensor fp8 (e4m3) quantization (matches the from_unquant path)."""
    scale = jnp.max(jnp.abs(weight)) / FP8_E4M3_MAX
    qweight = jnp.clip(weight / scale, -FP8_E4M3_MAX, FP8_E4M3_MAX).astype(
        jnp.float8_e4m3fn
    )
    return qweight, scale


# ----------------------------------------------------------------------------
# Pallas kernels: tiled fp8-dequant matmul, f32 accumulation, per-channel
# scale (+ optional bias) epilogue.
# ----------------------------------------------------------------------------
def _fp8_gemm_kernel(a_ref, w_ref, s_ref, o_ref, acc_ref):
    k = pl.program_id(2)

    @pl.when(k == 0)
    def _():
        acc_ref[...] = jnp.zeros_like(acc_ref)

    a = a_ref[...]                              # (tm, tk) activation dtype (bf16)
    w = w_ref[...].astype(a.dtype)              # fp8 -> bf16 (exact), MXU bf16 path
    acc_ref[...] += jnp.dot(a, w, preferred_element_type=jnp.float32)

    @pl.when(k == pl.num_programs(2) - 1)
    def _():
        out = acc_ref[...] * s_ref[...]         # per-out-channel scale (f32)
        o_ref[...] = out.astype(o_ref.dtype)


def _fp8_gemm_bias_kernel(a_ref, w_ref, s_ref, b_ref, o_ref, acc_ref):
    k = pl.program_id(2)

    @pl.when(k == 0)
    def _():
        acc_ref[...] = jnp.zeros_like(acc_ref)

    a = a_ref[...]
    w = w_ref[...].astype(a.dtype)
    acc_ref[...] += jnp.dot(a, w, preferred_element_type=jnp.float32)

    @pl.when(k == pl.num_programs(2) - 1)
    def _():
        out = acc_ref[...] * s_ref[...] + b_ref[...]
        o_ref[...] = out.astype(o_ref.dtype)


@functools.partial(jax.jit, static_argnames=("tm", "tn", "tk"))
def fp8_marlin_gemm(a, w_t_fp8, scales, bias=None, *, tm=256, tn=256, tk=512):
    """C = (a @ dequant(w_t_fp8)) * scales (+ bias), output dtype = a.dtype."""
    m, k = a.shape
    k2, n = w_t_fp8.shape
    assert k == k2, (k, k2)
    assert n % tn == 0 and k % tk == 0, (n, tn, k, tk)

    m_pad = _round_up(max(m, 1), tm)
    if m_pad != m:
        a = jnp.pad(a, ((0, m_pad - m), (0, 0)))

    scales2d = scales.reshape(1, n).astype(jnp.float32)

    out_dtype = a.dtype
    grid_m, grid_n, grid_k = m_pad // tm, n // tn, k // tk
    flops = 2 * m_pad * n * k
    bytes_accessed = (
        grid_n * m_pad * k * a.dtype.itemsize          # A re-streamed per N tile
        + grid_m * k * n * w_t_fp8.dtype.itemsize      # W re-streamed per M tile
        + n * 4
        + m_pad * n * jnp.dtype(out_dtype).itemsize
    )

    in_specs = [
        pl.BlockSpec((tm, tk), lambda i, j, kk: (i, kk)),
        pl.BlockSpec((tk, tn), lambda i, j, kk: (kk, j)),
        pl.BlockSpec((1, tn), lambda i, j, kk: (0, j)),
    ]
    inputs = [a, w_t_fp8, scales2d]
    if bias is not None:
        in_specs.append(pl.BlockSpec((1, tn), lambda i, j, kk: (0, j)))
        inputs.append(bias.reshape(1, n).astype(jnp.float32))
        kernel = _fp8_gemm_bias_kernel
    else:
        kernel = _fp8_gemm_kernel

    out = pl.pallas_call(
        kernel,
        out_shape=jax.ShapeDtypeStruct((m_pad, n), out_dtype),
        grid_spec=pltpu.PrefetchScalarGridSpec(
            num_scalar_prefetch=0,
            grid=(grid_m, grid_n, grid_k),
            in_specs=in_specs,
            out_specs=pl.BlockSpec((tm, tn), lambda i, j, kk: (i, j)),
            scratch_shapes=[pltpu.VMEM((tm, tn), jnp.float32)],
        ),
        compiler_params=pltpu.CompilerParams(
            dimension_semantics=("parallel", "parallel", "arbitrary"),
        ),
        cost_estimate=pl.CostEstimate(
            flops=flops, transcendentals=0, bytes_accessed=bytes_accessed
        ),
    )(*inputs)

    if m_pad != m:
        out = out[:m]
    return out


# ----------------------------------------------------------------------------
# Module-equivalent wrapper
# ----------------------------------------------------------------------------
class GPTQMarlinFP8Linear:
    """FP8 GPTQ-Marlin linear layer (JAX/Pallas TPU version)."""

    def __init__(self, qweight, scales, bias=None):
        # qweight: (out_features, in_features), fp8_e4m3
        out_features, in_features = qweight.shape
        # _check_valid_shape equivalent
        assert in_features % 128 == 0 and out_features % 64 == 0

        scales = jnp.atleast_1d(jnp.asarray(scales)).reshape(-1).astype(jnp.float32)
        if scales.shape[0] == 1:
            scales = jnp.broadcast_to(scales, (out_features,))
        assert scales.shape[0] == out_features

        # Storage format (mirrors the module): pack weight.T as gptq int32.
        # TODO(synk): gptq_marlin_repack / permute_scales are GPU tile-layout
        # permutations with no math effect; skipped on TPU.
        self.qweight = pack_fp8_as_int32(qweight.T)            # (K//4, N) int32
        self.in_features = in_features
        self.out_features = out_features
        self.workspace = jnp.zeros((out_features // 64 * 16,), dtype=jnp.int32)

        # ---- compute-format cache (built once, not per forward call) ----
        # Tile choices: lane-dense 256-wide output tiles (full MXU N on v6e/v7x),
        # large K tiles for the weight stream; footprint ~2 MiB << VMEM budget.
        self._tn = 256 if out_features % 256 == 0 else 128
        n_pad = _round_up(out_features, self._tn)
        tk = 1024
        while in_features % tk != 0:
            tk //= 2
        self._tk = max(tk, 128)

        packed = self.qweight
        if n_pad != out_features:
            packed = jnp.pad(packed, ((0, 0), (0, n_pad - out_features)))
        self._w_t_fp8 = unpack_int32_to_fp8(packed)            # (K, n_pad) fp8, cached
        self._scales = jnp.pad(
            scales, (0, n_pad - out_features)
        ).reshape(1, n_pad).astype(jnp.float32)                # fp32 scales kept

        if bias is not None:
            b = jnp.asarray(bias).reshape(-1).astype(jnp.float32)
            assert b.shape[0] == out_features
            self._bias = jnp.pad(b, (0, n_pad - out_features)).reshape(1, n_pad)
        else:
            self._bias = None
        self.bias = bias
        self.scales = scales.reshape(1, out_features)
        self._n_pad = n_pad

    @classmethod
    def from_unquant(cls, weight, bias, dtype):
        qweight, scale = fp8_quantize(weight)
        return cls(qweight=qweight, scales=jnp.asarray(scale, dtype), bias=bias)

    @classmethod
    def from_fp8(cls, weight, scale, bias, dtype, **kwargs):
        return cls(qweight=weight, scales=jnp.asarray(scale, dtype), bias=bias)

    def __call__(self, A: jax.Array) -> jax.Array:
        A_flat = A.reshape(-1, A.shape[-1])
        m = A_flat.shape[0]
        tm = min(256, _round_up(m, 16))
        C = fp8_marlin_gemm(
            A_flat, self._w_t_fp8, self._scales, self._bias,
            tm=tm, tn=self._tn, tk=self._tk,
        )
        if self._n_pad != self.out_features:
            C = C[:, : self.out_features]
        return C.reshape(A.shape[:-1] + (self.out_features,))


# ----------------------------------------------------------------------------
# Demo / correctness check
# ----------------------------------------------------------------------------
def _assert_allclose(out, ref, rtol=2e-2, atol=5e-2, msg="mismatch"):
    """Combined rtol/atol check (kernel output is rounded to the activation
    dtype — bf16 — so a pure absolute tolerance is not meaningful)."""
    out = jnp.asarray(out, jnp.float32)
    ref = jnp.asarray(ref, jnp.float32)
    diff = jnp.abs(out - ref)
    tol = atol + rtol * jnp.abs(ref)
    ok = bool(jnp.all(diff <= tol))
    if not ok:
        max_abs = float(jnp.max(diff))
        max_rel = float(jnp.max(diff / (jnp.abs(ref) + 1e-6)))
        raise AssertionError(f"{msg}: max_abs={max_abs:.4f} max_rel={max_rel:.4f}")


if __name__ == "__main__":
    key = jax.random.PRNGKey(0)
    k_a, k_w, k_b = jax.random.split(key, 3)

    batch, seq, in_features, out_features = 2, 8, 512, 256

    weight = jax.random.normal(k_w, (out_features, in_features), dtype=jnp.float32)
    bias = (0.1 * jax.random.normal(k_b, (out_features,), dtype=jnp.float32)).astype(
        jnp.bfloat16
    )
    A = jax.random.normal(k_a, (batch, seq, in_features), dtype=jnp.float32).astype(
        jnp.bfloat16
    )

    layer = GPTQMarlinFP8Linear.from_unquant(weight, bias, jnp.bfloat16)
    out = layer(A)
    out = jax.block_until_ready(out)

    assert out.shape == (batch, seq, out_features)
    assert out.dtype == A.dtype

    # pack/unpack round-trip check (bitwise).
    qw_fp8, _ = fp8_quantize(weight)
    rt = unpack_int32_to_fp8(pack_fp8_as_int32(qw_fp8.T))
    assert bool(
        jnp.all(
            lax.bitcast_convert_type(rt, jnp.uint8)
            == lax.bitcast_convert_type(qw_fp8.T, jnp.uint8)
        )
    )

    # Reference: dequantize fp8 weight exactly, compute in f32.
    w_fp8 = unpack_int32_to_fp8(layer.qweight).astype(jnp.float32)   # (K, N)
    scales_f32 = layer._scales[:, :out_features]                     # (1, N) f32
    A2 = A.reshape(-1, in_features).astype(jnp.float32)
    ref = (A2 @ w_fp8) * scales_f32 + bias.astype(jnp.float32)

    _assert_allclose(out.reshape(-1, out_features), ref, msg="bias path")

    # Multi-tile coverage: force small tiles so K and N span several blocks
    # (exercises accumulator carry across the 'arbitrary' K axis).
    out_small = fp8_marlin_gemm(
        A.reshape(-1, in_features), layer._w_t_fp8, layer._scales, layer._bias,
        tm=16, tn=128, tk=128,
    )
    out_small = jax.block_until_ready(out_small)[:, :out_features]
    _assert_allclose(out_small, ref, msg="small-tile path")

    # No-bias path (separate kernel, no zero-bias stream).
    layer_nb = GPTQMarlinFP8Linear.from_fp8(
        qw_fp8, layer.scales[0, 0], None, jnp.bfloat16
    )
    out_nb = jax.block_until_ready(layer_nb(A)).reshape(-1, out_features)
    ref_nb = (A2 @ w_fp8) * scales_f32
    _assert_allclose(out_nb, ref_nb, msg="no-bias path")

    print("KERNEL_OK")
</pallas_src>

<mosaic_0001>
module attributes {stable_mosaic.version = 11 : i64} {
  func.func @_fp8_gemm_bias_kernel(%arg0: i32, %arg1: i32, %arg2: i32, %arg3: memref<16x512xbf16, #tpu.memory_space<vmem>>, %arg4: memref<512x256xf8E4M3FN, #tpu.memory_space<vmem>>, %arg5: memref<1x256xf32, #tpu.memory_space<vmem>>, %arg6: memref<1x256xf32, #tpu.memory_space<vmem>>, %arg7: memref<16x256xbf16, #tpu.memory_space<vmem>>, %arg8: memref<16x256xf32, #tpu.memory_space<vmem>>) attributes {dimension_semantics = [#tpu.dimension_semantics<parallel>, #tpu.dimension_semantics<parallel>, #tpu.dimension_semantics<arbitrary>], iteration_bounds = array<i64: 1, 1, 1>, scalar_prefetch = 0 : i64, scratch_operands = 1 : i64, tpu.core_type = #tpu.core_type<tc>, window_params = [{transform_indices = @transform_0, window_bounds = array<i64: 16, 512>}, {transform_indices = @transform_1, window_bounds = array<i64: 512, 256>}, {transform_indices = @transform_2, window_bounds = array<i64: 1, 256>}, {transform_indices = @transform_3, window_bounds = array<i64: 1, 256>}, {transform_indices = @transform_4, window_bounds = array<i64: 16, 256>}]} {
    %c0_i32 = arith.constant 0 : i32
    %0 = arith.cmpi eq, %arg2, %c0_i32 : i32
    %1 = arith.extui %0 : i1 to i32
    %c0_i32_0 = arith.constant 0 : i32
    %2 = arith.cmpi ne, %1, %c0_i32_0 : i32
    scf.if %2 {
      %cst_10 = arith.constant 0.000000e+00 : f32
      %13 = vector.broadcast %cst_10 : f32 to vector<16x256xf32>
      %c0_11 = arith.constant 0 : index
      %c0_12 = arith.constant 0 : index
      %14 = vector.load %arg8[%c0_11, %c0_12] : memref<16x256xf32, #tpu.memory_space<vmem>>, vector<16x256xf32>
      tpu.vector_store %arg8[%c0_11, %c0_12], %13 {strides = array<i32>} : memref<16x256xf32, #tpu.memory_space<vmem>>, vector<16x256xf32>,
    } else {
    }
    %c0 = arith.constant 0 : index
    %c0_1 = arith.constant 0 : index
    %3 = vector.load %arg3[%c0, %c0_1] : memref<16x512xbf16, #tpu.memory_space<vmem>>, vector<16x512xbf16>
    %c0_2 = arith.constant 0 : index
    %c0_3 = arith.constant 0 : index
    %4 = vector.load %arg4[%c0_2, %c0_3] : memref<512x256xf8E4M3FN, #tpu.memory_space<vmem>>, vector<512x256xf8E4M3FN>
    %5 = arith.extf %4 : vector<512x256xf8E4M3FN> to vector<512x256xbf16>
    %c0_4 = arith.constant 0 : index
    %c0_5 = arith.constant 0 : index
    %6 = vector.load %arg8[%c0_4, %c0_5] : memref<16x256xf32, #tpu.memory_space<vmem>>, vector<16x256xf32>
    %cst = arith.constant dense<0.000000e+00> : vector<16x256xf32>
    %7 = tpu.matmul %3, %5, %cst {dimension_numbers = #tpu.dot_dimension_numbers<[1], [0], [0], [1], [0, 0, 1, 1], [], []>} : vector<16x512xbf16>, vector<512x256xbf16>, vector<16x256xf32> -> vector<16x256xf32>
    %8 = arith.addf %6, %7 : vector<16x256xf32>
    %c0_6 = arith.constant 0 : index
    %c0_7 = arith.constant 0 : index
    %9 = vector.load %arg8[%c0_6, %c0_7] : memref<16x256xf32, #tpu.memory_space<vmem>>, vector<16x256xf32>
    tpu.vector_store %arg8[%c0_6, %c0_7], %8 {strides = array<i32>} : memref<16x256xf32, #tpu.memory_space<vmem>>, vector<16x256xf32>,
    %c0_i32_8 = arith.constant 0 : i32
    %10 = arith.cmpi eq, %arg2, %c0_i32_8 : i32
    %11 = arith.extui %10 : i1 to i32
    %c0_i32_9 = arith.constant 0 : i32
    %12 = arith.cmpi ne, %11, %c0_i32_9 : i32
    scf.if %12 {
      %c0_10 = arith.constant 0 : index
      %c0_11 = arith.constant 0 : index
      %13 = vector.load %arg8[%c0_10, %c0_11] : memref<16x256xf32, #tpu.memory_space<vmem>>, vector<16x256xf32>
      %c0_12 = arith.constant 0 : index
      %c0_13 = arith.constant 0 : index
      %14 = vector.load %arg5[%c0_12, %c0_13] : memref<1x256xf32, #tpu.memory_space<vmem>>, vector<1x256xf32>
      %15 = vector.broadcast %14 : vector<1x256xf32> to vector<16x256xf32>
      %16 = arith.mulf %13, %15 : vector<16x256xf32>
      %c0_14 = arith.constant 0 : index
      %c0_15 = arith.constant 0 : index
      %17 = vector.load %arg6[%c0_14, %c0_15] : memref<1x256xf32, #tpu.memory_space<vmem>>, vector<1x256xf32>
      %18 = vector.broadcast %17 : vector<1x256xf32> to vector<16x256xf32>
      %19 = arith.addf %16, %18 : vector<16x256xf32>
      %20 = arith.truncf %19 : vector<16x256xf32> to vector<16x256xbf16>
      %c0_16 = arith.constant 0 : index
      %c0_17 = arith.constant 0 : index
      %21 = vector.load %arg7[%c0_16, %c0_17] : memref<16x256xbf16, #tpu.memory_space<vmem>>, vector<16x256xbf16>
      tpu.vector_store %arg7[%c0_16, %c0_17], %20 {strides = array<i32>} : memref<16x256xbf16, #tpu.memory_space<vmem>>, vector<16x256xbf16>,
    } else {
    }
    return
  }
  func.func @transform_0(%arg0: i32, %arg1: i32, %arg2: i32) -> (i32, i32) {
    %c0_i32 = arith.constant 0 : i32
    return %arg0, %arg2 : i32, i32
  }
  func.func @transform_1(%arg0: i32, %arg1: i32, %arg2: i32) -> (i32, i32) {
    %c0_i32 = arith.constant 0 : i32
    return %arg2, %arg1 : i32, i32
  }
  func.func @transform_2(%arg0: i32, %arg1: i32, %arg2: i32) -> (i32, i32) {
    %c0_i32 = arith.constant 0 : i32
    %c0_i32_0 = arith.constant 0 : i32
    return %c0_i32, %arg1 : i32, i32
  }
  func.func @transform_3(%arg0: i32, %arg1: i32, %arg2: i32) -> (i32, i32) {
    %c0_i32 = arith.constant 0 : i32
    %c0_i32_0 = arith.constant 0 : i32
    return %c0_i32, %arg1 : i32, i32
  }
  func.func @transform_4(%arg0: i32, %arg1: i32, %arg2: i32) -> (i32, i32) {
    %c0_i32 = arith.constant 0 : i32
    return %arg0, %arg1 : i32, i32
  }
}

</mosaic_0001>

<bundles_post_ra>
// kernel: fp8_marlin_gemm.1
= control target key start
LH: loop header
LB: loop body
LE: loop exit
PB: predicated region body
PF: predicated region fallthrough
CT: control target
= control target key end

     0   :  { %9 = vsyncpa [#allocation4], 0  ;;  %s6349_s0 = inlined_call_operand.hbm [shape: bf16[16,512], index: 0, kind: input, shape index: {}]   ;;  %s6350_s1 = inlined_call_operand.hbm [shape: f8e4m3fn[512,256], index: 1, kind: input, shape index: {}]   ;;  %s6351_s2 = inlined_call_operand.hbm [shape: f32[1,256], index: 2, kind: input, shape index: {}]   ;;  %s6352_s3 = inlined_call_operand.vmem [shape: f32[1,256], index: 3, kind: input, shape index: {}]   ;;  %s6353_s4 = inlined_call_operand.hbm [shape: bf16[16,256], index: 4, kind: output, shape index: {}]  }
   0x1   :  { %10 = vsyncpa [#allocation7], 0 }
   0x2   :  { %11 = vsyncpa [#allocation5], 0  ;;  %s29_s17 = sshll.u32 %s6350_s1, 4  ;;  %s4432_s18 = smov [#allocation6]   ;;  %s30_s17 = int_to_ptr.hbm [resolvable:$true] %s29_s17 }
   0x3   :  { %s31_s19 = sshll.u32 %s4432_s18, 4  ;;  %s16_s22 = sshll.u32 %s6349_s0, 4  ;;  %s32_s19 = int_to_ptr.vmem [resolvable:$true] %s31_s19  ;;  %s17_s22 = int_to_ptr.hbm [resolvable:$true] %s16_s22 }
   0x4   :  { %s4433_s23 = smov 256   ;;  %s4434_s24 = smov 16  }
   0x5   :  { %37 = dma.hbm_to_vmem [thread:$0]  %s30_s17, 4096, %s32_s19, [#allocation7], %s4433_s23, %s4433_s23, %s4434_s24  }
   0x6   :  { %s4435_s25 = smov [#allocation3]   ;;  %s43_s29 = sshll.u32 %s6351_s2, 4  ;;  %s44_s29 = int_to_ptr.hbm [resolvable:$true] %s43_s29 }
   0x7   :  { %s18_s26 = sshll.u32 %s4435_s25, 4  ;;  %s4436_s1 = smov [#allocation8]   ;;  %s19_s26 = int_to_ptr.vmem [resolvable:$true] %s18_s26 }
   0x8   :  { %24 = dma.hbm_to_vmem [thread:$0]  %s17_s22, 512, %s19_s26, [#allocation4], %s4433_s23, %s4433_s23, %s4434_s24  }
   0x9   :  { %s45_s30 = sshll.u32 %s4436_s1, 4  ;;  %s46_s30 = int_to_ptr.vmem [resolvable:$true] %s45_s30 }
   0xa   :  { %48 = dma.hbm_to_vmem [thread:$0]  %s44_s29, 32, %s46_s30, [#allocation7]  }
   0xb   :  { %4426 = dma.done.wait [#allocation4], 512  }
   0xc   :  { %4427 = vsyncadd [#allocation4], 4294966784 }
   0xd   :  { %4428 = dma.done.wait [#allocation7], 4128  }
   0xe   :  { %4429 = vsyncadd [#allocation7], 4294963168  ;;  %v4474_v0 = vld [vmem:[#allocation3 + $0x4] sm:$0xf]  ;;  %v4476_v1 = vld [vmem:[#allocation3] sm:$0xf] }
   0xf   :  { %6666 = vst [vmem:[#allocation141_spill] sm:$0xff] %v4474_v0  ;;  %v4478_v2 = vld [vmem:[#allocation3 + $0xc] sm:$0xf]  ;;  %v4480_v3 = vld [vmem:[#allocation3 + $0x8] sm:$0xf]  ;;  %v4490_v8 = vld [vmem:[#allocation6] sm:$0xff] }
  0x10   :  { %6667 = vst [vmem:[#allocation142_spill] sm:$0xff] %v4476_v1  ;;  %v4482_v4 = vld [vmem:[#allocation3 + $0x10] sm:$0xf0]  ;;  %v4484_v5 = vld [vmem:[#allocation3 + $0xc] sm:$0xf0]  ;;  %v4492_v9 = vld [vmem:[#allocation6 + $0x8] sm:$0xff] }
  0x11   :  { %6668 = vst [vmem:[#allocation143_spill] sm:$0xff] %v4478_v2  ;;  %v4486_v6 = vld [vmem:[#allocation3 + $0x18] sm:$0xf0]  ;;  %v4488_v7 = vld [vmem:[#allocation3 + $0x14] sm:$0xf0]  ;;  %v4494_v10 = vld [vmem:[#allocation6 + $0x10] sm:$0xff] }
  0x12   :  { %6669 = vst [vmem:[#allocation144_spill] sm:$0xff] %v4480_v3  ;;  %v4496_v11 = vld [vmem:[#allocation6 + $0x18] sm:$0xff]  ;;  %v4498_v12 = vld [vmem:[#allocation6 + $0x20] sm:$0xff]  ;;  %v4500_v13 = vld [vmem:[#allocation6 + $0x28] sm:$0xff] }
  0x13   :  { %6670 = vst [vmem:[#allocation145_spill] sm:$0xff] %v4482_v4  ;;  %v4502_v14 = vld [vmem:[#allocation6 + $0x30] sm:$0xff]  ;;  %v4504_v15 = vld [vmem:[#allocation6 + $0x38] sm:$0xff]  ;;  %v4506_v16 = vld [vmem:[#allocation6 + $0x40] sm:$0xff] }
  0x14   :  { %6671 = vst [vmem:[#allocation146_spill] sm:$0xff] %v4484_v5  ;;  %v4508_v17 = vld [vmem:[#allocation6 + $0x48] sm:$0xff]  ;;  %v4510_v18 = vld [vmem:[#allocation6 + $0x50] sm:$0xff]  ;;  %v4512_v19 = vld [vmem:[#allocation6 + $0x58] sm:$0xff] }
  0x15   :  { %6672 = vst [vmem:[#allocation147_spill] sm:$0xff] %v4486_v6  ;;  %v4514_v20 = vld [vmem:[#allocation6 + $0x60] sm:$0xff]  ;;  %v4516_v21 = vld [vmem:[#allocation6 + $0x68] sm:$0xff]  ;;  %v4518_v22 = vld [vmem:[#allocation6 + $0x70] sm:$0xff] }
  0x16   :  { %6673 = vst [vmem:[#allocation148_spill] sm:$0xff] %v4488_v7  ;;  %v4520_v23 = vld [vmem:[#allocation6 + $0x78] sm:$0xff]  ;;  %v4522_v24 = vld [vmem:[#allocation6 + $0x80] sm:$0xff]  ;;  %v4524_v25 = vld [vmem:[#allocation6 + $0x88] sm:$0xff] }
  0x17   :  { %v4526_v26 = vld [vmem:[#allocation6 + $0x90] sm:$0xff]  ;;  %v4528_v27 = vld [vmem:[#allocation6 + $0x98] sm:$0xff]  ;;  %v4530_v28 = vld [vmem:[#allocation6 + $0xa0] sm:$0xff] }
  0x18   :  { %v4532_v29 = vld [vmem:[#allocation6 + $0xa8] sm:$0xff]  ;;  %v4534_v30 = vld [vmem:[#allocation6 + $0xb0] sm:$0xff]  ;;  %v4536_v31 = vld [vmem:[#allocation6 + $0xb8] sm:$0xff] }
  0x19   :  { %v4538_v32 = vld [vmem:[#allocation6 + $0xc0] sm:$0xff]  ;;  %v4540_v33 = vld [vmem:[#allocation6 + $0xc8] sm:$0xff]  ;;  %v4542_v34 = vld [vmem:[#allocation6 + $0xd0] sm:$0xff] }
  0x1a   :  { %v4544_v35 = vld [vmem:[#allocation6 + $0xd8] sm:$0xff]  ;;  %v4546_v36 = vld [vmem:[#allocation6 + $0xe0] sm:$0xff]  ;;  %v4548_v37 = vld [vmem:[#allocation6 + $0xe8] sm:$0xff] }
  0x1b   :  { %v4550_v38 = vld [vmem:[#allocation6 + $0xf0] sm:$0xff]  ;;  %v4552_v39 = vld [vmem:[#allocation6 + $0xf8] sm:$0xff] }
  0x1c   :  { %107 = vst [vmem:[#allocation10] sm:$0xff] %v4490_v8  ;;  %v6674_v44 = vmov 0 }
  0x23   :  { %v108_v40 = vld [vmem:[#allocation10] sm:$0x3] }
  0x24   :  { %v109_v41 = vunpack.c.0.f8e4m3b11 %v108_v40 }
  0x26   :  { %v113_v42 = vand.u32 2147483647, %v109_v41  ;;  %vm115_vm0 = vcmp.ne.f32.partialorder %v109_v41, %v109_v41  ;;  %v116_v43 = vmul.f32 16.0, %v109_v41 }
  0x28   :  { %vm4555_vm1 = vcmp.gt.f32.partialorder %v113_v42, 29.0  ;;  %v4559_v45 = vsel %vm115_vm0, -0.0, %v116_v43 }
  0x29   :  { %v6675_v44 = vsel %vm4555_vm1, 4294967295, %v6674_v44  ;;  %6677 = vst [vmem:[#allocation150_spill] sm:$0xff] %v4559_v45 }
  0x2a   :  { %6676 = vst [vmem:[#allocation149_spill] sm:$0xff] %v6675_v44 }
  0x2b   :  { %137 = vst [vmem:[#allocation11] sm:$0xff] %v4492_v9  ;;  %v6678_v51 = vmov 0 }
  0x32   :  { %v138_v47 = vld [vmem:[#allocation11] sm:$0x3] }
  0x33   :  { %v139_v48 = vunpack.c.0.f8e4m3b11 %v138_v47 }
  0x35   :  { %v143_v49 = vand.u32 2147483647, %v139_v48  ;;  %vm145_vm2 = vcmp.ne.f32.partialorder %v139_v48, %v139_v48  ;;  %v146_v50 = vmul.f32 16.0, %v139_v48 }
  0x37   :  { %vm4565_vm3 = vcmp.gt.f32.partialorder %v143_v49, 29.0  ;;  %v4569_v52 = vsel %vm145_vm2, -0.0, %v146_v50 }
  0x38   :  { %v6679_v51 = vsel %vm4565_vm3, 4294967295, %v6678_v51  ;;  %6681 = vst [vmem:[#allocation152_spill] sm:$0xff] %v4569_v52 }
  0x39   :  { %6680 = vst [vmem:[#allocation151_spill] sm:$0xff] %v6679_v51 }
  0x3a   :  { %167 = vst [vmem:[#allocation12] sm:$0xff] %v4490_v8  ;;  %v6682_v58 = vmov 0 }
  0x41   :  { %v169_v54 = vld [vmem:[#allocation12 + $0x2] sm:$0x3] }
  0x42   :  { %v170_v55 = vunpack.c.0.f8e4m3b11 %v169_v54 }
  0x44   :  { %v174_v56 = vand.u32 2147483647, %v170_v55  ;;  %vm176_vm4 = vcmp.ne.f32.partialorder %v170_v55, %v170_v55  ;;  %v177_v57 = vmul.f32 16.0, %v170_v55 }
  0x46   :  { %vm4575_vm5 = vcmp.gt.f32.partialorder %v174_v56, 29.0  ;;  %v4579_v59 = vsel %vm176_vm4, -0.0, %v177_v57 }
  0x47   :  { %v6683_v58 = vsel %vm4575_vm5, 4294967295, %v6682_v58  ;;  %6685 = vst [vmem:[#allocation154_spill] sm:$0xff] %v4579_v59 }
  0x48   :  { %6684 = vst [vmem:[#allocation153_spill] sm:$0xff] %v6683_v58 }
  0x49   :  { %198 = vst [vmem:[#allocation13] sm:$0xff] %v4492_v9  ;;  %v6686_v41 = vmov 0 }
  0x50   :  { %v200_v61 = vld [vmem:[#allocation13 + $0x2] sm:$0x3] }
  0x51   :  { %v201_v62 = vunpack.c.0.f8e4m3b11 %v200_v61 }
  0x53   :  { %v205_v63 = vand.u32 2147483647, %v201_v62  ;;  %vm207_vm6 = vcmp.ne.f32.partialorder %v201_v62, %v201_v62  ;;  %v208_v40 = vmul.f32 16.0, %v201_v62 }
  0x55   :  { %vm4585_vm7 = vcmp.gt.f32.partialorder %v205_v63, 29.0  ;;  %v4589_v42 = vsel %vm207_vm6, -0.0, %v208_v40 }
  0x56   :  { %v6687_v41 = vsel %vm4585_vm7, 4294967295, %v6686_v41  ;;  %6689 = vst [vmem:[#allocation156_spill] sm:$0xff] %v4589_v42 }
  0x57   :  { %6688 = vst [vmem:[#allocation155_spill] sm:$0xff] %v6687_v41 }
  0x58   :  { %229 = vst [vmem:[#allocation14] sm:$0xff] %v4490_v8  ;;  %v6690_v54 = vmov 0 }
  0x5f   :  { %v231_v47 = vld [vmem:[#allocation14 + $0x4] sm:$0x3] }
  0x60   :  { %v232_v48 = vunpack.c.0.f8e4m3b11 %v231_v47 }
  0x62   :  { %v236_v49 = vand.u32 2147483647, %v232_v48  ;;  %vm238_vm8 = vcmp.ne.f32.partialorder %v232_v48, %v232_v48  ;;  %v239_v50 = vmul.f32 16.0, %v232_v48 }
  0x64   :  { %vm4595_vm9 = vcmp.gt.f32.partialorder %v236_v49, 29.0  ;;  %v4599_v55 = vsel %vm238_vm8, -0.0, %v239_v50 }
  0x65   :  { %v6691_v54 = vsel %vm4595_vm9, 4294967295, %v6690_v54  ;;  %6693 = vst [vmem:[#allocation158_spill] sm:$0xff] %v4599_v55 }
  0x66   :  { %6692 = vst [vmem:[#allocation157_spill] sm:$0xff] %v6691_v54 }
  0x67   :  { %260 = vst [vmem:[#allocation15] sm:$0xff] %v4492_v9  ;;  %v6694_v40 = vmov 0 }
  0x6e   :  { %v262_v57 = vld [vmem:[#allocation15 + $0x4] sm:$0x3] }
  0x6f   :  { %v263_v61 = vunpack.c.0.f8e4m3b11 %v262_v57 }
  0x71   :  { %v267_v62 = vand.u32 2147483647, %v263_v61  ;;  %vm269_vm10 = vcmp.ne.f32.partialorder %v263_v61, %v263_v61  ;;  %v270_v63 = vmul.f32 16.0, %v263_v61 }
  0x73   :  { %vm4605_vm11 = vcmp.gt.f32.partialorder %v267_v62, 29.0  ;;  %v4609_v47 = vsel %vm269_vm10, -0.0, %v270_v63 }
  0x74   :  { %v6695_v40 = vsel %vm4605_vm11, 4294967295, %v6694_v40  ;;  %6697 = vst [vmem:[#allocation160_spill] sm:$0xff] %v4609_v47 }
  0x75   :  { %6696 = vst [vmem:[#allocation159_spill] sm:$0xff] %v6695_v40 }
  0x76   :  { %291 = vst [vmem:[#allocation16] sm:$0xff] %v4490_v8  ;;  %v6698_v53 = vmov 0 }
  0x7d   :  { %v293_v49 = vld [vmem:[#allocation16 + $0x6] sm:$0x3] }
  0x7e   :  { %v294_v50 = vunpack.c.0.f8e4m3b11 %v293_v49 }
  0x80   :  { %v298_v43 = vand.u32 2147483647, %v294_v50  ;;  %vm300_vm12 = vcmp.ne.f32.partialorder %v294_v50, %v294_v50  ;;  %v301_v57 = vmul.f32 16.0, %v294_v50 }
  0x82   :  { %vm4615_vm13 = vcmp.gt.f32.partialorder %v298_v43, 29.0  ;;  %v4619_v61 = vsel %vm300_vm12, -0.0, %v301_v57 }
  0x83   :  { %v6699_v53 = vsel %vm4615_vm13, 4294967295, %v6698_v53  ;;  %6701 = vst [vmem:[#allocation162_spill] sm:$0xff] %v4619_v61 }
  0x84   :  { %6700 = vst [vmem:[#allocation161_spill] sm:$0xff] %v6699_v53 }
  0x85   :  { %322 = vst [vmem:[#allocation17] sm:$0xff] %v4492_v9  ;;  %v6702_v60 = vmov 0 }
  0x8c   :  { %v324_v63 = vld [vmem:[#allocation17 + $0x6] sm:$0x3] }
  0x8d   :  { %v325_v48 = vunpack.c.0.f8e4m3b11 %v324_v63 }
  0x8f   :  { %v329_v8 = vand.u32 2147483647, %v325_v48  ;;  %vm331_vm14 = vcmp.ne.f32.partialorder %v325_v48, %v325_v48  ;;  %v332_v49 = vmul.f32 16.0, %v325_v48 }
  0x91   :  { %vm4625_vm15 = vcmp.gt.f32.partialorder %v329_v8, 29.0  ;;  %v4629_v43 = vsel %vm331_vm14, -0.0, %v332_v49 }
  0x92   :  { %v6703_v60 = vsel %vm4625_vm15, 4294967295, %v6702_v60  ;;  %6705 = vst [vmem:[#allocation164_spill] sm:$0xff] %v4629_v43 }
  0x93   :  { %6704 = vst [vmem:[#allocation163_spill] sm:$0xff] %v6703_v60 }
  0x94   :  { %353 = vst [vmem:[#allocation18] sm:$0xff] %v4494_v10  ;;  %v6706_v62 = vmov 0 }
  0x9b   :  { %v354_v57 = vld [vmem:[#allocation18] sm:$0x3] }
  0x9c   :  { %v355_v46 = vunpack.c.0.f8e4m3b11 %v354_v57 }
  0x9e   :  { %v359_v9 = vand.u32 2147483647, %v355_v46  ;;  %vm361_vm0 = vcmp.ne.f32.partialorder %v355_v46, %v355_v46  ;;  %v362_v63 = vmul.f32 16.0, %v355_v46 }
  0xa0   :  { %vm4635_vm2 = vcmp.gt.f32.partialorder %v359_v9, 29.0  ;;  %v4639_v48 = vsel %vm361_vm0, -0.0, %v362_v63 }
  0xa1   :  { %v6707_v62 = vsel %vm4635_vm2, 4294967295, %v6706_v62  ;;  %6709 = vst [vmem:[#allocation166_spill] sm:$0xff] %v4639_v48 }
  0xa2   :  { %6708 = vst [vmem:[#allocation165_spill] sm:$0xff] %v6707_v62 }
  0xa3   :  { %383 = vst [vmem:[#allocation19] sm:$0xff] %v4496_v11  ;;  %v6710_v42 = vmov 0 }
  0xaa   :  { %v384_v49 = vld [vmem:[#allocation19] sm:$0x3] }
  0xab   :  { %v385_v50 = vunpack.c.0.f8e4m3b11 %v384_v49 }
  0xad   :  { %v389_v56 = vand.u32 2147483647, %v385_v50  ;;  %vm391_vm4 = vcmp.ne.f32.partialorder %v385_v50, %v385_v50  ;;  %v392_v57 = vmul.f32 16.0, %v385_v50 }
  0xaf   :  { %vm4645_vm6 = vcmp.gt.f32.partialorder %v389_v56, 29.0  ;;  %v4649_v46 = vsel %vm391_vm4, -0.0, %v392_v57 }
  0xb0   :  { %v6711_v42 = vsel %vm4645_vm6, 4294967295, %v6710_v42  ;;  %6713 = vst [vmem:[#allocation168_spill] sm:$0xff] %v4649_v46 }
  0xb1   :  { %6712 = vst [vmem:[#allocation167_spill] sm:$0xff] %v6711_v42 }
  0xb2   :  { %413 = vst [vmem:[#allocation20] sm:$0xff] %v4494_v10  ;;  %v6714_v52 = vmov 0 }
  0xb9   :  { %v415_v63 = vld [vmem:[#allocation20 + $0x2] sm:$0x3] }
  0xba   :  { %v416_v8 = vunpack.c.0.f8e4m3b11 %v415_v63 }
  0xbc   :  { %v420_v41 = vand.u32 2147483647, %v416_v8  ;;  %vm422_vm8 = vcmp.ne.f32.partialorder %v416_v8, %v416_v8  ;;  %v423_v49 = vmul.f32 16.0, %v416_v8 }
  0xbe   :  { %vm4655_vm10 = vcmp.gt.f32.partialorder %v420_v41, 29.0  ;;  %v4659_v56 = vsel %vm422_vm8, -0.0, %v423_v49 }
  0xbf   :  { %v6715_v52 = vsel %vm4655_vm10, 4294967295, %v6714_v52  ;;  %6717 = vst [vmem:[#allocation170_spill] sm:$0xff] %v4659_v56 }
  0xc0   :  { %6716 = vst [vmem:[#allocation169_spill] sm:$0xff] %v6715_v52 }
  0xc1   :  { %444 = vst [vmem:[#allocation21] sm:$0xff] %v4496_v11  ;;  %v6718_v43 = vmov 0 }
  0xc8   :  { %v446_v57 = vld [vmem:[#allocation21 + $0x2] sm:$0x3] }
  0xc9   :  { %v447_v9 = vunpack.c.0.f8e4m3b11 %v446_v57 }
  0xcb   :  { %v451_v51 = vand.u32 2147483647, %v447_v9  ;;  %vm453_vm12 = vcmp.ne.f32.partialorder %v447_v9, %v447_v9  ;;  %v454_v63 = vmul.f32 16.0, %v447_v9 }
  0xcd   :  { %vm4665_vm14 = vcmp.gt.f32.partialorder %v451_v51, 29.0  ;;  %v4669_v41 = vsel %vm453_vm12, -0.0, %v454_v63 }
  0xce   :  { %v6719_v43 = vsel %vm4665_vm14, 4294967295, %v6718_v43  ;;  %6721 = vst [vmem:[#allocation172_spill] sm:$0xff] %v4669_v41 }
  0xcf   :  { %6720 = vst [vmem:[#allocation171_spill] sm:$0xff] %v6719_v43 }
  0xd0   :  { %475 = vst [vmem:[#allocation22] sm:$0xff] %v4494_v10  ;;  %v6722_v47 = vmov 0 }
  0xd7   :  { %v477_v49 = vld [vmem:[#allocation22 + $0x4] sm:$0x3] }
  0xd8   :  { %v478_v50 = vunpack.c.0.f8e4m3b11 %v477_v49 }
  0xda   :  { %v482_v60 = vand.u32 2147483647, %v478_v50  ;;  %vm484_vm0 = vcmp.ne.f32.partialorder %v478_v50, %v478_v50  ;;  %v485_v57 = vmul.f32 16.0, %v478_v50 }
  0xdc   :  { %vm4675_vm4 = vcmp.gt.f32.partialorder %v482_v60, 29.0  ;;  %v4679_v51 = vsel %vm484_vm0, -0.0, %v485_v57 }
  0xdd   :  { %v6723_v47 = vsel %vm4675_vm4, 4294967295, %v6722_v47  ;;  %6725 = vst [vmem:[#allocation174_spill] sm:$0xff] %v4679_v51 }
  0xde   :  { %6724 = vst [vmem:[#allocation173_spill] sm:$0xff] %v6723_v47 }
  0xdf   :  { %506 = vst [vmem:[#allocation23] sm:$0xff] %v4496_v11  ;;  %v6726_v41 = vmov 0 }
  0xe6   :  { %v508_v63 = vld [vmem:[#allocation23 + $0x4] sm:$0x3] }
  0xe7   :  { %v509_v8 = vunpack.c.0.f8e4m3b11 %v508_v63 }
  0xe9   :  { %v513_v40 = vand.u32 2147483647, %v509_v8  ;;  %vm515_vm8 = vcmp.ne.f32.partialorder %v509_v8, %v509_v8  ;;  %v516_v49 = vmul.f32 16.0, %v509_v8 }
  0xeb   :  { %vm4685_vm12 = vcmp.gt.f32.partialorder %v513_v40, 29.0  ;;  %v4689_v60 = vsel %vm515_vm8, -0.0, %v516_v49 }
  0xec   :  { %v6727_v41 = vsel %vm4685_vm12, 4294967295, %v6726_v41  ;;  %6729 = vst [vmem:[#allocation176_spill] sm:$0xff] %v4689_v60 }
  0xed   :  { %6728 = vst [vmem:[#allocation175_spill] sm:$0xff] %v6727_v41 }
  0xee   :  { %537 = vst [vmem:[#allocation24] sm:$0xff] %v4494_v10  ;;  %v6730_v46 = vmov 0 }
  0xf5   :  { %v539_v57 = vld [vmem:[#allocation24 + $0x6] sm:$0x3] }
  0xf6   :  { %v540_v9 = vunpack.c.0.f8e4m3b11 %v539_v57 }
  0xf8   :  { %v544_v43 = vand.u32 2147483647, %v540_v9  ;;  %vm546_vm0 = vcmp.ne.f32.partialorder %v540_v9, %v540_v9  ;;  %v547_v63 = vmul.f32 16.0, %v540_v9 }
  0xfa   :  { %vm4695_vm7 = vcmp.gt.f32.partialorder %v544_v43, 29.0  ;;  %v4699_v40 = vsel %vm546_vm0, -0.0, %v547_v63 }
  0xfb   :  { %v6731_v46 = vsel %vm4695_vm7, 4294967295, %v6730_v46  ;;  %6733 = vst [vmem:[#allocation178_spill] sm:$0xff] %v4699_v40 }
  0xfc   :  { %6732 = vst [vmem:[#allocation177_spill] sm:$0xff] %v6731_v46 }
  0xfd   :  { %568 = vst [vmem:[#allocation25] sm:$0xff] %v4496_v11  ;;  %v6734_v42 = vmov 0 }
 0x104   :  { %v570_v49 = vld [vmem:[#allocation25 + $0x6] sm:$0x3] }
 0x105   :  { %v571_v50 = vunpack.c.0.f8e4m3b11 %v570_v49 }
 0x107   :  { %v575_v10 = vand.u32 2147483647, %v571_v50  ;;  %vm577_vm8 = vcmp.ne.f32.partialorder %v571_v50, %v571_v50  ;;  %v578_v57 = vmul.f32 16.0, %v571_v50 }
 0x109   :  { %vm4705_vm3 = vcmp.gt.f32.partialorder %v575_v10, 29.0  ;;  %v4709_v43 = vsel %vm577_vm8, -0.0, %v578_v57 }
 0x10a   :  { %v6735_v42 = vsel %vm4705_vm3, 4294967295, %v6734_v42  ;;  %6737 = vst [vmem:[#allocation180_spill] sm:$0xff] %v4709_v43 }
 0x10b   :  { %6736 = vst [vmem:[#allocation179_spill] sm:$0xff] %v6735_v42 }
 0x10c   :  { %599 = vst [vmem:[#allocation26] sm:$0xff] %v4498_v12  ;;  %v6738_v60 = vmov 0 }
 0x113   :  { %v600_v63 = vld [vmem:[#allocation26] sm:$0x3] }
 0x114   :  { %v601_v8 = vunpack.c.0.f8e4m3b11 %v600_v63 }
 0x116   :  { %v605_v11 = vand.u32 2147483647, %v601_v8  ;;  %vm607_vm0 = vcmp.ne.f32.partialorder %v601_v8, %v601_v8  ;;  %v608_v49 = vmul.f32 16.0, %v601_v8 }
 0x118   :  { %vm4715_vm15 = vcmp.gt.f32.partialorder %v605_v11, 29.0  ;;  %v4719_v50 = vsel %vm607_vm0, -0.0, %v608_v49 }
 0x119   :  { %v6739_v60 = vsel %vm4715_vm15, 4294967295, %v6738_v60 }
 0x11a   :  { %629 = vst [vmem:[#allocation27] sm:$0xff] %v4500_v13  ;;  %v6740_v42 = vmov 0 }
 0x121   :  { %v630_v57 = vld [vmem:[#allocation27] sm:$0x3] }
 0x122   :  { %v631_v9 = vunpack.c.0.f8e4m3b11 %v630_v57 }
 0x124   :  { %v635_v43 = vand.u32 2147483647, %v631_v9  ;;  %vm637_vm8 = vcmp.ne.f32.partialorder %v631_v9, %v631_v9  ;;  %v638_v63 = vmul.f32 16.0, %v631_v9 }
 0x126   :  { %vm4725_vm11 = vcmp.gt.f32.partialorder %v635_v43, 29.0  ;;  %v4729_v8 = vsel %vm637_vm8, -0.0, %v638_v63 }
 0x127   :  { %v6741_v42 = vsel %vm4725_vm11, 4294967295, %v6740_v42  ;;  %6743 = vst [vmem:[#allocation182_spill] sm:$0xff] %v4729_v8 }
 0x128   :  { %6742 = vst [vmem:[#allocation181_spill] sm:$0xff] %v6741_v42 }
 0x129   :  { %659 = vst [vmem:[#allocation28] sm:$0xff] %v4498_v12  ;;  %v6744_v0 = vmov 0 }
 0x130   :  { %v661_v49 = vld [vmem:[#allocation28 + $0x2] sm:$0x3] }
 0x131   :  { %v662_v10 = vunpack.c.0.f8e4m3b11 %v661_v49 }
 0x133   :  { %v666_v41 = vand.u32 2147483647, %v662_v10  ;;  %vm668_vm0 = vcmp.ne.f32.partialorder %v662_v10, %v662_v10  ;;  %v669_v57 = vmul.f32 16.0, %v662_v10 }
 0x135   :  { %vm4735_vm14 = vcmp.gt.f32.partialorder %v666_v41, 29.0  ;;  %v4739_v43 = vsel %vm668_vm0, -0.0, %v669_v57 }
 0x136   :  { %v6745_v0 = vsel %vm4735_vm14, 4294967295, %v6744_v0 }
 0x137   :  { %690 = vst [vmem:[#allocation29] sm:$0xff] %v4500_v13  ;;  %v6746_v42 = vmov 0 }
 0x13e   :  { %v692_v63 = vld [vmem:[#allocation29 + $0x2] sm:$0x3] }
 0x13f   :  { %v693_v11 = vunpack.c.0.f8e4m3b11 %v692_v63 }
 0x141   :  { %v697_v8 = vand.u32 2147483647, %v693_v11  ;;  %vm699_vm8 = vcmp.ne.f32.partialorder %v693_v11, %v693_v11  ;;  %v700_v49 = vmul.f32 16.0, %v693_v11 }
 0x143   :  { %vm4745_vm6 = vcmp.gt.f32.partialorder %v697_v8, 29.0  ;;  %v4749_v41 = vsel %vm699_vm8, -0.0, %v700_v49 }
 0x144   :  { %v6747_v42 = vsel %vm4745_vm6, 4294967295, %v6746_v42  ;;  %6749 = vst [vmem:[#allocation184_spill] sm:$0xff] %v4749_v41 }
 0x145   :  { %6748 = vst [vmem:[#allocation183_spill] sm:$0xff] %v6747_v42 }
 0x146   :  { %721 = vst [vmem:[#allocation30] sm:$0xff] %v4498_v12  ;;  %v6750_v5 = vmov 0 }
 0x14d   :  { %v723_v57 = vld [vmem:[#allocation30 + $0x4] sm:$0x3] }
 0x14e   :  { %v724_v9 = vunpack.c.0.f8e4m3b11 %v723_v57 }
 0x150   :  { %v728_v4 = vand.u32 2147483647, %v724_v9  ;;  %vm730_vm0 = vcmp.ne.f32.partialorder %v724_v9, %v724_v9  ;;  %v731_v63 = vmul.f32 16.0, %v724_v9 }
 0x152   :  { %vm4755_vm3 = vcmp.gt.f32.partialorder %v728_v4, 29.0  ;;  %v4759_v8 = vsel %vm730_vm0, -0.0, %v731_v63 }
 0x153   :  { %v6751_v5 = vsel %vm4755_vm3, 4294967295, %v6750_v5 }
 0x154   :  { %752 = vst [vmem:[#allocation31] sm:$0xff] %v4500_v13  ;;  %v6752_v42 = vmov 0 }
 0x15b   :  { %v754_v49 = vld [vmem:[#allocation31 + $0x4] sm:$0x3] }
 0x15c   :  { %v755_v10 = vunpack.c.0.f8e4m3b11 %v754_v49 }
 0x15e   :  { %v759_v41 = vand.u32 2147483647, %v755_v10  ;;  %vm761_vm8 = vcmp.ne.f32.partialorder %v755_v10, %v755_v10  ;;  %v762_v57 = vmul.f32 16.0, %v755_v10 }
 0x160   :  { %vm4765_vm12 = vcmp.gt.f32.partialorder %v759_v41, 29.0  ;;  %v4769_v4 = vsel %vm761_vm8, -0.0, %v762_v57 }
 0x161   :  { %v6753_v42 = vsel %vm4765_vm12, 4294967295, %v6752_v42  ;;  %6755 = vst [vmem:[#allocation186_spill] sm:$0xff] %v4769_v4 }
 0x162   :  { %6754 = vst [vmem:[#allocation185_spill] sm:$0xff] %v6753_v42 }
 0x163   :  { %783 = vst [vmem:[#allocation32] sm:$0xff] %v4498_v12  ;;  %v6756_v2 = vmov 0 }
 0x16a   :  { %v785_v63 = vld [vmem:[#allocation32 + $0x6] sm:$0x3] }
 0x16b   :  { %v786_v11 = vunpack.c.0.f8e4m3b11 %v785_v63 }
 0x16d   :  { %v790_v1 = vand.u32 2147483647, %v786_v11  ;;  %vm792_vm0 = vcmp.ne.f32.partialorder %v786_v11, %v786_v11  ;;  %v793_v49 = vmul.f32 16.0, %v786_v11 }
 0x16f   :  { %vm4775_vm6 = vcmp.gt.f32.partialorder %v790_v1, 29.0  ;;  %v4779_v41 = vsel %vm792_vm0, -0.0, %v793_v49 }
 0x170   :  { %v6757_v2 = vsel %vm4775_vm6, 4294967295, %v6756_v2 }
 0x171   :  { %814 = vst [vmem:[#allocation33] sm:$0xff] %v4500_v13  ;;  %v6758_v4 = vmov 0 }
 0x178   :  { %v816_v57 = vld [vmem:[#allocation33 + $0x6] sm:$0x3] }
 0x179   :  { %v817_v9 = vunpack.c.0.f8e4m3b11 %v816_v57 }
 0x17b   :  { %v821_v12 = vand.u32 2147483647, %v817_v9  ;;  %vm823_vm8 = vcmp.ne.f32.partialorder %v817_v9, %v817_v9  ;;  %v824_v63 = vmul.f32 16.0, %v817_v9 }
 0x17d   :  { %vm4785_vm11 = vcmp.gt.f32.partialorder %v821_v12, 29.0  ;;  %v4789_v1 = vsel %vm823_vm8, -0.0, %v824_v63 }
 0x17e   :  { %v6759_v4 = vsel %vm4785_vm11, 4294967295, %v6758_v4  ;;  %6761 = vst [vmem:[#allocation188_spill] sm:$0xff] %v4789_v1 }
 0x17f   :  { %6760 = vst [vmem:[#allocation187_spill] sm:$0xff] %v6759_v4 }
 0x180   :  { %845 = vst [vmem:[#allocation34] sm:$0xff] %v4502_v14 }
 0x187   :  { %v846_v49 = vld [vmem:[#allocation34] sm:$0x3] }
 0x188   :  { %v847_v10 = vunpack.c.0.f8e4m3b11 %v846_v49 }
 0x18a   :  { %v851_v13 = vand.u32 2147483647, %v847_v10  ;;  %vm853_vm0 = vcmp.ne.f32.partialorder %v847_v10, %v847_v10  ;;  %v854_v57 = vmul.f32 16.0, %v847_v10 }
 0x18c   :  { %vm4795_vm12 = vcmp.gt.f32.partialorder %v851_v13, 29.0  ;;  %v4799_v9 = vsel %vm853_vm0, -0.0, %v854_v57 }
 0x18d   :  { %875 = vst [vmem:[#allocation35] sm:$0xff] %v4504_v15  ;;  %v6764_v4 = vmov 0 }
 0x194   :  { %v876_v63 = vld [vmem:[#allocation35] sm:$0x3] }
 0x195   :  { %v877_v11 = vunpack.c.0.f8e4m3b11 %v876_v63 }
 0x197   :  { %v881_v1 = vand.u32 2147483647, %v877_v11  ;;  %vm883_vm8 = vcmp.ne.f32.partialorder %v877_v11, %v877_v11  ;;  %v884_v49 = vmul.f32 16.0, %v877_v11 }
 0x199   :  { %vm4805_vm11 = vcmp.gt.f32.partialorder %v881_v1, 29.0  ;;  %v4809_v10 = vsel %vm883_vm8, -0.0, %v884_v49 }
 0x19a   :  { %v6765_v4 = vsel %vm4805_vm11, 4294967295, %v6764_v4  ;;  %6767 = vst [vmem:[#allocation190_spill] sm:$0xff] %v4809_v10 }
 0x19b   :  { %6766 = vst [vmem:[#allocation189_spill] sm:$0xff] %v6765_v4 }
 0x19c   :  { %905 = vst [vmem:[#allocation36] sm:$0xff] %v4502_v14 }
 0x1a3   :  { %v907_v57 = vld [vmem:[#allocation36 + $0x2] sm:$0x3] }
 0x1a4   :  { %v908_v12 = vunpack.c.0.f8e4m3b11 %v907_v57 }
 0x1a6   :  { %v912_v6 = vand.u32 2147483647, %v908_v12  ;;  %vm914_vm0 = vcmp.ne.f32.partialorder %v908_v12, %v908_v12  ;;  %v915_v63 = vmul.f32 16.0, %v908_v12 }
 0x1a8   :  { %vm4815_vm5 = vcmp.gt.f32.partialorder %v912_v6, 29.0  ;;  %v4819_v1 = vsel %vm914_vm0, -0.0, %v915_v63 }
 0x1a9   :  { %936 = vst [vmem:[#allocation37] sm:$0xff] %v4504_v15  ;;  %v6770_v4 = vmov 0 }
 0x1b0   :  { %v938_v49 = vld [vmem:[#allocation37 + $0x2] sm:$0x3] }
 0x1b1   :  { %v939_v13 = vunpack.c.0.f8e4m3b11 %v938_v49 }
 0x1b3   :  { %v943_v10 = vand.u32 2147483647, %v939_v13  ;;  %vm945_vm8 = vcmp.ne.f32.partialorder %v939_v13, %v939_v13  ;;  %v946_v57 = vmul.f32 16.0, %v939_v13 }
 0x1b5   :  { %vm4825_vm11 = vcmp.gt.f32.partialorder %v943_v10, 29.0  ;;  %v4829_v6 = vsel %vm945_vm8, -0.0, %v946_v57 }
 0x1b6   :  { %v6771_v4 = vsel %vm4825_vm11, 4294967295, %v6770_v4  ;;  %6773 = vst [vmem:[#allocation192_spill] sm:$0xff] %v4829_v6 }
 0x1b7   :  { %6772 = vst [vmem:[#allocation191_spill] sm:$0xff] %v6771_v4 }
 0x1b8   :  { %967 = vst [vmem:[#allocation38] sm:$0xff] %v4502_v14 }
 0x1bf   :  { %v969_v63 = vld [vmem:[#allocation38 + $0x4] sm:$0x3] }
 0x1c0   :  { %v970_v11 = vunpack.c.0.f8e4m3b11 %v969_v63 }
 0x1c2   :  { %v974_v3 = vand.u32 2147483647, %v970_v11  ;;  %vm976_vm0 = vcmp.ne.f32.partialorder %v970_v11, %v970_v11  ;;  %v977_v49 = vmul.f32 16.0, %v970_v11 }
 0x1c4   :  { %vm4835_vm1 = vcmp.gt.f32.partialorder %v974_v3, 29.0  ;;  %v4839_v10 = vsel %vm976_vm0, -0.0, %v977_v49 }
 0x1c5   :  { %998 = vst [vmem:[#allocation39] sm:$0xff] %v4504_v15  ;;  %v6776_v4 = vmov 0 }
 0x1cc   :  { %v1000_v57 = vld [vmem:[#allocation39 + $0x4] sm:$0x3] }
 0x1cd   :  { %v1001_v12 = vunpack.c.0.f8e4m3b11 %v1000_v57 }
 0x1cf   :  { %v1005_v6 = vand.u32 2147483647, %v1001_v12  ;;  %vm1007_vm8 = vcmp.ne.f32.partialorder %v1001_v12, %v1001_v12  ;;  %v1008_v63 = vmul.f32 16.0, %v1001_v12 }
 0x1d1   :  { %vm4845_vm11 = vcmp.gt.f32.partialorder %v1005_v6, 29.0  ;;  %v4849_v3 = vsel %vm1007_vm8, -0.0, %v1008_v63 }
 0x1d2   :  { %v6777_v4 = vsel %vm4845_vm11, 4294967295, %v6776_v4  ;;  %6779 = vst [vmem:[#allocation194_spill] sm:$0xff] %v4849_v3 }
 0x1d3   :  { %6778 = vst [vmem:[#allocation193_spill] sm:$0xff] %v6777_v4 }
 0x1d4   :  { %1029 = vst [vmem:[#allocation40] sm:$0xff] %v4502_v14 }
 0x1db   :  { %v1031_v49 = vld [vmem:[#allocation40 + $0x6] sm:$0x3] }
 0x1dc   :  { %v1032_v13 = vunpack.c.0.f8e4m3b11 %v1031_v49 }
 0x1de   :  { %v1036_v58 = vand.u32 2147483647, %v1032_v13  ;;  %vm1038_vm0 = vcmp.ne.f32.partialorder %v1032_v13, %v1032_v13  ;;  %v1039_v57 = vmul.f32 16.0, %v1032_v13 }
 0x1e0   :  { %vm4855_vm13 = vcmp.gt.f32.partialorder %v1036_v58, 29.0  ;;  %v4859_v6 = vsel %vm1038_vm0, -0.0, %v1039_v57 }
 0x1e1   :  { %1060 = vst [vmem:[#allocation41] sm:$0xff] %v4504_v15  ;;  %v6782_v3 = vmov 0 }
 0x1e8   :  { %v1062_v63 = vld [vmem:[#allocation41 + $0x6] sm:$0x3] }
 0x1e9   :  { %v1063_v11 = vunpack.c.0.f8e4m3b11 %v1062_v63 }
 0x1eb   :  { %v1067_v14 = vand.u32 2147483647, %v1063_v11  ;;  %vm1069_vm8 = vcmp.ne.f32.partialorder %v1063_v11, %v1063_v11  ;;  %v1070_v49 = vmul.f32 16.0, %v1063_v11 }
 0x1ed   :  { %vm4865_vm11 = vcmp.gt.f32.partialorder %v1067_v14, 29.0  ;;  %v4869_v58 = vsel %vm1069_vm8, -0.0, %v1070_v49 }
 0x1ee   :  { %v6783_v3 = vsel %vm4865_vm11, 4294967295, %v6782_v3  ;;  %6785 = vst [vmem:[#allocation196_spill] sm:$0xff] %v4869_v58 }
 0x1ef   :  { %6784 = vst [vmem:[#allocation195_spill] sm:$0xff] %v6783_v3 }
 0x1f0   :  { %1091 = vst [vmem:[#allocation42] sm:$0xff] %v4506_v16  ;;  %v6786_v4 = vmov 0 }
 0x1f7   :  { %v1092_v57 = vld [vmem:[#allocation42] sm:$0x3] }
 0x1f8   :  { %v1093_v12 = vunpack.c.0.f8e4m3b11 %v1092_v57 }
 0x1fa   :  { %v1097_v15 = vand.u32 2147483647, %v1093_v12  ;;  %vm1099_vm0 = vcmp.ne.f32.partialorder %v1093_v12, %v1093_v12  ;;  %v1100_v63 = vmul.f32 16.0, %v1093_v12 }
 0x1fc   :  { %vm4875_vm9 = vcmp.gt.f32.partialorder %v1097_v15, 29.0  ;;  %v4879_v11 = vsel %vm1099_vm0, -0.0, %v1100_v63 }
 0x1fd   :  { %v6787_v4 = vsel %vm4875_vm9, 4294967295, %v6786_v4  ;;  %6789 = vst [vmem:[#allocation198_spill] sm:$0xff] %v4879_v11 }
 0x1fe   :  { %6788 = vst [vmem:[#allocation197_spill] sm:$0xff] %v6787_v4 }
 0x1ff   :  { %1121 = vst [vmem:[#allocation43] sm:$0xff] %v4508_v17  ;;  %v6790_v3 = vmov 0 }
 0x206   :  { %v1122_v49 = vld [vmem:[#allocation43] sm:$0x3] }
 0x207   :  { %v1123_v13 = vunpack.c.0.f8e4m3b11 %v1122_v49 }
 0x209   :  { %v1127_v58 = vand.u32 2147483647, %v1123_v13  ;;  %vm1129_vm8 = vcmp.ne.f32.partialorder %v1123_v13, %v1123_v13  ;;  %v1130_v57 = vmul.f32 16.0, %v1123_v13 }
 0x20b   :  { %vm4885_vm11 = vcmp.gt.f32.partialorder %v1127_v58, 29.0  ;;  %v4889_v12 = vsel %vm1129_vm8, -0.0, %v1130_v57 }
 0x20c   :  { %v6791_v3 = vsel %vm4885_vm11, 4294967295, %v6790_v3  ;;  %6793 = vst [vmem:[#allocation200_spill] sm:$0xff] %v4889_v12 }
 0x20d   :  { %6792 = vst [vmem:[#allocation199_spill] sm:$0xff] %v6791_v3 }
 0x20e   :  { %1151 = vst [vmem:[#allocation44] sm:$0xff] %v4506_v16  ;;  %v6794_v4 = vmov 0 }
 0x215   :  { %v1153_v63 = vld [vmem:[#allocation44 + $0x2] sm:$0x3] }
 0x216   :  { %v1154_v14 = vunpack.c.0.f8e4m3b11 %v1153_v63 }
 0x218   :  { %v1158_v11 = vand.u32 2147483647, %v1154_v14  ;;  %vm1160_vm0 = vcmp.ne.f32.partialorder %v1154_v14, %v1154_v14  ;;  %v1161_v49 = vmul.f32 16.0, %v1154_v14 }
 0x21a   :  { %vm4895_vm9 = vcmp.gt.f32.partialorder %v1158_v11, 29.0  ;;  %v4899_v58 = vsel %vm1160_vm0, -0.0, %v1161_v49 }
 0x21b   :  { %v6795_v4 = vsel %vm4895_vm9, 4294967295, %v6794_v4  ;;  %6797 = vst [vmem:[#allocation202_spill] sm:$0xff] %v4899_v58 }
 0x21c   :  { %6796 = vst [vmem:[#allocation201_spill] sm:$0xff] %v6795_v4 }
 0x21d   :  { %1182 = vst [vmem:[#allocation45] sm:$0xff] %v4508_v17  ;;  %v6798_v3 = vmov 0 }
 0x224   :  { %v1184_v57 = vld [vmem:[#allocation45 + $0x2] sm:$0x3] }
 0x225   :  { %v1185_v15 = vunpack.c.0.f8e4m3b11 %v1184_v57 }
 0x227   :  { %v1189_v12 = vand.u32 2147483647, %v1185_v15  ;;  %vm1191_vm8 = vcmp.ne.f32.partialorder %v1185_v15, %v1185_v15  ;;  %v1192_v63 = vmul.f32 16.0, %v1185_v15 }
 0x229   :  { %vm4905_vm11 = vcmp.gt.f32.partialorder %v1189_v12, 29.0  ;;  %v4909_v11 = vsel %vm1191_vm8, -0.0, %v1192_v63 }
 0x22a   :  { %v6799_v3 = vsel %vm4905_vm11, 4294967295, %v6798_v3  ;;  %6801 = vst [vmem:[#allocation204_spill] sm:$0xff] %v4909_v11 }
 0x22b   :  { %6800 = vst [vmem:[#allocation203_spill] sm:$0xff] %v6799_v3 }
 0x22c   :  { %1213 = vst [vmem:[#allocation46] sm:$0xff] %v4506_v16  ;;  %v6802_v4 = vmov 0 }
 0x233   :  { %v1215_v49 = vld [vmem:[#allocation46 + $0x4] sm:$0x3] }
 0x234   :  { %v1216_v13 = vunpack.c.0.f8e4m3b11 %v1215_v49 }
 0x236   :  { %v1220_v58 = vand.u32 2147483647, %v1216_v13  ;;  %vm1222_vm0 = vcmp.ne.f32.partialorder %v1216_v13, %v1216_v13  ;;  %v1223_v57 = vmul.f32 16.0, %v1216_v13 }
 0x238   :  { %vm4915_vm9 = vcmp.gt.f32.partialorder %v1220_v58, 29.0  ;;  %v4919_v12 = vsel %vm1222_vm0, -0.0, %v1223_v57 }
 0x239   :  { %v6803_v4 = vsel %vm4915_vm9, 4294967295, %v6802_v4  ;;  %6805 = vst [vmem:[#allocation206_spill] sm:$0xff] %v4919_v12 }
 0x23a   :  { %6804 = vst [vmem:[#allocation205_spill] sm:$0xff] %v6803_v4 }
 0x23b   :  { %1244 = vst [vmem:[#allocation47] sm:$0xff] %v4508_v17  ;;  %v6806_v3 = vmov 0 }
 0x242   :  { %v1246_v63 = vld [vmem:[#allocation47 + $0x4] sm:$0x3] }
 0x243   :  { %v1247_v14 = vunpack.c.0.f8e4m3b11 %v1246_v63 }
 0x245   :  { %v1251_v11 = vand.u32 2147483647, %v1247_v14  ;;  %vm1253_vm8 = vcmp.ne.f32.partialorder %v1247_v14, %v1247_v14  ;;  %v1254_v49 = vmul.f32 16.0, %v1247_v14 }
 0x247   :  { %vm4925_vm11 = vcmp.gt.f32.partialorder %v1251_v11, 29.0  ;;  %v4929_v58 = vsel %vm1253_vm8, -0.0, %v1254_v49 }
 0x248   :  { %v6807_v3 = vsel %vm4925_vm11, 4294967295, %v6806_v3  ;;  %6809 = vst [vmem:[#allocation208_spill] sm:$0xff] %v4929_v58 }
 0x249   :  { %6808 = vst [vmem:[#allocation207_spill] sm:$0xff] %v6807_v3 }
 0x24a   :  { %1275 = vst [vmem:[#allocation48] sm:$0xff] %v4506_v16  ;;  %v6810_v12 = vmov 0 }
 0x251   :  { %v1277_v57 = vld [vmem:[#allocation48 + $0x6] sm:$0x3] }
 0x252   :  { %v1278_v15 = vunpack.c.0.f8e4m3b11 %v1277_v57 }
 0x254   :  { %v1282_v44 = vand.u32 2147483647, %v1278_v15  ;;  %vm1284_vm0 = vcmp.ne.f32.partialorder %v1278_v15, %v1278_v15  ;;  %v1285_v63 = vmul.f32 16.0, %v1278_v15 }
 0x256   :  { %vm4935_vm9 = vcmp.gt.f32.partialorder %v1282_v44, 29.0  ;;  %v4939_v11 = vsel %vm1284_vm0, -0.0, %v1285_v63 }
 0x257   :  { %v6811_v12 = vsel %vm4935_vm9, 4294967295, %v6810_v12  ;;  %6813 = vst [vmem:[#allocation210_spill] sm:$0xff] %v4939_v11 }
 0x258   :  { %6812 = vst [vmem:[#allocation209_spill] sm:$0xff] %v6811_v12 }
 0x259   :  { %1306 = vst [vmem:[#allocation49] sm:$0xff] %v4508_v17  ;;  %v6814_v58 = vmov 0 }
 0x260   :  { %v1308_v49 = vld [vmem:[#allocation49 + $0x6] sm:$0x3] }
 0x261   :  { %v1309_v13 = vunpack.c.0.f8e4m3b11 %v1308_v49 }
 0x263   :  { %v1313_v16 = vand.u32 2147483647, %v1309_v13  ;;  %vm1315_vm8 = vcmp.ne.f32.partialorder %v1309_v13, %v1309_v13  ;;  %v1316_v57 = vmul.f32 16.0, %v1309_v13 }
 0x265   :  { %vm4945_vm11 = vcmp.gt.f32.partialorder %v1313_v16, 29.0  ;;  %v4949_v44 = vsel %vm1315_vm8, -0.0, %v1316_v57 }
 0x266   :  { %v6815_v58 = vsel %vm4945_vm11, 4294967295, %v6814_v58  ;;  %6817 = vst [vmem:[#allocation212_spill] sm:$0xff] %v4949_v44 }
 0x267   :  { %6816 = vst [vmem:[#allocation211_spill] sm:$0xff] %v6815_v58 }
 0x268   :  { %1337 = vst [vmem:[#allocation50] sm:$0xff] %v4510_v18  ;;  %v6818_v3 = vmov 0 }
 0x26f   :  { %v1338_v63 = vld [vmem:[#allocation50] sm:$0x3] }
 0x270   :  { %v1339_v14 = vunpack.c.0.f8e4m3b11 %v1338_v63 }
 0x272   :  { %v1343_v17 = vand.u32 2147483647, %v1339_v14  ;;  %vm1345_vm0 = vcmp.ne.f32.partialorder %v1339_v14, %v1339_v14  ;;  %v1346_v49 = vmul.f32 16.0, %v1339_v14 }
 0x274   :  { %vm4955_vm9 = vcmp.gt.f32.partialorder %v1343_v17, 29.0  ;;  %v4959_v13 = vsel %vm1345_vm0, -0.0, %v1346_v49 }
 0x275   :  { %v6819_v3 = vsel %vm4955_vm9, 4294967295, %v6818_v3  ;;  %6821 = vst [vmem:[#allocation214_spill] sm:$0xff] %v4959_v13 }
 0x276   :  { %6820 = vst [vmem:[#allocation213_spill] sm:$0xff] %v6819_v3 }
 0x277   :  { %1367 = vst [vmem:[#allocation51] sm:$0xff] %v4512_v19  ;;  %v6822_v58 = vmov 0 }
 0x27e   :  { %v1368_v57 = vld [vmem:[#allocation51] sm:$0x3] }
 0x27f   :  { %v1369_v15 = vunpack.c.0.f8e4m3b11 %v1368_v57 }
 0x281   :  { %v1373_v44 = vand.u32 2147483647, %v1369_v15  ;;  %vm1375_vm8 = vcmp.ne.f32.partialorder %v1369_v15, %v1369_v15  ;;  %v1376_v63 = vmul.f32 16.0, %v1369_v15 }
 0x283   :  { %vm4965_vm11 = vcmp.gt.f32.partialorder %v1373_v44, 29.0  ;;  %v4969_v14 = vsel %vm1375_vm8, -0.0, %v1376_v63 }
 0x284   :  { %v6823_v58 = vsel %vm4965_vm11, 4294967295, %v6822_v58  ;;  %6825 = vst [vmem:[#allocation216_spill] sm:$0xff] %v4969_v14 }
 0x285   :  { %6824 = vst [vmem:[#allocation215_spill] sm:$0xff] %v6823_v58 }
 0x286   :  { %1397 = vst [vmem:[#allocation52] sm:$0xff] %v4510_v18  ;;  %v6826_v12 = vmov 0 }
 0x28d   :  { %v1399_v49 = vld [vmem:[#allocation52 + $0x2] sm:$0x3] }
 0x28e   :  { %v1400_v16 = vunpack.c.0.f8e4m3b11 %v1399_v49 }
 0x290   :  { %v1404_v11 = vand.u32 2147483647, %v1400_v16  ;;  %vm1406_vm0 = vcmp.ne.f32.partialorder %v1400_v16, %v1400_v16  ;;  %v1407_v57 = vmul.f32 16.0, %v1400_v16 }
 0x292   :  { %vm4975_vm9 = vcmp.gt.f32.partialorder %v1404_v11, 29.0  ;;  %v4979_v44 = vsel %vm1406_vm0, -0.0, %v1407_v57 }
 0x293   :  { %v6827_v12 = vsel %vm4975_vm9, 4294967295, %v6826_v12  ;;  %6829 = vst [vmem:[#allocation218_spill] sm:$0xff] %v4979_v44 }
 0x294   :  { %6828 = vst [vmem:[#allocation217_spill] sm:$0xff] %v6827_v12 }
 0x295   :  { %1428 = vst [vmem:[#allocation53] sm:$0xff] %v4512_v19  ;;  %v6830_v58 = vmov 0 }
 0x29c   :  { %v1430_v63 = vld [vmem:[#allocation53 + $0x2] sm:$0x3] }
 0x29d   :  { %v1431_v17 = vunpack.c.0.f8e4m3b11 %v1430_v63 }
 0x29f   :  { %v1435_v14 = vand.u32 2147483647, %v1431_v17  ;;  %vm1437_vm8 = vcmp.ne.f32.partialorder %v1431_v17, %v1431_v17  ;;  %v1438_v49 = vmul.f32 16.0, %v1431_v17 }
 0x2a1   :  { %vm4985_vm11 = vcmp.gt.f32.partialorder %v1435_v14, 29.0  ;;  %v4989_v11 = vsel %vm1437_vm8, -0.0, %v1438_v49 }
 0x2a2   :  { %v6831_v58 = vsel %vm4985_vm11, 4294967295, %v6830_v58  ;;  %6833 = vst [vmem:[#allocation220_spill] sm:$0xff] %v4989_v11 }
 0x2a3   :  { %6832 = vst [vmem:[#allocation219_spill] sm:$0xff] %v6831_v58 }
 0x2a4   :  { %1459 = vst [vmem:[#allocation54] sm:$0xff] %v4510_v18  ;;  %v6834_v61 = vmov 0 }
 0x2ab   :  { %v1461_v57 = vld [vmem:[#allocation54 + $0x4] sm:$0x3] }
 0x2ac   :  { %v1462_v15 = vunpack.c.0.f8e4m3b11 %v1461_v57 }
 0x2ae   :  { %v1466_v4 = vand.u32 2147483647, %v1462_v15  ;;  %vm1468_vm0 = vcmp.ne.f32.partialorder %v1462_v15, %v1462_v15  ;;  %v1469_v63 = vmul.f32 16.0, %v1462_v15 }
 0x2b0   :  { %vm4995_vm9 = vcmp.gt.f32.partialorder %v1466_v4, 29.0  ;;  %v4999_v14 = vsel %vm1468_vm0, -0.0, %v1469_v63 }
 0x2b1   :  { %v6835_v61 = vsel %vm4995_vm9, 4294967295, %v6834_v61  ;;  %6837 = vst [vmem:[#allocation222_spill] sm:$0xff] %v4999_v14 }
 0x2b2   :  { %6836 = vst [vmem:[#allocation221_spill] sm:$0xff] %v6835_v61 }
 0x2b3   :  { %1490 = vst [vmem:[#allocation55] sm:$0xff] %v4512_v19  ;;  %v6838_v58 = vmov 0 }
 0x2ba   :  { %v1492_v49 = vld [vmem:[#allocation55 + $0x4] sm:$0x3] }
 0x2bb   :  { %v1493_v16 = vunpack.c.0.f8e4m3b11 %v1492_v49 }
 0x2bd   :  { %v1497_v11 = vand.u32 2147483647, %v1493_v16  ;;  %vm1499_vm8 = vcmp.ne.f32.partialorder %v1493_v16, %v1493_v16  ;;  %v1500_v57 = vmul.f32 16.0, %v1493_v16 }
 0x2bf   :  { %vm5005_vm11 = vcmp.gt.f32.partialorder %v1497_v11, 29.0  ;;  %v5009_v4 = vsel %vm1499_vm8, -0.0, %v1500_v57 }
 0x2c0   :  { %v6839_v58 = vsel %vm5005_vm11, 4294967295, %v6838_v58  ;;  %6841 = vst [vmem:[#allocation224_spill] sm:$0xff] %v5009_v4 }
 0x2c1   :  { %6840 = vst [vmem:[#allocation223_spill] sm:$0xff] %v6839_v58 }
 0x2c2   :  { %1521 = vst [vmem:[#allocation56] sm:$0xff] %v4510_v18  ;;  %v6842_v55 = vmov 0 }
 0x2c9   :  { %v1523_v63 = vld [vmem:[#allocation56 + $0x6] sm:$0x3] }
 0x2ca   :  { %v1524_v17 = vunpack.c.0.f8e4m3b11 %v1523_v63 }
 0x2cc   :  { %v1528_v53 = vand.u32 2147483647, %v1524_v17  ;;  %vm1530_vm0 = vcmp.ne.f32.partialorder %v1524_v17, %v1524_v17  ;;  %v1531_v49 = vmul.f32 16.0, %v1524_v17 }
 0x2ce   :  { %vm5015_vm10 = vcmp.gt.f32.partialorder %v1528_v53, 29.0  ;;  %v5019_v11 = vsel %vm1530_vm0, -0.0, %v1531_v49 }
 0x2cf   :  { %v6843_v55 = vsel %vm5015_vm10, 4294967295, %v6842_v55  ;;  %6845 = vst [vmem:[#allocation226_spill] sm:$0xff] %v5019_v11 }
 0x2d0   :  { %6844 = vst [vmem:[#allocation225_spill] sm:$0xff] %v6843_v55 }
 0x2d1   :  { %1552 = vst [vmem:[#allocation57] sm:$0xff] %v4512_v19  ;;  %v6846_v4 = vmov 0 }
 0x2d8   :  { %v1554_v57 = vld [vmem:[#allocation57 + $0x6] sm:$0x3] }
 0x2d9   :  { %v1555_v15 = vunpack.c.0.f8e4m3b11 %v1554_v57 }
 0x2db   :  { %v1559_v18 = vand.u32 2147483647, %v1555_v15  ;;  %vm1561_vm8 = vcmp.ne.f32.partialorder %v1555_v15, %v1555_v15  ;;  %v1562_v63 = vmul.f32 16.0, %v1555_v15 }
 0x2dd   :  { %vm5025_vm11 = vcmp.gt.f32.partialorder %v1559_v18, 29.0  ;;  %v5029_v53 = vsel %vm1561_vm8, -0.0, %v1562_v63 }
 0x2de   :  { %v6847_v4 = vsel %vm5025_vm11, 4294967295, %v6846_v4  ;;  %6849 = vst [vmem:[#allocation228_spill] sm:$0xff] %v5029_v53 }
 0x2df   :  { %6848 = vst [vmem:[#allocation227_spill] sm:$0xff] %v6847_v4 }
 0x2e0   :  { %1583 = vst [vmem:[#allocation58] sm:$0xff] %v4514_v20  ;;  %v6850_v58 = vmov 0 }
 0x2e7   :  { %v1584_v49 = vld [vmem:[#allocation58] sm:$0x3] }
 0x2e8   :  { %v1585_v16 = vunpack.c.0.f8e4m3b11 %v1584_v49 }
 0x2ea   :  { %v1589_v19 = vand.u32 2147483647, %v1585_v16  ;;  %vm1591_vm0 = vcmp.ne.f32.partialorder %v1585_v16, %v1585_v16  ;;  %v1592_v57 = vmul.f32 16.0, %v1585_v16 }
 0x2ec   :  { %vm5035_vm2 = vcmp.gt.f32.partialorder %v1589_v19, 29.0  ;;  %v5039_v15 = vsel %vm1591_vm0, -0.0, %v1592_v57 }
 0x2ed   :  { %v6851_v58 = vsel %vm5035_vm2, 4294967295, %v6850_v58  ;;  %6852 = vst [vmem:[#allocation229_spill] sm:$0xff] %v5039_v15 }
 0x2ee   :  { %1613 = vst [vmem:[#allocation59] sm:$0xff] %v4516_v21  ;;  %v6853_v4 = vmov 0 }
 0x2f5   :  { %v1614_v63 = vld [vmem:[#allocation59] sm:$0x3] }
 0x2f6   :  { %v1615_v17 = vunpack.c.0.f8e4m3b11 %v1614_v63 }
 0x2f8   :  { %v1619_v53 = vand.u32 2147483647, %v1615_v17  ;;  %vm1621_vm8 = vcmp.ne.f32.partialorder %v1615_v17, %v1615_v17  ;;  %v1622_v49 = vmul.f32 16.0, %v1615_v17 }
 0x2fa   :  { %vm5045_vm11 = vcmp.gt.f32.partialorder %v1619_v53, 29.0  ;;  %v5049_v16 = vsel %vm1621_vm8, -0.0, %v1622_v49 }
 0x2fb   :  { %v6854_v4 = vsel %vm5045_vm11, 4294967295, %v6853_v4  ;;  %6856 = vst [vmem:[#allocation231_spill] sm:$0xff] %v5049_v16 }
 0x2fc   :  { %6855 = vst [vmem:[#allocation230_spill] sm:$0xff] %v6854_v4 }
 0x2fd   :  { %1643 = vst [vmem:[#allocation60] sm:$0xff] %v4514_v20  ;;  %v6857_v44 = vmov 0 }
 0x304   :  { %v1645_v57 = vld [vmem:[#allocation60 + $0x2] sm:$0x3] }
 0x305   :  { %v1646_v18 = vunpack.c.0.f8e4m3b11 %v1645_v57 }
 0x307   :  { %v1650_v54 = vand.u32 2147483647, %v1646_v18  ;;  %vm1652_vm0 = vcmp.ne.f32.partialorder %v1646_v18, %v1646_v18  ;;  %v1653_v63 = vmul.f32 16.0, %v1646_v18 }
 0x309   :  { %vm5055_vm10 = vcmp.gt.f32.partialorder %v1650_v54, 29.0  ;;  %v5059_v53 = vsel %vm1652_vm0, -0.0, %v1653_v63 }
 0x30a   :  { %v6858_v44 = vsel %vm5055_vm10, 4294967295, %v6857_v44  ;;  %6860 = vst [vmem:[#allocation233_spill] sm:$0xff] %v5059_v53 }
 0x30b   :  { %6859 = vst [vmem:[#allocation232_spill] sm:$0xff] %v6858_v44 }
 0x30c   :  { %1674 = vst [vmem:[#allocation61] sm:$0xff] %v4516_v21  ;;  %v6861_v4 = vmov 0 }
 0x313   :  { %v1676_v49 = vld [vmem:[#allocation61 + $0x2] sm:$0x3] }
 0x314   :  { %v1677_v19 = vunpack.c.0.f8e4m3b11 %v1676_v49 }
 0x316   :  { %v1681_v16 = vand.u32 2147483647, %v1677_v19  ;;  %vm1683_vm8 = vcmp.ne.f32.partialorder %v1677_v19, %v1677_v19  ;;  %v1684_v57 = vmul.f32 16.0, %v1677_v19 }
 0x318   :  { %vm5065_vm11 = vcmp.gt.f32.partialorder %v1681_v16, 29.0  ;;  %v5069_v54 = vsel %vm1683_vm8, -0.0, %v1684_v57 }
 0x319   :  { %v6862_v4 = vsel %vm5065_vm11, 4294967295, %v6861_v4  ;;  %6864 = vst [vmem:[#allocation235_spill] sm:$0xff] %v5069_v54 }
 0x31a   :  { %6863 = vst [vmem:[#allocation234_spill] sm:$0xff] %v6862_v4 }
 0x31b   :  { %1705 = vst [vmem:[#allocation62] sm:$0xff] %v4514_v20  ;;  %v6865_v13 = vmov 0 }
 0x322   :  { %v1707_v63 = vld [vmem:[#allocation62 + $0x4] sm:$0x3] }
 0x323   :  { %v1708_v17 = vunpack.c.0.f8e4m3b11 %v1707_v63 }
 0x325   :  { %v1712_v12 = vand.u32 2147483647, %v1708_v17  ;;  %vm1714_vm0 = vcmp.ne.f32.partialorder %v1708_v17, %v1708_v17  ;;  %v1715_v49 = vmul.f32 16.0, %v1708_v17 }
 0x327   :  { %vm5075_vm9 = vcmp.gt.f32.partialorder %v1712_v12, 29.0  ;;  %v5079_v16 = vsel %vm1714_vm0, -0.0, %v1715_v49 }
 0x328   :  { %v6866_v13 = vsel %vm5075_vm9, 4294967295, %v6865_v13 }
 0x329   :  { %1736 = vst [vmem:[#allocation63] sm:$0xff] %v4516_v21  ;;  %v6867_v4 = vmov 0 }
 0x330   :  { %v1738_v57 = vld [vmem:[#allocation63 + $0x4] sm:$0x3] }
 0x331   :  { %v1739_v18 = vunpack.c.0.f8e4m3b11 %v1738_v57 }
 0x333   :  { %v1743_v54 = vand.u32 2147483647, %v1739_v18  ;;  %vm1745_vm8 = vcmp.ne.f32.partialorder %v1739_v18, %v1739_v18  ;;  %v1746_v63 = vmul.f32 16.0, %v1739_v18 }
 0x335   :  { %vm5085_vm11 = vcmp.gt.f32.partialorder %v1743_v54, 29.0  ;;  %v5089_v12 = vsel %vm1745_vm8, -0.0, %v1746_v63 }
 0x336   :  { %v6868_v4 = vsel %vm5085_vm11, 4294967295, %v6867_v4  ;;  %6870 = vst [vmem:[#allocation237_spill] sm:$0xff] %v5089_v12 }
 0x337   :  { %6869 = vst [vmem:[#allocation236_spill] sm:$0xff] %v6868_v4 }
 0x338   :  { %1767 = vst [vmem:[#allocation64] sm:$0xff] %v4514_v20  ;;  %v6871_v56 = vmov 0 }
 0x33f   :  { %v1769_v49 = vld [vmem:[#allocation64 + $0x6] sm:$0x3] }
 0x340   :  { %v1770_v19 = vunpack.c.0.f8e4m3b11 %v1769_v49 }
 0x342   :  { %v1774_v3 = vand.u32 2147483647, %v1770_v19  ;;  %vm1776_vm0 = vcmp.ne.f32.partialorder %v1770_v19, %v1770_v19  ;;  %v1777_v57 = vmul.f32 16.0, %v1770_v19 }
 0x344   :  { %vm5095_vm7 = vcmp.gt.f32.partialorder %v1774_v3, 29.0  ;;  %v5099_v54 = vsel %vm1776_vm0, -0.0, %v1777_v57 }
 0x345   :  { %v6872_v56 = vsel %vm5095_vm7, 4294967295, %v6871_v56 }
 0x346   :  { %1798 = vst [vmem:[#allocation65] sm:$0xff] %v4516_v21  ;;  %v6873_v12 = vmov 0 }
 0x34d   :  { %v1800_v63 = vld [vmem:[#allocation65 + $0x6] sm:$0x3] }
 0x34e   :  { %v1801_v17 = vunpack.c.0.f8e4m3b11 %v1800_v63 }
 0x350   :  { %v1805_v20 = vand.u32 2147483647, %v1801_v17  ;;  %vm1807_vm8 = vcmp.ne.f32.partialorder %v1801_v17, %v1801_v17  ;;  %v1808_v49 = vmul.f32 16.0, %v1801_v17 }
 0x352   :  { %vm5105_vm11 = vcmp.gt.f32.partialorder %v1805_v20, 29.0  ;;  %v5109_v3 = vsel %vm1807_vm8, -0.0, %v1808_v49 }
 0x353   :  { %v6874_v12 = vsel %vm5105_vm11, 4294967295, %v6873_v12  ;;  %6876 = vst [vmem:[#allocation239_spill] sm:$0xff] %v5109_v3 }
 0x354   :  { %6875 = vst [vmem:[#allocation238_spill] sm:$0xff] %v6874_v12 }
 0x355   :  { %1829 = vst [vmem:[#allocation66] sm:$0xff] %v4518_v22 }
 0x35c   :  { %v1830_v57 = vld [vmem:[#allocation66] sm:$0x3] }
 0x35d   :  { %v1831_v18 = vunpack.c.0.f8e4m3b11 %v1830_v57 }
 0x35f   :  { %v1835_v21 = vand.u32 2147483647, %v1831_v18  ;;  %vm1837_vm0 = vcmp.ne.f32.partialorder %v1831_v18, %v1831_v18  ;;  %v1838_v63 = vmul.f32 16.0, %v1831_v18 }
 0x361   :  { %vm5115_vm4 = vcmp.gt.f32.partialorder %v1835_v21, 29.0  ;;  %v5119_v17 = vsel %vm1837_vm0, -0.0, %v1838_v63 }
 0x362   :  { %1859 = vst [vmem:[#allocation67] sm:$0xff] %v4520_v23  ;;  %v6879_v12 = vmov 0 }
 0x369   :  { %v1860_v49 = vld [vmem:[#allocation67] sm:$0x3] }
 0x36a   :  { %v1861_v19 = vunpack.c.0.f8e4m3b11 %v1860_v49 }
 0x36c   :  { %v1865_v3 = vand.u32 2147483647, %v1861_v19  ;;  %vm1867_vm8 = vcmp.ne.f32.partialorder %v1861_v19, %v1861_v19  ;;  %v1868_v57 = vmul.f32 16.0, %v1861_v19 }
 0x36e   :  { %vm5125_vm11 = vcmp.gt.f32.partialorder %v1865_v3, 29.0  ;;  %v5129_v18 = vsel %vm1867_vm8, -0.0, %v1868_v57 }
 0x36f   :  { %v6880_v12 = vsel %vm5125_vm11, 4294967295, %v6879_v12  ;;  %6882 = vst [vmem:[#allocation241_spill] sm:$0xff] %v5129_v18 }
 0x370   :  { %6881 = vst [vmem:[#allocation240_spill] sm:$0xff] %v6880_v12 }
 0x371   :  { %1889 = vst [vmem:[#allocation68] sm:$0xff] %v4518_v22 }
 0x378   :  { %v1891_v63 = vld [vmem:[#allocation68 + $0x2] sm:$0x3] }
 0x379   :  { %v1892_v20 = vunpack.c.0.f8e4m3b11 %v1891_v63 }
 0x37b   :  { %v1896_v52 = vand.u32 2147483647, %v1892_v20  ;;  %vm1898_vm0 = vcmp.ne.f32.partialorder %v1892_v20, %v1892_v20  ;;  %v1899_v49 = vmul.f32 16.0, %v1892_v20 }
 0x37d   :  { %vm5135_vm10 = vcmp.gt.f32.partialorder %v1896_v52, 29.0  ;;  %v5139_v3 = vsel %vm1898_vm0, -0.0, %v1899_v49 }
 0x37e   :  { %1920 = vst [vmem:[#allocation69] sm:$0xff] %v4520_v23  ;;  %v6885_v12 = vmov 0 }
 0x385   :  { %v1922_v57 = vld [vmem:[#allocation69 + $0x2] sm:$0x3] }
 0x386   :  { %v1923_v21 = vunpack.c.0.f8e4m3b11 %v1922_v57 }
 0x388   :  { %v1927_v18 = vand.u32 2147483647, %v1923_v21  ;;  %vm1929_vm8 = vcmp.ne.f32.partialorder %v1923_v21, %v1923_v21  ;;  %v1930_v63 = vmul.f32 16.0, %v1923_v21 }
 0x38a   :  { %vm5145_vm11 = vcmp.gt.f32.partialorder %v1927_v18, 29.0  ;;  %v5149_v52 = vsel %vm1929_vm8, -0.0, %v1930_v63 }
 0x38b   :  { %v6886_v12 = vsel %vm5145_vm11, 4294967295, %v6885_v12  ;;  %6888 = vst [vmem:[#allocation243_spill] sm:$0xff] %v5149_v52 }
 0x38c   :  { %6887 = vst [vmem:[#allocation242_spill] sm:$0xff] %v6886_v12 }
 0x38d   :  { %1951 = vst [vmem:[#allocation70] sm:$0xff] %v4518_v22 }
 0x394   :  { %v1953_v49 = vld [vmem:[#allocation70 + $0x4] sm:$0x3] }
 0x395   :  { %v1954_v19 = vunpack.c.0.f8e4m3b11 %v1953_v49 }
 0x397   :  { %v1958_v62 = vand.u32 2147483647, %v1954_v19  ;;  %vm1960_vm0 = vcmp.ne.f32.partialorder %v1954_v19, %v1954_v19  ;;  %v1961_v57 = vmul.f32 16.0, %v1954_v19 }
 0x399   :  { %vm5155_vm2 = vcmp.gt.f32.partialorder %v1958_v62, 29.0  ;;  %v5159_v18 = vsel %vm1960_vm0, -0.0, %v1961_v57 }
 0x39a   :  { %1982 = vst [vmem:[#allocation71] sm:$0xff] %v4520_v23  ;;  %v6891_v12 = vmov 0 }
 0x3a1   :  { %v1984_v63 = vld [vmem:[#allocation71 + $0x4] sm:$0x3] }
 0x3a2   :  { %v1985_v20 = vunpack.c.0.f8e4m3b11 %v1984_v63 }
 0x3a4   :  { %v1989_v52 = vand.u32 2147483647, %v1985_v20  ;;  %vm1991_vm8 = vcmp.ne.f32.partialorder %v1985_v20, %v1985_v20  ;;  %v1992_v49 = vmul.f32 16.0, %v1985_v20 }
 0x3a6   :  { %vm5165_vm11 = vcmp.gt.f32.partialorder %v1989_v52, 29.0  ;;  %v5169_v62 = vsel %vm1991_vm8, -0.0, %v1992_v49 }
 0x3a7   :  { %v6892_v12 = vsel %vm5165_vm11, 4294967295, %v6891_v12  ;;  %6894 = vst [vmem:[#allocation245_spill] sm:$0xff] %v5169_v62 }
 0x3a8   :  { %6893 = vst [vmem:[#allocation244_spill] sm:$0xff] %v6892_v12 }
 0x3a9   :  { %2013 = vst [vmem:[#allocation72] sm:$0xff] %v4518_v22 }
 0x3b0   :  { %v2015_v57 = vld [vmem:[#allocation72 + $0x6] sm:$0x3] }
 0x3b1   :  { %v2016_v21 = vunpack.c.0.f8e4m3b11 %v2015_v57 }
 0x3b3   :  { %v2020_v55 = vand.u32 2147483647, %v2016_v21  ;;  %vm2022_vm0 = vcmp.ne.f32.partialorder %v2016_v21, %v2016_v21  ;;  %v2023_v63 = vmul.f32 16.0, %v2016_v21 }
 0x3b5   :  { %vm5175_vm14 = vcmp.gt.f32.partialorder %v2020_v55, 29.0  ;;  %v5179_v52 = vsel %vm2022_vm0, -0.0, %v2023_v63 }
 0x3b6   :  { %2044 = vst [vmem:[#allocation73] sm:$0xff] %v4520_v23  ;;  %v6897_v62 = vmov 0 }
 0x3bd   :  { %v2046_v49 = vld [vmem:[#allocation73 + $0x6] sm:$0x3] }
 0x3be   :  { %v2047_v19 = vunpack.c.0.f8e4m3b11 %v2046_v49 }
 0x3c0   :  { %v2051_v22 = vand.u32 2147483647, %v2047_v19  ;;  %vm2053_vm8 = vcmp.ne.f32.partialorder %v2047_v19, %v2047_v19  ;;  %v2054_v57 = vmul.f32 16.0, %v2047_v19 }
 0x3c2   :  { %vm5185_vm11 = vcmp.gt.f32.partialorder %v2051_v22, 29.0  ;;  %v5189_v55 = vsel %vm2053_vm8, -0.0, %v2054_v57 }
 0x3c3   :  { %v6898_v62 = vsel %vm5185_vm11, 4294967295, %v6897_v62  ;;  %6900 = vst [vmem:[#allocation247_spill] sm:$0xff] %v5189_v55 }
 0x3c4   :  { %6899 = vst [vmem:[#allocation246_spill] sm:$0xff] %v6898_v62 }
 0x3c5   :  { %2075 = vst [vmem:[#allocation74] sm:$0xff] %v4522_v24  ;;  %v6901_v12 = vmov 0 }
 0x3cc   :  { %v2076_v63 = vld [vmem:[#allocation74] sm:$0x3] }
 0x3cd   :  { %v2077_v20 = vunpack.c.0.f8e4m3b11 %v2076_v63 }
 0x3cf   :  { %v2081_v23 = vand.u32 2147483647, %v2077_v20  ;;  %vm2083_vm0 = vcmp.ne.f32.partialorder %v2077_v20, %v2077_v20  ;;  %v2084_v49 = vmul.f32 16.0, %v2077_v20 }
 0x3d1   :  { %vm5195_vm15 = vcmp.gt.f32.partialorder %v2081_v23, 29.0  ;;  %v5199_v19 = vsel %vm2083_vm0, -0.0, %v2084_v49 }
 0x3d2   :  { %v6902_v12 = vsel %vm5195_vm15, 4294967295, %v6901_v12  ;;  %6904 = vst [vmem:[#allocation249_spill] sm:$0xff] %v5199_v19 }
 0x3d3   :  { %6903 = vst [vmem:[#allocation248_spill] sm:$0xff] %v6902_v12 }
 0x3d4   :  { %2105 = vst [vmem:[#allocation75] sm:$0xff] %v4524_v25  ;;  %v6905_v62 = vmov 0 }
 0x3db   :  { %v2106_v57 = vld [vmem:[#allocation75] sm:$0x3] }
 0x3dc   :  { %v2107_v21 = vunpack.c.0.f8e4m3b11 %v2106_v57 }
 0x3de   :  { %v2111_v55 = vand.u32 2147483647, %v2107_v21  ;;  %vm2113_vm8 = vcmp.ne.f32.partialorder %v2107_v21, %v2107_v21  ;;  %v2114_v63 = vmul.f32 16.0, %v2107_v21 }
 0x3e0   :  { %vm5205_vm11 = vcmp.gt.f32.partialorder %v2111_v55, 29.0  ;;  %v5209_v20 = vsel %vm2113_vm8, -0.0, %v2114_v63 }
 0x3e1   :  { %v6906_v62 = vsel %vm5205_vm11, 4294967295, %v6905_v62  ;;  %6908 = vst [vmem:[#allocation251_spill] sm:$0xff] %v5209_v20 }
 0x3e2   :  { %6907 = vst [vmem:[#allocation250_spill] sm:$0xff] %v6906_v62 }
 0x3e3   :  { %2135 = vst [vmem:[#allocation76] sm:$0xff] %v4522_v24  ;;  %v6909_v12 = vmov 0 }
 0x3ea   :  { %v2137_v49 = vld [vmem:[#allocation76 + $0x2] sm:$0x3] }
 0x3eb   :  { %v2138_v22 = vunpack.c.0.f8e4m3b11 %v2137_v49 }
 0x3ed   :  { %v2142_v19 = vand.u32 2147483647, %v2138_v22  ;;  %vm2144_vm0 = vcmp.ne.f32.partialorder %v2138_v22, %v2138_v22  ;;  %v2145_v57 = vmul.f32 16.0, %v2138_v22 }
 0x3ef   :  { %vm5215_vm15 = vcmp.gt.f32.partialorder %v2142_v19, 29.0  ;;  %v5219_v55 = vsel %vm2144_vm0, -0.0, %v2145_v57 }
 0x3f0   :  { %v6910_v12 = vsel %vm5215_vm15, 4294967295, %v6909_v12  ;;  %6912 = vst [vmem:[#allocation253_spill] sm:$0xff] %v5219_v55 }
 0x3f1   :  { %6911 = vst [vmem:[#allocation252_spill] sm:$0xff] %v6910_v12 }
 0x3f2   :  { %2166 = vst [vmem:[#allocation77] sm:$0xff] %v4524_v25  ;;  %v6913_v62 = vmov 0 }
 0x3f9   :  { %v2168_v63 = vld [vmem:[#allocation77 + $0x2] sm:$0x3] }
 0x3fa   :  { %v2169_v23 = vunpack.c.0.f8e4m3b11 %v2168_v63 }
 0x3fc   :  { %v2173_v20 = vand.u32 2147483647, %v2169_v23  ;;  %vm2175_vm8 = vcmp.ne.f32.partialorder %v2169_v23, %v2169_v23  ;;  %v2176_v49 = vmul.f32 16.0, %v2169_v23 }
 0x3fe   :  { %vm5225_vm11 = vcmp.gt.f32.partialorder %v2173_v20, 29.0  ;;  %v5229_v19 = vsel %vm2175_vm8, -0.0, %v2176_v49 }
 0x3ff   :  { %v6914_v62 = vsel %vm5225_vm11, 4294967295, %v6913_v62  ;;  %6916 = vst [vmem:[#allocation255_spill] sm:$0xff] %v5229_v19 }
 0x400   :  { %6915 = vst [vmem:[#allocation254_spill] sm:$0xff] %v6914_v62 }
 0x401   :  { %2197 = vst [vmem:[#allocation78] sm:$0xff] %v4522_v24  ;;  %v6917_v12 = vmov 0 }
 0x408   :  { %v2199_v57 = vld [vmem:[#allocation78 + $0x4] sm:$0x3] }
 0x409   :  { %v2200_v21 = vunpack.c.0.f8e4m3b11 %v2199_v57 }
 0x40b   :  { %v2204_v55 = vand.u32 2147483647, %v2200_v21  ;;  %vm2206_vm0 = vcmp.ne.f32.partialorder %v2200_v21, %v2200_v21  ;;  %v2207_v63 = vmul.f32 16.0, %v2200_v21 }
 0x40d   :  { %vm5235_vm15 = vcmp.gt.f32.partialorder %v2204_v55, 29.0  ;;  %v5239_v20 = vsel %vm2206_vm0, -0.0, %v2207_v63 }
 0x40e   :  { %v6918_v12 = vsel %vm5235_vm15, 4294967295, %v6917_v12  ;;  %6920 = vst [vmem:[#allocation257_spill] sm:$0xff] %v5239_v20 }
 0x40f   :  { %6919 = vst [vmem:[#allocation256_spill] sm:$0xff] %v6918_v12 }
 0x410   :  { %2228 = vst [vmem:[#allocation79] sm:$0xff] %v4524_v25  ;;  %v6921_v62 = vmov 0 }
 0x417   :  { %v2230_v49 = vld [vmem:[#allocation79 + $0x4] sm:$0x3] }
 0x418   :  { %v2231_v22 = vunpack.c.0.f8e4m3b11 %v2230_v49 }
 0x41a   :  { %v2235_v19 = vand.u32 2147483647, %v2231_v22  ;;  %vm2237_vm8 = vcmp.ne.f32.partialorder %v2231_v22, %v2231_v22  ;;  %v2238_v57 = vmul.f32 16.0, %v2231_v22 }
 0x41c   :  { %vm5245_vm11 = vcmp.gt.f32.partialorder %v2235_v19, 29.0  ;;  %v5249_v55 = vsel %vm2237_vm8, -0.0, %v2238_v57 }
 0x41d   :  { %v6922_v62 = vsel %vm5245_vm11, 4294967295, %v6921_v62  ;;  %6924 = vst [vmem:[#allocation259_spill] sm:$0xff] %v5249_v55 }
 0x41e   :  { %6923 = vst [vmem:[#allocation258_spill] sm:$0xff] %v6922_v62 }
 0x41f   :  { %2259 = vst [vmem:[#allocation80] sm:$0xff] %v4522_v24  ;;  %v6925_v12 = vmov 0 }
 0x426   :  { %v2261_v63 = vld [vmem:[#allocation80 + $0x6] sm:$0x3] }
 0x427   :  { %v2262_v23 = vunpack.c.0.f8e4m3b11 %v2261_v63 }
 0x429   :  { %v2266_v20 = vand.u32 2147483647, %v2262_v23  ;;  %vm2268_vm0 = vcmp.ne.f32.partialorder %v2262_v23, %v2262_v23  ;;  %v2269_v49 = vmul.f32 16.0, %v2262_v23 }
 0x42b   :  { %vm5255_vm15 = vcmp.gt.f32.partialorder %v2266_v20, 29.0  ;;  %v5259_v19 = vsel %vm2268_vm0, -0.0, %v2269_v49 }
 0x42c   :  { %v6926_v12 = vsel %vm5255_vm15, 4294967295, %v6925_v12  ;;  %6928 = vst [vmem:[#allocation261_spill] sm:$0xff] %v5259_v19 }
 0x42d   :  { %6927 = vst [vmem:[#allocation260_spill] sm:$0xff] %v6926_v12 }
 0x42e   :  { %2290 = vst [vmem:[#allocation81] sm:$0xff] %v4524_v25  ;;  %v6929_v55 = vmov 0 }
 0x435   :  { %v2292_v57 = vld [vmem:[#allocation81 + $0x6] sm:$0x3] }
 0x436   :  { %v2293_v21 = vunpack.c.0.f8e4m3b11 %v2292_v57 }
 0x438   :  { %v2297_v24 = vand.u32 2147483647, %v2293_v21  ;;  %vm2299_vm8 = vcmp.ne.f32.partialorder %v2293_v21, %v2293_v21  ;;  %v2300_v63 = vmul.f32 16.0, %v2293_v21 }
 0x43a   :  { %vm5265_vm11 = vcmp.gt.f32.partialorder %v2297_v24, 29.0  ;;  %v5269_v20 = vsel %vm2299_vm8, -0.0, %v2300_v63 }
 0x43b   :  { %v6930_v55 = vsel %vm5265_vm11, 4294967295, %v6929_v55  ;;  %6932 = vst [vmem:[#allocation263_spill] sm:$0xff] %v5269_v20 }
 0x43c   :  { %6931 = vst [vmem:[#allocation262_spill] sm:$0xff] %v6930_v55 }
 0x43d   :  { %2321 = vst [vmem:[#allocation82] sm:$0xff] %v4526_v26  ;;  %v6933_v62 = vmov 0 }
 0x444   :  { %v2322_v49 = vld [vmem:[#allocation82] sm:$0x3] }
 0x445   :  { %v2323_v22 = vunpack.c.0.f8e4m3b11 %v2322_v49 }
 0x447   :  { %v2327_v25 = vand.u32 2147483647, %v2323_v22  ;;  %vm2329_vm0 = vcmp.ne.f32.partialorder %v2323_v22, %v2323_v22  ;;  %v2330_v57 = vmul.f32 16.0, %v2323_v22 }
 0x449   :  { %vm5275_vm15 = vcmp.gt.f32.partialorder %v2327_v25, 29.0  ;;  %v5279_v21 = vsel %vm2329_vm0, -0.0, %v2330_v57 }
 0x44a   :  { %v6934_v62 = vsel %vm5275_vm15, 4294967295, %v6933_v62  ;;  %6936 = vst [vmem:[#allocation265_spill] sm:$0xff] %v5279_v21 }
 0x44b   :  { %6935 = vst [vmem:[#allocation264_spill] sm:$0xff] %v6934_v62 }
 0x44c   :  { %2351 = vst [vmem:[#allocation83] sm:$0xff] %v4528_v27  ;;  %v6937_v55 = vmov 0 }
 0x453   :  { %v2352_v63 = vld [vmem:[#allocation83] sm:$0x3] }
 0x454   :  { %v2353_v23 = vunpack.c.0.f8e4m3b11 %v2352_v63 }
 0x456   :  { %v2357_v20 = vand.u32 2147483647, %v2353_v23  ;;  %vm2359_vm8 = vcmp.ne.f32.partialorder %v2353_v23, %v2353_v23  ;;  %v2360_v49 = vmul.f32 16.0, %v2353_v23 }
 0x458   :  { %vm5285_vm11 = vcmp.gt.f32.partialorder %v2357_v20, 29.0  ;;  %v5289_v22 = vsel %vm2359_vm8, -0.0, %v2360_v49 }
 0x459   :  { %v6938_v55 = vsel %vm5285_vm11, 4294967295, %v6937_v55  ;;  %6940 = vst [vmem:[#allocation267_spill] sm:$0xff] %v5289_v22 }
 0x45a   :  { %6939 = vst [vmem:[#allocation266_spill] sm:$0xff] %v6938_v55 }
 0x45b   :  { %2381 = vst [vmem:[#allocation84] sm:$0xff] %v4526_v26  ;;  %v6941_v12 = vmov 0 }
 0x462   :  { %v2383_v57 = vld [vmem:[#allocation84 + $0x2] sm:$0x3] }
 0x463   :  { %v2384_v24 = vunpack.c.0.f8e4m3b11 %v2383_v57 }
 0x465   :  { %v2388_v19 = vand.u32 2147483647, %v2384_v24  ;;  %vm2390_vm0 = vcmp.ne.f32.partialorder %v2384_v24, %v2384_v24  ;;  %v2391_v63 = vmul.f32 16.0, %v2384_v24 }
 0x467   :  { %vm5295_vm15 = vcmp.gt.f32.partialorder %v2388_v19, 29.0  ;;  %v5299_v20 = vsel %vm2390_vm0, -0.0, %v2391_v63 }
 0x468   :  { %v6942_v12 = vsel %vm5295_vm15, 4294967295, %v6941_v12  ;;  %6944 = vst [vmem:[#allocation269_spill] sm:$0xff] %v5299_v20 }
 0x469   :  { %6943 = vst [vmem:[#allocation268_spill] sm:$0xff] %v6942_v12 }
 0x46a   :  { %2412 = vst [vmem:[#allocation85] sm:$0xff] %v4528_v27  ;;  %v6945_v55 = vmov 0 }
 0x471   :  { %v2414_v49 = vld [vmem:[#allocation85 + $0x2] sm:$0x3] }
 0x472   :  { %v2415_v25 = vunpack.c.0.f8e4m3b11 %v2414_v49 }
 0x474   :  { %v2419_v22 = vand.u32 2147483647, %v2415_v25  ;;  %vm2421_vm8 = vcmp.ne.f32.partialorder %v2415_v25, %v2415_v25  ;;  %v2422_v57 = vmul.f32 16.0, %v2415_v25 }
 0x476   :  { %vm5305_vm11 = vcmp.gt.f32.partialorder %v2419_v22, 29.0  ;;  %v5309_v19 = vsel %vm2421_vm8, -0.0, %v2422_v57 }
 0x477   :  { %v6946_v55 = vsel %vm5305_vm11, 4294967295, %v6945_v55  ;;  %6948 = vst [vmem:[#allocation271_spill] sm:$0xff] %v5309_v19 }
 0x478   :  { %6947 = vst [vmem:[#allocation270_spill] sm:$0xff] %v6946_v55 }
 0x479   :  { %2443 = vst [vmem:[#allocation86] sm:$0xff] %v4526_v26  ;;  %v6949_v12 = vmov 0 }
 0x480   :  { %v2445_v63 = vld [vmem:[#allocation86 + $0x4] sm:$0x3] }
 0x481   :  { %v2446_v23 = vunpack.c.0.f8e4m3b11 %v2445_v63 }
 0x483   :  { %v2450_v20 = vand.u32 2147483647, %v2446_v23  ;;  %vm2452_vm0 = vcmp.ne.f32.partialorder %v2446_v23, %v2446_v23  ;;  %v2453_v49 = vmul.f32 16.0, %v2446_v23 }
 0x485   :  { %vm5315_vm15 = vcmp.gt.f32.partialorder %v2450_v20, 29.0  ;;  %v5319_v22 = vsel %vm2452_vm0, -0.0, %v2453_v49 }
 0x486   :  { %v6950_v12 = vsel %vm5315_vm15, 4294967295, %v6949_v12  ;;  %6952 = vst [vmem:[#allocation273_spill] sm:$0xff] %v5319_v22 }
 0x487   :  { %6951 = vst [vmem:[#allocation272_spill] sm:$0xff] %v6950_v12 }
 0x488   :  { %2474 = vst [vmem:[#allocation87] sm:$0xff] %v4528_v27  ;;  %v6953_v55 = vmov 0 }
 0x48f   :  { %v2476_v57 = vld [vmem:[#allocation87 + $0x4] sm:$0x3] }
 0x490   :  { %v2477_v24 = vunpack.c.0.f8e4m3b11 %v2476_v57 }
 0x492   :  { %v2481_v19 = vand.u32 2147483647, %v2477_v24  ;;  %vm2483_vm8 = vcmp.ne.f32.partialorder %v2477_v24, %v2477_v24  ;;  %v2484_v63 = vmul.f32 16.0, %v2477_v24 }
 0x494   :  { %vm5325_vm11 = vcmp.gt.f32.partialorder %v2481_v19, 29.0  ;;  %v5329_v20 = vsel %vm2483_vm8, -0.0, %v2484_v63 }
 0x495   :  { %v6954_v55 = vsel %vm5325_vm11, 4294967295, %v6953_v55  ;;  %6956 = vst [vmem:[#allocation275_spill] sm:$0xff] %v5329_v20 }
 0x496   :  { %6955 = vst [vmem:[#allocation274_spill] sm:$0xff] %v6954_v55 }
 0x497   :  { %2505 = vst [vmem:[#allocation88] sm:$0xff] %v4526_v26  ;;  %v6957_v62 = vmov 0 }
 0x49e   :  { %v2507_v49 = vld [vmem:[#allocation88 + $0x6] sm:$0x3] }
 0x49f   :  { %v2508_v25 = vunpack.c.0.f8e4m3b11 %v2507_v49 }
 0x4a1   :  { %v2512_v21 = vand.u32 2147483647, %v2508_v25  ;;  %vm2514_vm0 = vcmp.ne.f32.partialorder %v2508_v25, %v2508_v25  ;;  %v2515_v57 = vmul.f32 16.0, %v2508_v25 }
 0x4a3   :  { %vm5335_vm15 = vcmp.gt.f32.partialorder %v2512_v21, 29.0  ;;  %v5339_v19 = vsel %vm2514_vm0, -0.0, %v2515_v57 }
 0x4a4   :  { %v6958_v62 = vsel %vm5335_vm15, 4294967295, %v6957_v62  ;;  %6960 = vst [vmem:[#allocation277_spill] sm:$0xff] %v5339_v19 }
 0x4a5   :  { %6959 = vst [vmem:[#allocation276_spill] sm:$0xff] %v6958_v62 }
 0x4a6   :  { %2536 = vst [vmem:[#allocation89] sm:$0xff] %v4528_v27  ;;  %v6961_v20 = vmov 0 }
 0x4ad   :  { %v2538_v63 = vld [vmem:[#allocation89 + $0x6] sm:$0x3] }
 0x4ae   :  { %v2539_v23 = vunpack.c.0.f8e4m3b11 %v2538_v63 }
 0x4b0   :  { %v2543_v26 = vand.u32 2147483647, %v2539_v23  ;;  %vm2545_vm8 = vcmp.ne.f32.partialorder %v2539_v23, %v2539_v23  ;;  %v2546_v49 = vmul.f32 16.0, %v2539_v23 }
 0x4b2   :  { %vm5345_vm11 = vcmp.gt.f32.partialorder %v2543_v26, 29.0  ;;  %v5349_v21 = vsel %vm2545_vm8, -0.0, %v2546_v49 }
 0x4b3   :  { %v6962_v20 = vsel %vm5345_vm11, 4294967295, %v6961_v20  ;;  %6964 = vst [vmem:[#allocation279_spill] sm:$0xff] %v5349_v21 }
 0x4b4   :  { %6963 = vst [vmem:[#allocation278_spill] sm:$0xff] %v6962_v20 }
 0x4b5   :  { %2567 = vst [vmem:[#allocation90] sm:$0xff] %v4530_v28  ;;  %v6965_v55 = vmov 0 }
 0x4bc   :  { %v2568_v57 = vld [vmem:[#allocation90] sm:$0x3] }
 0x4bd   :  { %v2569_v24 = vunpack.c.0.f8e4m3b11 %v2568_v57 }
 0x4bf   :  { %v2573_v27 = vand.u32 2147483647, %v2569_v24  ;;  %vm2575_vm0 = vcmp.ne.f32.partialorder %v2569_v24, %v2569_v24  ;;  %v2576_v63 = vmul.f32 16.0, %v2569_v24 }
 0x4c1   :  { %vm5355_vm15 = vcmp.gt.f32.partialorder %v2573_v27, 29.0  ;;  %v5359_v23 = vsel %vm2575_vm0, -0.0, %v2576_v63 }
 0x4c2   :  { %v6966_v55 = vsel %vm5355_vm15, 4294967295, %v6965_v55  ;;  %6968 = vst [vmem:[#allocation281_spill] sm:$0xff] %v5359_v23 }
 0x4c3   :  { %6967 = vst [vmem:[#allocation280_spill] sm:$0xff] %v6966_v55 }
 0x4c4   :  { %2597 = vst [vmem:[#allocation91] sm:$0xff] %v4532_v29  ;;  %v6969_v20 = vmov 0 }
 0x4cb   :  { %v2598_v49 = vld [vmem:[#allocation91] sm:$0x3] }
 0x4cc   :  { %v2599_v25 = vunpack.c.0.f8e4m3b11 %v2598_v49 }
 0x4ce   :  { %v2603_v21 = vand.u32 2147483647, %v2599_v25  ;;  %vm2605_vm8 = vcmp.ne.f32.partialorder %v2599_v25, %v2599_v25  ;;  %v2606_v57 = vmul.f32 16.0, %v2599_v25 }
 0x4d0   :  { %vm5365_vm11 = vcmp.gt.f32.partialorder %v2603_v21, 29.0  ;;  %v5369_v24 = vsel %vm2605_vm8, -0.0, %v2606_v57 }
 0x4d1   :  { %v6970_v20 = vsel %vm5365_vm11, 4294967295, %v6969_v20  ;;  %6972 = vst [vmem:[#allocation283_spill] sm:$0xff] %v5369_v24 }
 0x4d2   :  { %6971 = vst [vmem:[#allocation282_spill] sm:$0xff] %v6970_v20 }
 0x4d3   :  { %2627 = vst [vmem:[#allocation92] sm:$0xff] %v4530_v28  ;;  %v6973_v62 = vmov 0 }
 0x4da   :  { %v2629_v63 = vld [vmem:[#allocation92 + $0x2] sm:$0x3] }
 0x4db   :  { %v2630_v26 = vunpack.c.0.f8e4m3b11 %v2629_v63 }
 0x4dd   :  { %v2634_v19 = vand.u32 2147483647, %v2630_v26  ;;  %vm2636_vm0 = vcmp.ne.f32.partialorder %v2630_v26, %v2630_v26  ;;  %v2637_v49 = vmul.f32 16.0, %v2630_v26 }
 0x4df   :  { %vm5375_vm15 = vcmp.gt.f32.partialorder %v2634_v19, 29.0  ;;  %v5379_v21 = vsel %vm2636_vm0, -0.0, %v2637_v49 }
 0x4e0   :  { %v6974_v62 = vsel %vm5375_vm15, 4294967295, %v6973_v62  ;;  %6976 = vst [vmem:[#allocation285_spill] sm:$0xff] %v5379_v21 }
 0x4e1   :  { %6975 = vst [vmem:[#allocation284_spill] sm:$0xff] %v6974_v62 }
 0x4e2   :  { %2658 = vst [vmem:[#allocation93] sm:$0xff] %v4532_v29  ;;  %v6977_v20 = vmov 0 }
 0x4e9   :  { %v2660_v57 = vld [vmem:[#allocation93 + $0x2] sm:$0x3] }
 0x4ea   :  { %v2661_v27 = vunpack.c.0.f8e4m3b11 %v2660_v57 }
 0x4ec   :  { %v2665_v24 = vand.u32 2147483647, %v2661_v27  ;;  %vm2667_vm8 = vcmp.ne.f32.partialorder %v2661_v27, %v2661_v27  ;;  %v2668_v63 = vmul.f32 16.0, %v2661_v27 }
 0x4ee   :  { %vm5385_vm11 = vcmp.gt.f32.partialorder %v2665_v24, 29.0  ;;  %v5389_v19 = vsel %vm2667_vm8, -0.0, %v2668_v63 }
 0x4ef   :  { %v6978_v20 = vsel %vm5385_vm11, 4294967295, %v6977_v20  ;;  %6980 = vst [vmem:[#allocation287_spill] sm:$0xff] %v5389_v19 }
 0x4f0   :  { %6979 = vst [vmem:[#allocation286_spill] sm:$0xff] %v6978_v20 }
 0x4f1   :  { %2689 = vst [vmem:[#allocation94] sm:$0xff] %v4530_v28  ;;  %v6981_v12 = vmov 0 }
 0x4f8   :  { %v2691_v49 = vld [vmem:[#allocation94 + $0x4] sm:$0x3] }
 0x4f9   :  { %v2692_v25 = vunpack.c.0.f8e4m3b11 %v2691_v49 }
 0x4fb   :  { %v2696_v22 = vand.u32 2147483647, %v2692_v25  ;;  %vm2698_vm0 = vcmp.ne.f32.partialorder %v2692_v25, %v2692_v25  ;;  %v2699_v57 = vmul.f32 16.0, %v2692_v25 }
 0x4fd   :  { %vm5395_vm15 = vcmp.gt.f32.partialorder %v2696_v22, 29.0  ;;  %v5399_v24 = vsel %vm2698_vm0, -0.0, %v2699_v57 }
 0x4fe   :  { %v6982_v12 = vsel %vm5395_vm15, 4294967295, %v6981_v12 }
 0x4ff   :  { %2720 = vst [vmem:[#allocation95] sm:$0xff] %v4532_v29  ;;  %v6983_v20 = vmov 0 }
 0x506   :  { %v2722_v63 = vld [vmem:[#allocation95 + $0x4] sm:$0x3] }
 0x507   :  { %v2723_v26 = vunpack.c.0.f8e4m3b11 %v2722_v63 }
 0x509   :  { %v2727_v19 = vand.u32 2147483647, %v2723_v26  ;;  %vm2729_vm8 = vcmp.ne.f32.partialorder %v2723_v26, %v2723_v26  ;;  %v2730_v49 = vmul.f32 16.0, %v2723_v26 }
 0x50b   :  { %vm5405_vm11 = vcmp.gt.f32.partialorder %v2727_v19, 29.0  ;;  %v5409_v22 = vsel %vm2729_vm8, -0.0, %v2730_v49 }
 0x50c   :  { %v6984_v20 = vsel %vm5405_vm11, 4294967295, %v6983_v20  ;;  %6986 = vst [vmem:[#allocation289_spill] sm:$0xff] %v5409_v22 }
 0x50d   :  { %6985 = vst [vmem:[#allocation288_spill] sm:$0xff] %v6984_v20 }
 0x50e   :  { %2751 = vst [vmem:[#allocation96] sm:$0xff] %v4530_v28  ;;  %v6987_v40 = vmov 0 }
 0x515   :  { %v2753_v57 = vld [vmem:[#allocation96 + $0x6] sm:$0x3] }
 0x516   :  { %v2754_v27 = vunpack.c.0.f8e4m3b11 %v2753_v57 }
 0x518   :  { %v2758_v61 = vand.u32 2147483647, %v2754_v27  ;;  %vm2760_vm0 = vcmp.ne.f32.partialorder %v2754_v27, %v2754_v27  ;;  %v2761_v63 = vmul.f32 16.0, %v2754_v27 }
 0x51a   :  { %vm5415_vm15 = vcmp.gt.f32.partialorder %v2758_v61, 29.0  ;;  %v5419_v19 = vsel %vm2760_vm0, -0.0, %v2761_v63 }
 0x51b   :  { %v6988_v40 = vsel %vm5415_vm15, 4294967295, %v6987_v40 }
 0x51c   :  { %2782 = vst [vmem:[#allocation97] sm:$0xff] %v4532_v29  ;;  %v6989_v22 = vmov 0 }
 0x523   :  { %v2784_v49 = vld [vmem:[#allocation97 + $0x6] sm:$0x3] }
 0x524   :  { %v2785_v25 = vunpack.c.0.f8e4m3b11 %v2784_v49 }
 0x526   :  { %v2789_v28 = vand.u32 2147483647, %v2785_v25  ;;  %vm2791_vm8 = vcmp.ne.f32.partialorder %v2785_v25, %v2785_v25  ;;  %v2792_v57 = vmul.f32 16.0, %v2785_v25 }
 0x528   :  { %vm5425_vm11 = vcmp.gt.f32.partialorder %v2789_v28, 29.0  ;;  %v5429_v61 = vsel %vm2791_vm8, -0.0, %v2792_v57 }
 0x529   :  { %v6990_v22 = vsel %vm5425_vm11, 4294967295, %v6989_v22  ;;  %6992 = vst [vmem:[#allocation291_spill] sm:$0xff] %v5429_v61 }
 0x52a   :  { %6991 = vst [vmem:[#allocation290_spill] sm:$0xff] %v6990_v22 }
 0x52b   :  { %2813 = vst [vmem:[#allocation98] sm:$0xff] %v4534_v30 }
 0x532   :  { %v2814_v63 = vld [vmem:[#allocation98] sm:$0x3] }
 0x533   :  { %v2815_v26 = vunpack.c.0.f8e4m3b11 %v2814_v63 }
 0x535   :  { %v2819_v29 = vand.u32 2147483647, %v2815_v26  ;;  %vm2821_vm0 = vcmp.ne.f32.partialorder %v2815_v26, %v2815_v26  ;;  %v2822_v49 = vmul.f32 16.0, %v2815_v26 }
 0x537   :  { %vm5435_vm15 = vcmp.gt.f32.partialorder %v2819_v29, 29.0  ;;  %v5439_v25 = vsel %vm2821_vm0, -0.0, %v2822_v49 }
 0x538   :  { %2843 = vst [vmem:[#allocation99] sm:$0xff] %v4536_v31  ;;  %v6995_v22 = vmov 0 }
 0x53f   :  { %v2844_v57 = vld [vmem:[#allocation99] sm:$0x3] }
 0x540   :  { %v2845_v27 = vunpack.c.0.f8e4m3b11 %v2844_v57 }
 0x542   :  { %v2849_v61 = vand.u32 2147483647, %v2845_v27  ;;  %vm2851_vm8 = vcmp.ne.f32.partialorder %v2845_v27, %v2845_v27  ;;  %v2852_v63 = vmul.f32 16.0, %v2845_v27 }
 0x544   :  { %vm5445_vm11 = vcmp.gt.f32.partialorder %v2849_v61, 29.0  ;;  %v5449_v26 = vsel %vm2851_vm8, -0.0, %v2852_v63 }
 0x545   :  { %v6996_v22 = vsel %vm5445_vm11, 4294967295, %v6995_v22  ;;  %6998 = vst [vmem:[#allocation293_spill] sm:$0xff] %v5449_v26 }
 0x546   :  { %6997 = vst [vmem:[#allocation292_spill] sm:$0xff] %v6996_v22 }
 0x547   :  { %2873 = vst [vmem:[#allocation100] sm:$0xff] %v4534_v30  ;;  %v6999_v51 = vmov 0 }
 0x54e   :  { %v2875_v49 = vld [vmem:[#allocation100 + $0x2] sm:$0x3] }
 0x54f   :  { %v2876_v28 = vunpack.c.0.f8e4m3b11 %v2875_v49 }
 0x551   :  { %v2880_v46 = vand.u32 2147483647, %v2876_v28  ;;  %vm2882_vm0 = vcmp.ne.f32.partialorder %v2876_v28, %v2876_v28  ;;  %v2883_v57 = vmul.f32 16.0, %v2876_v28 }
 0x553   :  { %vm5455_vm7 = vcmp.gt.f32.partialorder %v2880_v46, 29.0  ;;  %v5459_v61 = vsel %vm2882_vm0, -0.0, %v2883_v57 }
 0x554   :  { %v7000_v51 = vsel %vm5455_vm7, 4294967295, %v6999_v51 }
 0x555   :  { %2904 = vst [vmem:[#allocation101] sm:$0xff] %v4536_v31  ;;  %v7001_v22 = vmov 0 }
 0x55c   :  { %v2906_v63 = vld [vmem:[#allocation101 + $0x2] sm:$0x3] }
 0x55d   :  { %v2907_v29 = vunpack.c.0.f8e4m3b11 %v2906_v63 }
 0x55f   :  { %v2911_v26 = vand.u32 2147483647, %v2907_v29  ;;  %vm2913_vm8 = vcmp.ne.f32.partialorder %v2907_v29, %v2907_v29  ;;  %v2914_v49 = vmul.f32 16.0, %v2907_v29 }
 0x561   :  { %vm5465_vm11 = vcmp.gt.f32.partialorder %v2911_v26, 29.0  ;;  %v5469_v46 = vsel %vm2913_vm8, -0.0, %v2914_v49 }
 0x562   :  { %v7002_v22 = vsel %vm5465_vm11, 4294967295, %v7001_v22  ;;  %7004 = vst [vmem:[#allocation295_spill] sm:$0xff] %v5469_v46 }
 0x563   :  { %7003 = vst [vmem:[#allocation294_spill] sm:$0xff] %v7002_v22 }
 0x564   :  { %2935 = vst [vmem:[#allocation102] sm:$0xff] %v4534_v30 }
 0x56b   :  { %v2937_v57 = vld [vmem:[#allocation102 + $0x4] sm:$0x3] }
 0x56c   :  { %v2938_v27 = vunpack.c.0.f8e4m3b11 %v2937_v57 }
 0x56e   :  { %v2942_v47 = vand.u32 2147483647, %v2938_v27  ;;  %vm2944_vm0 = vcmp.ne.f32.partialorder %v2938_v27, %v2938_v27  ;;  %v2945_v63 = vmul.f32 16.0, %v2938_v27 }
 0x570   :  { %vm5475_vm9 = vcmp.gt.f32.partialorder %v2942_v47, 29.0  ;;  %v5479_v26 = vsel %vm2944_vm0, -0.0, %v2945_v63 }
 0x571   :  { %2966 = vst [vmem:[#allocation103] sm:$0xff] %v4536_v31  ;;  %v7007_v22 = vmov 0 }
 0x578   :  { %v2968_v49 = vld [vmem:[#allocation103 + $0x4] sm:$0x3] }
 0x579   :  { %v2969_v28 = vunpack.c.0.f8e4m3b11 %v2968_v49 }
 0x57b   :  { %v2973_v46 = vand.u32 2147483647, %v2969_v28  ;;  %vm2975_vm8 = vcmp.ne.f32.partialorder %v2969_v28, %v2969_v28  ;;  %v2976_v57 = vmul.f32 16.0, %v2969_v28 }
 0x57d   :  { %vm5485_vm11 = vcmp.gt.f32.partialorder %v2973_v46, 29.0  ;;  %v5489_v47 = vsel %vm2975_vm8, -0.0, %v2976_v57 }
 0x57e   :  { %v7008_v22 = vsel %vm5485_vm11, 4294967295, %v7007_v22  ;;  %7010 = vst [vmem:[#allocation297_spill] sm:$0xff] %v5489_v47 }
 0x57f   :  { %7009 = vst [vmem:[#allocation296_spill] sm:$0xff] %v7008_v22 }
 0x580   :  { %2997 = vst [vmem:[#allocation104] sm:$0xff] %v4534_v30 }
 0x587   :  { %v2999_v63 = vld [vmem:[#allocation104 + $0x6] sm:$0x3] }
 0x588   :  { %v3000_v29 = vunpack.c.0.f8e4m3b11 %v2999_v63 }
 0x58a   :  { %v3004_v62 = vand.u32 2147483647, %v3000_v29  ;;  %vm3006_vm0 = vcmp.ne.f32.partialorder %v3000_v29, %v3000_v29  ;;  %v3007_v49 = vmul.f32 16.0, %v3000_v29 }
 0x58c   :  { %vm5495_vm6 = vcmp.gt.f32.partialorder %v3004_v62, 29.0  ;;  %v5499_v46 = vsel %vm3006_vm0, -0.0, %v3007_v49 }
 0x58d   :  { %3028 = vst [vmem:[#allocation105] sm:$0xff] %v4536_v31  ;;  %v7013_v47 = vmov 0 }
 0x594   :  { %v3030_v57 = vld [vmem:[#allocation105 + $0x6] sm:$0x3] }
 0x595   :  { %v3031_v27 = vunpack.c.0.f8e4m3b11 %v3030_v57 }
 0x597   :  { %v3035_v30 = vand.u32 2147483647, %v3031_v27  ;;  %vm3037_vm8 = vcmp.ne.f32.partialorder %v3031_v27, %v3031_v27  ;;  %v3038_v63 = vmul.f32 16.0, %v3031_v27 }
 0x599   :  { %vm5505_vm11 = vcmp.gt.f32.partialorder %v3035_v30, 29.0  ;;  %v5509_v62 = vsel %vm3037_vm8, -0.0, %v3038_v63 }
 0x59a   :  { %v7014_v47 = vsel %vm5505_vm11, 4294967295, %v7013_v47  ;;  %7016 = vst [vmem:[#allocation299_spill] sm:$0xff] %v5509_v62 }
 0x59b   :  { %7015 = vst [vmem:[#allocation298_spill] sm:$0xff] %v7014_v47 }
 0x59c   :  { %3059 = vst [vmem:[#allocation106] sm:$0xff] %v4538_v32  ;;  %v7017_v22 = vmov 0 }
 0x5a3   :  { %v3060_v49 = vld [vmem:[#allocation106] sm:$0x3] }
 0x5a4   :  { %v3061_v28 = vunpack.c.0.f8e4m3b11 %v3060_v49 }
 0x5a6   :  { %v3065_v31 = vand.u32 2147483647, %v3061_v28  ;;  %vm3067_vm0 = vcmp.ne.f32.partialorder %v3061_v28, %v3061_v28  ;;  %v3068_v57 = vmul.f32 16.0, %v3061_v28 }
 0x5a8   :  { %vm5515_vm3 = vcmp.gt.f32.partialorder %v3065_v31, 29.0  ;;  %v5519_v27 = vsel %vm3067_vm0, -0.0, %v3068_v57 }
 0x5a9   :  { %v7018_v22 = vsel %vm5515_vm3, 4294967295, %v7017_v22  ;;  %7020 = vst [vmem:[#allocation301_spill] sm:$0xff] %v5519_v27 }
 0x5aa   :  { %7019 = vst [vmem:[#allocation300_spill] sm:$0xff] %v7018_v22 }
 0x5ab   :  { %3089 = vst [vmem:[#allocation107] sm:$0xff] %v4540_v33  ;;  %v7021_v47 = vmov 0 }
 0x5b2   :  { %v3090_v63 = vld [vmem:[#allocation107] sm:$0x3] }
 0x5b3   :  { %v3091_v29 = vunpack.c.0.f8e4m3b11 %v3090_v63 }
 0x5b5   :  { %v3095_v62 = vand.u32 2147483647, %v3091_v29  ;;  %vm3097_vm8 = vcmp.ne.f32.partialorder %v3091_v29, %v3091_v29  ;;  %v3098_v49 = vmul.f32 16.0, %v3091_v29 }
 0x5b7   :  { %vm5525_vm11 = vcmp.gt.f32.partialorder %v3095_v62, 29.0  ;;  %v5529_v28 = vsel %vm3097_vm8, -0.0, %v3098_v49 }
 0x5b8   :  { %v7022_v47 = vsel %vm5525_vm11, 4294967295, %v7021_v47  ;;  %7024 = vst [vmem:[#allocation303_spill] sm:$0xff] %v5529_v28 }
 0x5b9   :  { %7023 = vst [vmem:[#allocation302_spill] sm:$0xff] %v7022_v47 }
 0x5ba   :  { %3119 = vst [vmem:[#allocation108] sm:$0xff] %v4538_v32  ;;  %v7025_v22 = vmov 0 }
 0x5c1   :  { %v3121_v57 = vld [vmem:[#allocation108 + $0x2] sm:$0x3] }
 0x5c2   :  { %v3122_v30 = vunpack.c.0.f8e4m3b11 %v3121_v57 }
 0x5c4   :  { %v3126_v27 = vand.u32 2147483647, %v3122_v30  ;;  %vm3128_vm0 = vcmp.ne.f32.partialorder %v3122_v30, %v3122_v30  ;;  %v3129_v63 = vmul.f32 16.0, %v3122_v30 }
 0x5c6   :  { %vm5535_vm3 = vcmp.gt.f32.partialorder %v3126_v27, 29.0  ;;  %v5539_v62 = vsel %vm3128_vm0, -0.0, %v3129_v63 }
 0x5c7   :  { %v7026_v22 = vsel %vm5535_vm3, 4294967295, %v7025_v22  ;;  %7028 = vst [vmem:[#allocation305_spill] sm:$0xff] %v5539_v62 }
 0x5c8   :  { %7027 = vst [vmem:[#allocation304_spill] sm:$0xff] %v7026_v22 }
 0x5c9   :  { %3150 = vst [vmem:[#allocation109] sm:$0xff] %v4540_v33  ;;  %v7029_v47 = vmov 0 }
 0x5d0   :  { %v3152_v49 = vld [vmem:[#allocation109 + $0x2] sm:$0x3] }
 0x5d1   :  { %v3153_v31 = vunpack.c.0.f8e4m3b11 %v3152_v49 }
 0x5d3   :  { %v3157_v28 = vand.u32 2147483647, %v3153_v31  ;;  %vm3159_vm8 = vcmp.ne.f32.partialorder %v3153_v31, %v3153_v31  ;;  %v3160_v57 = vmul.f32 16.0, %v3153_v31 }
 0x5d5   :  { %vm5545_vm11 = vcmp.gt.f32.partialorder %v3157_v28, 29.0  ;;  %v5549_v27 = vsel %vm3159_vm8, -0.0, %v3160_v57 }
 0x5d6   :  { %v7030_v47 = vsel %vm5545_vm11, 4294967295, %v7029_v47  ;;  %7032 = vst [vmem:[#allocation307_spill] sm:$0xff] %v5549_v27 }
 0x5d7   :  { %7031 = vst [vmem:[#allocation306_spill] sm:$0xff] %v7030_v47 }
 0x5d8   :  { %3181 = vst [vmem:[#allocation110] sm:$0xff] %v4538_v32  ;;  %v7033_v22 = vmov 0 }
 0x5df   :  { %v3183_v63 = vld [vmem:[#allocation110 + $0x4] sm:$0x3] }
 0x5e0   :  { %v3184_v29 = vunpack.c.0.f8e4m3b11 %v3183_v63 }
 0x5e2   :  { %v3188_v62 = vand.u32 2147483647, %v3184_v29  ;;  %vm3190_vm0 = vcmp.ne.f32.partialorder %v3184_v29, %v3184_v29  ;;  %v3191_v49 = vmul.f32 16.0, %v3184_v29 }
 0x5e4   :  { %vm5555_vm3 = vcmp.gt.f32.partialorder %v3188_v62, 29.0  ;;  %v5559_v28 = vsel %vm3190_vm0, -0.0, %v3191_v49 }
 0x5e5   :  { %v7034_v22 = vsel %vm5555_vm3, 4294967295, %v7033_v22  ;;  %7036 = vst [vmem:[#allocation309_spill] sm:$0xff] %v5559_v28 }
 0x5e6   :  { %7035 = vst [vmem:[#allocation308_spill] sm:$0xff] %v7034_v22 }
 0x5e7   :  { %3212 = vst [vmem:[#allocation111] sm:$0xff] %v4540_v33  ;;  %v7037_v47 = vmov 0 }
 0x5ee   :  { %v3214_v57 = vld [vmem:[#allocation111 + $0x4] sm:$0x3] }
 0x5ef   :  { %v3215_v30 = vunpack.c.0.f8e4m3b11 %v3214_v57 }
 0x5f1   :  { %v3219_v27 = vand.u32 2147483647, %v3215_v30  ;;  %vm3221_vm8 = vcmp.ne.f32.partialorder %v3215_v30, %v3215_v30  ;;  %v3222_v63 = vmul.f32 16.0, %v3215_v30 }
 0x5f3   :  { %vm5565_vm11 = vcmp.gt.f32.partialorder %v3219_v27, 29.0  ;;  %v5569_v62 = vsel %vm3221_vm8, -0.0, %v3222_v63 }
 0x5f4   :  { %v7038_v47 = vsel %vm5565_vm11, 4294967295, %v7037_v47  ;;  %7040 = vst [vmem:[#allocation311_spill] sm:$0xff] %v5569_v62 }
 0x5f5   :  { %7039 = vst [vmem:[#allocation310_spill] sm:$0xff] %v7038_v47 }
 0x5f6   :  { %3243 = vst [vmem:[#allocation112] sm:$0xff] %v4538_v32  ;;  %v7041_v22 = vmov 0 }
 0x5fd   :  { %v3245_v49 = vld [vmem:[#allocation112 + $0x6] sm:$0x3] }
 0x5fe   :  { %v3246_v31 = vunpack.c.0.f8e4m3b11 %v3245_v49 }
 0x600   :  { %v3250_v28 = vand.u32 2147483647, %v3246_v31  ;;  %vm3252_vm0 = vcmp.ne.f32.partialorder %v3246_v31, %v3246_v31  ;;  %v3253_v57 = vmul.f32 16.0, %v3246_v31 }
 0x602   :  { %vm5575_vm3 = vcmp.gt.f32.partialorder %v3250_v28, 29.0  ;;  %v5579_v27 = vsel %vm3252_vm0, -0.0, %v3253_v57 }
 0x603   :  { %v7042_v22 = vsel %vm5575_vm3, 4294967295, %v7041_v22  ;;  %7044 = vst [vmem:[#allocation313_spill] sm:$0xff] %v5579_v27 }
 0x604   :  { %7043 = vst [vmem:[#allocation312_spill] sm:$0xff] %v7042_v22 }
 0x605   :  { %3274 = vst [vmem:[#allocation113] sm:$0xff] %v4540_v33  ;;  %v7045_v62 = vmov 0 }
 0x60c   :  { %v3276_v63 = vld [vmem:[#allocation113 + $0x6] sm:$0x3] }
 0x60d   :  { %v3277_v29 = vunpack.c.0.f8e4m3b11 %v3276_v63 }
 0x60f   :  { %v3281_v32 = vand.u32 2147483647, %v3277_v29  ;;  %vm3283_vm8 = vcmp.ne.f32.partialorder %v3277_v29, %v3277_v29  ;;  %v3284_v49 = vmul.f32 16.0, %v3277_v29 }
 0x611   :  { %vm5585_vm11 = vcmp.gt.f32.partialorder %v3281_v32, 29.0  ;;  %v5589_v28 = vsel %vm3283_vm8, -0.0, %v3284_v49 }
 0x612   :  { %v7046_v62 = vsel %vm5585_vm11, 4294967295, %v7045_v62  ;;  %7048 = vst [vmem:[#allocation315_spill] sm:$0xff] %v5589_v28 }
 0x613   :  { %7047 = vst [vmem:[#allocation314_spill] sm:$0xff] %v7046_v62 }
 0x614   :  { %3305 = vst [vmem:[#allocation114] sm:$0xff] %v4542_v34  ;;  %v7049_v47 = vmov 0 }
 0x61b   :  { %v3306_v57 = vld [vmem:[#allocation114] sm:$0x3] }
 0x61c   :  { %v3307_v30 = vunpack.c.0.f8e4m3b11 %v3306_v57 }
 0x61e   :  { %v3311_v33 = vand.u32 2147483647, %v3307_v30  ;;  %vm3313_vm0 = vcmp.ne.f32.partialorder %v3307_v30, %v3307_v30  ;;  %v3314_v63 = vmul.f32 16.0, %v3307_v30 }
 0x620   :  { %vm5595_vm3 = vcmp.gt.f32.partialorder %v3311_v33, 29.0  ;;  %v5599_v29 = vsel %vm3313_vm0, -0.0, %v3314_v63 }
 0x621   :  { %v7050_v47 = vsel %vm5595_vm3, 4294967295, %v7049_v47  ;;  %7052 = vst [vmem:[#allocation317_spill] sm:$0xff] %v5599_v29 }
 0x622   :  { %7051 = vst [vmem:[#allocation316_spill] sm:$0xff] %v7050_v47 }
 0x623   :  { %3335 = vst [vmem:[#allocation115] sm:$0xff] %v4544_v35  ;;  %v7053_v62 = vmov 0 }
 0x62a   :  { %v3336_v49 = vld [vmem:[#allocation115] sm:$0x3] }
 0x62b   :  { %v3337_v31 = vunpack.c.0.f8e4m3b11 %v3336_v49 }
 0x62d   :  { %v3341_v28 = vand.u32 2147483647, %v3337_v31  ;;  %vm3343_vm8 = vcmp.ne.f32.partialorder %v3337_v31, %v3337_v31  ;;  %v3344_v57 = vmul.f32 16.0, %v3337_v31 }
 0x62f   :  { %vm5605_vm11 = vcmp.gt.f32.partialorder %v3341_v28, 29.0  ;;  %v5609_v30 = vsel %vm3343_vm8, -0.0, %v3344_v57 }
 0x630   :  { %v7054_v62 = vsel %vm5605_vm11, 4294967295, %v7053_v62  ;;  %7056 = vst [vmem:[#allocation319_spill] sm:$0xff] %v5609_v30 }
 0x631   :  { %7055 = vst [vmem:[#allocation318_spill] sm:$0xff] %v7054_v62 }
 0x632   :  { %3365 = vst [vmem:[#allocation116] sm:$0xff] %v4542_v34  ;;  %v7057_v22 = vmov 0 }
 0x639   :  { %v3367_v63 = vld [vmem:[#allocation116 + $0x2] sm:$0x3] }
 0x63a   :  { %v3368_v32 = vunpack.c.0.f8e4m3b11 %v3367_v63 }
 0x63c   :  { %v3372_v27 = vand.u32 2147483647, %v3368_v32  ;;  %vm3374_vm0 = vcmp.ne.f32.partialorder %v3368_v32, %v3368_v32  ;;  %v3375_v49 = vmul.f32 16.0, %v3368_v32 }
 0x63e   :  { %vm5615_vm3 = vcmp.gt.f32.partialorder %v3372_v27, 29.0  ;;  %v5619_v28 = vsel %vm3374_vm0, -0.0, %v3375_v49 }
 0x63f   :  { %v7058_v22 = vsel %vm5615_vm3, 4294967295, %v7057_v22  ;;  %7060 = vst [vmem:[#allocation321_spill] sm:$0xff] %v5619_v28 }
 0x640   :  { %7059 = vst [vmem:[#allocation320_spill] sm:$0xff] %v7058_v22 }
 0x641   :  { %3396 = vst [vmem:[#allocation117] sm:$0xff] %v4544_v35  ;;  %v7061_v62 = vmov 0 }
 0x648   :  { %v3398_v57 = vld [vmem:[#allocation117 + $0x2] sm:$0x3] }
 0x649   :  { %v3399_v33 = vunpack.c.0.f8e4m3b11 %v3398_v57 }
 0x64b   :  { %v3403_v30 = vand.u32 2147483647, %v3399_v33  ;;  %vm3405_vm8 = vcmp.ne.f32.partialorder %v3399_v33, %v3399_v33  ;;  %v3406_v63 = vmul.f32 16.0, %v3399_v33 }
 0x64d   :  { %vm5625_vm11 = vcmp.gt.f32.partialorder %v3403_v30, 29.0  ;;  %v5629_v27 = vsel %vm3405_vm8, -0.0, %v3406_v63 }
 0x64e   :  { %v7062_v62 = vsel %vm5625_vm11, 4294967295, %v7061_v62  ;;  %7064 = vst [vmem:[#allocation323_spill] sm:$0xff] %v5629_v27 }
 0x64f   :  { %7063 = vst [vmem:[#allocation322_spill] sm:$0xff] %v7062_v62 }
 0x650   :  { %3427 = vst [vmem:[#allocation118] sm:$0xff] %v4542_v34  ;;  %v7065_v22 = vmov 0 }
 0x657   :  { %v3429_v49 = vld [vmem:[#allocation118 + $0x4] sm:$0x3] }
 0x658   :  { %v3430_v31 = vunpack.c.0.f8e4m3b11 %v3429_v49 }
 0x65a   :  { %v3434_v28 = vand.u32 2147483647, %v3430_v31  ;;  %vm3436_vm0 = vcmp.ne.f32.partialorder %v3430_v31, %v3430_v31  ;;  %v3437_v57 = vmul.f32 16.0, %v3430_v31 }
 0x65c   :  { %vm5635_vm3 = vcmp.gt.f32.partialorder %v3434_v28, 29.0  ;;  %v5639_v30 = vsel %vm3436_vm0, -0.0, %v3437_v57 }
 0x65d   :  { %v7066_v22 = vsel %vm5635_vm3, 4294967295, %v7065_v22  ;;  %7068 = vst [vmem:[#allocation325_spill] sm:$0xff] %v5639_v30 }
 0x65e   :  { %7067 = vst [vmem:[#allocation324_spill] sm:$0xff] %v7066_v22 }
 0x65f   :  { %3458 = vst [vmem:[#allocation119] sm:$0xff] %v4544_v35  ;;  %v7069_v62 = vmov 0 }
 0x666   :  { %v3460_v63 = vld [vmem:[#allocation119 + $0x4] sm:$0x3] }
 0x667   :  { %v3461_v32 = vunpack.c.0.f8e4m3b11 %v3460_v63 }
 0x669   :  { %v3465_v27 = vand.u32 2147483647, %v3461_v32  ;;  %vm3467_vm8 = vcmp.ne.f32.partialorder %v3461_v32, %v3461_v32  ;;  %v3468_v49 = vmul.f32 16.0, %v3461_v32 }
 0x66b   :  { %vm5645_vm11 = vcmp.gt.f32.partialorder %v3465_v27, 29.0  ;;  %v5649_v28 = vsel %vm3467_vm8, -0.0, %v3468_v49 }
 0x66c   :  { %v7070_v62 = vsel %vm5645_vm11, 4294967295, %v7069_v62  ;;  %7072 = vst [vmem:[#allocation327_spill] sm:$0xff] %v5649_v28 }
 0x66d   :  { %7071 = vst [vmem:[#allocation326_spill] sm:$0xff] %v7070_v62 }
 0x66e   :  { %3489 = vst [vmem:[#allocation120] sm:$0xff] %v4542_v34  ;;  %v7073_v47 = vmov 0 }
 0x675   :  { %v3491_v57 = vld [vmem:[#allocation120 + $0x6] sm:$0x3] }
 0x676   :  { %v3492_v33 = vunpack.c.0.f8e4m3b11 %v3491_v57 }
 0x678   :  { %v3496_v29 = vand.u32 2147483647, %v3492_v33  ;;  %vm3498_vm0 = vcmp.ne.f32.partialorder %v3492_v33, %v3492_v33  ;;  %v3499_v63 = vmul.f32 16.0, %v3492_v33 }
 0x67a   :  { %vm5655_vm3 = vcmp.gt.f32.partialorder %v3496_v29, 29.0  ;;  %v5659_v27 = vsel %vm3498_vm0, -0.0, %v3499_v63 }
 0x67b   :  { %v7074_v47 = vsel %vm5655_vm3, 4294967295, %v7073_v47  ;;  %7076 = vst [vmem:[#allocation329_spill] sm:$0xff] %v5659_v27 }
 0x67c   :  { %7075 = vst [vmem:[#allocation328_spill] sm:$0xff] %v7074_v47 }
 0x67d   :  { %3520 = vst [vmem:[#allocation121] sm:$0xff] %v4544_v35  ;;  %v7077_v28 = vmov 0 }
 0x684   :  { %v3522_v49 = vld [vmem:[#allocation121 + $0x6] sm:$0x3] }
 0x685   :  { %v3523_v31 = vunpack.c.0.f8e4m3b11 %v3522_v49 }
 0x687   :  { %v3527_v34 = vand.u32 2147483647, %v3523_v31  ;;  %vm3529_vm8 = vcmp.ne.f32.partialorder %v3523_v31, %v3523_v31  ;;  %v3530_v57 = vmul.f32 16.0, %v3523_v31 }
 0x689   :  { %vm5665_vm11 = vcmp.gt.f32.partialorder %v3527_v34, 29.0  ;;  %v5669_v29 = vsel %vm3529_vm8, -0.0, %v3530_v57 }
 0x68a   :  { %v7078_v28 = vsel %vm5665_vm11, 4294967295, %v7077_v28  ;;  %7080 = vst [vmem:[#allocation331_spill] sm:$0xff] %v5669_v29 }
 0x68b   :  { %7079 = vst [vmem:[#allocation330_spill] sm:$0xff] %v7078_v28 }
 0x68c   :  { %3551 = vst [vmem:[#allocation122] sm:$0xff] %v4546_v36  ;;  %v7081_v62 = vmov 0 }
 0x693   :  { %v3552_v63 = vld [vmem:[#allocation122] sm:$0x3] }
 0x694   :  { %v3553_v32 = vunpack.c.0.f8e4m3b11 %v3552_v63 }
 0x696   :  { %v3557_v35 = vand.u32 2147483647, %v3553_v32  ;;  %vm3559_vm0 = vcmp.ne.f32.partialorder %v3553_v32, %v3553_v32  ;;  %v3560_v49 = vmul.f32 16.0, %v3553_v32 }
 0x698   :  { %vm5675_vm3 = vcmp.gt.f32.partialorder %v3557_v35, 29.0  ;;  %v5679_v31 = vsel %vm3559_vm0, -0.0, %v3560_v49 }
 0x699   :  { %v7082_v62 = vsel %vm5675_vm3, 4294967295, %v7081_v62  ;;  %7084 = vst [vmem:[#allocation333_spill] sm:$0xff] %v5679_v31 }
 0x69a   :  { %7083 = vst [vmem:[#allocation332_spill] sm:$0xff] %v7082_v62 }
 0x69b   :  { %3581 = vst [vmem:[#allocation123] sm:$0xff] %v4548_v37  ;;  %v7085_v28 = vmov 0 }
 0x6a2   :  { %v3582_v57 = vld [vmem:[#allocation123] sm:$0x3] }
 0x6a3   :  { %v3583_v33 = vunpack.c.0.f8e4m3b11 %v3582_v57 }
 0x6a5   :  { %v3587_v29 = vand.u32 2147483647, %v3583_v33  ;;  %vm3589_vm8 = vcmp.ne.f32.partialorder %v3583_v33, %v3583_v33  ;;  %v3590_v63 = vmul.f32 16.0, %v3583_v33 }
 0x6a7   :  { %vm5685_vm11 = vcmp.gt.f32.partialorder %v3587_v29, 29.0  ;;  %v5689_v32 = vsel %vm3589_vm8, -0.0, %v3590_v63 }
 0x6a8   :  { %v7086_v28 = vsel %vm5685_vm11, 4294967295, %v7085_v28  ;;  %7088 = vst [vmem:[#allocation335_spill] sm:$0xff] %v5689_v32 }
 0x6a9   :  { %7087 = vst [vmem:[#allocation334_spill] sm:$0xff] %v7086_v28 }
 0x6aa   :  { %3611 = vst [vmem:[#allocation124] sm:$0xff] %v4546_v36  ;;  %v7089_v47 = vmov 0 }
 0x6b1   :  { %v3613_v49 = vld [vmem:[#allocation124 + $0x2] sm:$0x3] }
 0x6b2   :  { %v3614_v34 = vunpack.c.0.f8e4m3b11 %v3613_v49 }
 0x6b4   :  { %v3618_v27 = vand.u32 2147483647, %v3614_v34  ;;  %vm3620_vm0 = vcmp.ne.f32.partialorder %v3614_v34, %v3614_v34  ;;  %v3621_v57 = vmul.f32 16.0, %v3614_v34 }
 0x6b6   :  { %vm5695_vm3 = vcmp.gt.f32.partialorder %v3618_v27, 29.0  ;;  %v5699_v29 = vsel %vm3620_vm0, -0.0, %v3621_v57 }
 0x6b7   :  { %v7090_v47 = vsel %vm5695_vm3, 4294967295, %v7089_v47  ;;  %7092 = vst [vmem:[#allocation337_spill] sm:$0xff] %v5699_v29 }
 0x6b8   :  { %7091 = vst [vmem:[#allocation336_spill] sm:$0xff] %v7090_v47 }
 0x6b9   :  { %3642 = vst [vmem:[#allocation125] sm:$0xff] %v4548_v37  ;;  %v7093_v28 = vmov 0 }
 0x6c0   :  { %v3644_v63 = vld [vmem:[#allocation125 + $0x2] sm:$0x3] }
 0x6c1   :  { %v3645_v35 = vunpack.c.0.f8e4m3b11 %v3644_v63 }
 0x6c3   :  { %v3649_v32 = vand.u32 2147483647, %v3645_v35  ;;  %vm3651_vm8 = vcmp.ne.f32.partialorder %v3645_v35, %v3645_v35  ;;  %v3652_v49 = vmul.f32 16.0, %v3645_v35 }
 0x6c5   :  { %vm5705_vm11 = vcmp.gt.f32.partialorder %v3649_v32, 29.0  ;;  %v5709_v27 = vsel %vm3651_vm8, -0.0, %v3652_v49 }
 0x6c6   :  { %v7094_v28 = vsel %vm5705_vm11, 4294967295, %v7093_v28  ;;  %7096 = vst [vmem:[#allocation339_spill] sm:$0xff] %v5709_v27 }
 0x6c7   :  { %7095 = vst [vmem:[#allocation338_spill] sm:$0xff] %v7094_v28 }
 0x6c8   :  { %3673 = vst [vmem:[#allocation126] sm:$0xff] %v4546_v36  ;;  %v7097_v22 = vmov 0 }
 0x6cf   :  { %v3675_v57 = vld [vmem:[#allocation126 + $0x4] sm:$0x3] }
 0x6d0   :  { %v3676_v33 = vunpack.c.0.f8e4m3b11 %v3675_v57 }
 0x6d2   :  { %v3680_v30 = vand.u32 2147483647, %v3676_v33  ;;  %vm3682_vm0 = vcmp.ne.f32.partialorder %v3676_v33, %v3676_v33  ;;  %v3683_v63 = vmul.f32 16.0, %v3676_v33 }
 0x6d4   :  { %vm5715_vm3 = vcmp.gt.f32.partialorder %v3680_v30, 29.0  ;;  %v5719_v32 = vsel %vm3682_vm0, -0.0, %v3683_v63 }
 0x6d5   :  { %v7098_v22 = vsel %vm5715_vm3, 4294967295, %v7097_v22 }
 0x6d6   :  { %3704 = vst [vmem:[#allocation127] sm:$0xff] %v4548_v37  ;;  %v7099_v28 = vmov 0 }
 0x6dd   :  { %v3706_v49 = vld [vmem:[#allocation127 + $0x4] sm:$0x3] }
 0x6de   :  { %v3707_v34 = vunpack.c.0.f8e4m3b11 %v3706_v49 }
 0x6e0   :  { %v3711_v27 = vand.u32 2147483647, %v3707_v34  ;;  %vm3713_vm8 = vcmp.ne.f32.partialorder %v3707_v34, %v3707_v34  ;;  %v3714_v57 = vmul.f32 16.0, %v3707_v34 }
 0x6e2   :  { %vm5725_vm11 = vcmp.gt.f32.partialorder %v3711_v27, 29.0  ;;  %v5729_v30 = vsel %vm3713_vm8, -0.0, %v3714_v57 }
 0x6e3   :  { %v7100_v28 = vsel %vm5725_vm11, 4294967295, %v7099_v28  ;;  %7102 = vst [vmem:[#allocation341_spill] sm:$0xff] %v5729_v30 }
 0x6e4   :  { %7101 = vst [vmem:[#allocation340_spill] sm:$0xff] %v7100_v28 }
 0x6e5   :  { %3735 = vst [vmem:[#allocation128] sm:$0xff] %v4546_v36  ;;  %v7103_v47 = vmov 0 }
 0x6ec   :  { %v3737_v63 = vld [vmem:[#allocation128 + $0x6] sm:$0x3] }
 0x6ed   :  { %v3738_v35 = vunpack.c.0.f8e4m3b11 %v3737_v63 }
 0x6ef   :  { %v3742_v29 = vand.u32 2147483647, %v3738_v35  ;;  %vm3744_vm0 = vcmp.ne.f32.partialorder %v3738_v35, %v3738_v35  ;;  %v3745_v49 = vmul.f32 16.0, %v3738_v35 }
 0x6f1   :  { %vm5735_vm3 = vcmp.gt.f32.partialorder %v3742_v29, 29.0  ;;  %v5739_v27 = vsel %vm3744_vm0, -0.0, %v3745_v49 }
 0x6f2   :  { %v7104_v47 = vsel %vm5735_vm3, 4294967295, %v7103_v47 }
 0x6f3   :  { %3766 = vst [vmem:[#allocation129] sm:$0xff] %v4548_v37  ;;  %v7105_v30 = vmov 0 }
 0x6fa   :  { %v3768_v57 = vld [vmem:[#allocation129 + $0x6] sm:$0x3] }
 0x6fb   :  { %v3769_v33 = vunpack.c.0.f8e4m3b11 %v3768_v57 }
 0x6fd   :  { %v3773_v36 = vand.u32 2147483647, %v3769_v33  ;;  %vm3775_vm8 = vcmp.ne.f32.partialorder %v3769_v33, %v3769_v33  ;;  %v3776_v63 = vmul.f32 16.0, %v3769_v33 }
 0x6ff   :  { %vm5745_vm11 = vcmp.gt.f32.partialorder %v3773_v36, 29.0  ;;  %v5749_v29 = vsel %vm3775_vm8, -0.0, %v3776_v63 }
 0x700   :  { %v7106_v30 = vsel %vm5745_vm11, 4294967295, %v7105_v30  ;;  %7108 = vst [vmem:[#allocation343_spill] sm:$0xff] %v5749_v29 }
 0x701   :  { %7107 = vst [vmem:[#allocation342_spill] sm:$0xff] %v7106_v30 }
 0x702   :  { %3797 = vst [vmem:[#allocation130] sm:$0xff] %v4550_v38  ;;  %v7109_v28 = vmov 0 }
 0x709   :  { %v3798_v49 = vld [vmem:[#allocation130] sm:$0x3] }
 0x70a   :  { %v3799_v34 = vunpack.c.0.f8e4m3b11 %v3798_v49 }
 0x70c   :  { %v3803_v37 = vand.u32 2147483647, %v3799_v34  ;;  %vm3805_vm0 = vcmp.ne.f32.partialorder %v3799_v34, %v3799_v34  ;;  %v3806_v57 = vmul.f32 16.0, %v3799_v34 }
 0x70e   :  { %vm5755_vm3 = vcmp.gt.f32.partialorder %v3803_v37, 29.0  ;;  %v5759_v33 = vsel %vm3805_vm0, -0.0, %v3806_v57 }
 0x70f   :  { %v7110_v28 = vsel %vm5755_vm3, 4294967295, %v7109_v28 }
 0x710   :  { %3827 = vst [vmem:[#allocation131] sm:$0xff] %v4552_v39  ;;  %v7111_v30 = vmov 0 }
 0x717   :  { %v3828_v63 = vld [vmem:[#allocation131] sm:$0x3] }
 0x718   :  { %v3829_v35 = vunpack.c.0.f8e4m3b11 %v3828_v63 }
 0x71a   :  { %v3833_v29 = vand.u32 2147483647, %v3829_v35  ;;  %vm3835_vm8 = vcmp.ne.f32.partialorder %v3829_v35, %v3829_v35  ;;  %v3836_v49 = vmul.f32 16.0, %v3829_v35 }
 0x71c   :  { %vm5765_vm11 = vcmp.gt.f32.partialorder %v3833_v29, 29.0  ;;  %v5769_v34 = vsel %vm3835_vm8, -0.0, %v3836_v49 }
 0x71d   :  { %v7112_v30 = vsel %vm5765_vm11, 4294967295, %v7111_v30  ;;  %7114 = vst [vmem:[#allocation345_spill] sm:$0xff] %v5769_v34 }
 0x71e   :  { %7113 = vst [vmem:[#allocation344_spill] sm:$0xff] %v7112_v30 }
 0x71f   :  { %3857 = vst [vmem:[#allocation132] sm:$0xff] %v4550_v38 }
 0x726   :  { %v3859_v57 = vld [vmem:[#allocation132 + $0x2] sm:$0x3] }
 0x727   :  { %v3860_v36 = vunpack.c.0.f8e4m3b11 %v3859_v57 }
 0x729   :  { %v3864_v31 = vand.u32 2147483647, %v3860_v36  ;;  %vm3866_vm0 = vcmp.ne.f32.partialorder %v3860_v36, %v3860_v36  ;;  %v3867_v63 = vmul.f32 16.0, %v3860_v36 }
 0x72b   :  { %vm5775_vm3 = vcmp.gt.f32.partialorder %v3864_v31, 29.0  ;;  %v3868_v29 = vsel %vm3866_vm0, -0.0, %v3867_v63 }
 0x72c   :  { %v3869_v35 = vsel %vm5775_vm3, nan, %v3868_v29 }
 0x72d   :  { %3888 = vst [vmem:[#allocation133] sm:$0xff] %v4552_v39  ;;  %v7117_v57 = vmov 0 }
 0x734   :  { %v3890_v49 = vld [vmem:[#allocation133 + $0x2] sm:$0x3] }
 0x735   :  { %v3891_v30 = vunpack.c.0.f8e4m3b11 %v3890_v49 }
 0x737   :  { %v3895_v37 = vand.u32 2147483647, %v3891_v30  ;;  %vm3897_vm8 = vcmp.ne.f32.partialorder %v3891_v30, %v3891_v30  ;;  %v3898_v34 = vmul.f32 16.0, %v3891_v30 }
 0x739   :  { %vm5782_vm11 = vcmp.gt.f32.partialorder %v3895_v37, 29.0  ;;  %v5786_v36 = vsel %vm3897_vm8, -0.0, %v3898_v34 }
 0x73a   :  { %v7118_v57 = vsel %vm5782_vm11, 4294967295, %v7117_v57  ;;  %7120 = vst [vmem:[#allocation347_spill] sm:$0xff] %v5786_v36 }
 0x73b   :  { %7119 = vst [vmem:[#allocation346_spill] sm:$0xff] %v7118_v57 }
 0x73c   :  { %3919 = vst [vmem:[#allocation134] sm:$0xff] %v4550_v38 }
 0x743   :  { %v3921_v62 = vld [vmem:[#allocation134 + $0x4] sm:$0x3] }
 0x744   :  { %v3922_v63 = vunpack.c.0.f8e4m3b11 %v3921_v62 }
 0x746   :  { %v3926_v29 = vand.u32 2147483647, %v3922_v63  ;;  %vm3928_vm3 = vcmp.ne.f32.partialorder %v3922_v63, %v3922_v63  ;;  %v3929_v49 = vmul.f32 16.0, %v3922_v63 }
 0x748   :  { %vm5792_vm0 = vcmp.gt.f32.partialorder %v3926_v29, 29.0  ;;  %v3930_v30 = vsel %vm3928_vm3, -0.0, %v3929_v49 }
 0x749   :  { %v3931_v34 = vsel %vm5792_vm0, nan, %v3930_v30 }
 0x74a   :  { %3950 = vst [vmem:[#allocation135] sm:$0xff] %v4552_v39  ;;  %v7123_v62 = vmov 0 }
 0x751   :  { %v3952_v37 = vld [vmem:[#allocation135 + $0x4] sm:$0x3] }
 0x752   :  { %v3953_v57 = vunpack.c.0.f8e4m3b11 %v3952_v37 }
 0x754   :  { %v3957_v31 = vand.u32 2147483647, %v3953_v57  ;;  %vm3959_vm8 = vcmp.ne.f32.partialorder %v3953_v57, %v3953_v57  ;;  %v3960_v36 = vmul.f32 16.0, %v3953_v57 }
 0x756   :  { %vm5799_vm11 = vcmp.gt.f32.partialorder %v3957_v31, 29.0  ;;  %v5803_v63 = vsel %vm3959_vm8, -0.0, %v3960_v36 }
 0x757   :  { %v7124_v62 = vsel %vm5799_vm11, 4294967295, %v7123_v62  ;;  %v3962_v29 = vsel %vm5799_vm11, nan, %v5803_v63 }
 0x758   :  { %7125 = vst [vmem:[#allocation348_spill] sm:$0xff] %v7124_v62 }
 0x759   :  { %3981 = vst [vmem:[#allocation136] sm:$0xff] %v4550_v38 }
 0x760   :  { %v3983_v55 = vld [vmem:[#allocation136 + $0x6] sm:$0x3] }
 0x761   :  { %v3984_v49 = vunpack.c.0.f8e4m3b11 %v3983_v55 }
 0x763   :  { %v3988_v30 = vand.u32 2147483647, %v3984_v49  ;;  %vm3990_vm3 = vcmp.ne.f32.partialorder %v3984_v49, %v3984_v49  ;;  %v3991_v37 = vmul.f32 16.0, %v3984_v49 }
 0x765   :  { %vm3989_vm0 = vcmp.gt.f32.partialorder %v3988_v30, 29.0  ;;  %v3992_v53 = vsel %vm3990_vm3, -0.0, %v3991_v37 }
 0x766   :  { %v3993_v57 = vsel %vm3989_vm0, nan, %v3992_v53 }
 0x767   :  { %4012 = vst [vmem:[#allocation137] sm:$0xff] %v4552_v39  ;;  %v7128_v53 = vsel %vm4835_vm1, nan, %v4839_v10  ;;  %v7129_v39 = vsel %vm4855_vm13, nan, %v4859_v6  ;;  %v7132_v59 = vsel %vm5475_vm9, nan, %v5479_v26  ;;  %v7133_v45 = vsel %vm5495_vm6, nan, %v5499_v46  ;;  %v7174_v46 = vld [vmem:[#allocation284_spill] sm:$0xff] }
 0x768   :  { %v4057_v49 = vpack.c.bf16 %v7129_v39, %v7128_v53  ;;  %v4089_v10 = vpack.c.bf16 %v7133_v45, %v7132_v59  ;;  %v4105_v6 = vpack.c.bf16 %v3993_v57, %v3931_v34  ;;  %v7134_v11 = vsel %vm4795_vm12, nan, %v4799_v9  ;;  %v7186_v57 = vld [vmem:[#allocation173_spill] sm:$0xff]  ;;  %v7192_v39 = vld [vmem:[#allocation178_spill] sm:$0xff]  ;;  %s4288_s8 = sshll.u32 %s6353_s4, 4  ;;  %s4438_s9 = smov 128   ;;  %s4289_s8 = int_to_ptr.hbm [resolvable:$true] %s4288_s8 }
 0x769   :  { %v7135_v14 = vsel %vm4815_vm5, nan, %v4819_v1  ;;  %v7137_v23 = vsel %vm5135_vm10, nan, %v5139_v3  ;;  %v7138_v42 = vsel %vm5435_vm15, nan, %v5439_v25  ;;  %vm7139_vm1 = vnez %v7000_v51  ;;  %v7190_v53 = vld [vmem:[#allocation177_spill] sm:$0xff]  ;;  %s4439_s10 = smov 8  }
 0x76a   :  { %4131 = vmatpush.bf16.msra.mxu0 %v4057_v49  ;;  %4159 = vmatpush.bf16.msra.mxu2 %v4089_v10  ;;  %v7140_v7 = vsel %vm7139_vm1, nan, %v5459_v61  ;;  %vm7141_vm5 = vnez %v7110_v28  ;;  %vm7143_vm9 = vnez %v6751_v5  ;;  %vm7145_vm13 = vnez %v6757_v2  ;;  %v7198_v45 = vld [vmem:[#allocation225_spill] sm:$0xff]  ;;  %v7200_v10 = vld [vmem:[#allocation226_spill] sm:$0xff] }
 0x76b   :  { %4173 = vmatpush.bf16.msra.mxu3 %v4105_v6  ;;  %v4087_v9 = vpack.c.bf16 %v7140_v7, %v7138_v42  ;;  %v7142_v1 = vsel %vm7141_vm5, nan, %v5759_v33  ;;  %v7144_v48 = vsel %vm7143_vm9, nan, %v4759_v8  ;;  %vm7147_vm15 = vnez %v6866_v13  ;;  %v7182_v33 = vld [vmem:[#allocation336_spill] sm:$0xff]  ;;  %v7345_v62 = vld [vmem:[#allocation145_spill] sm:$0xff] }
 0x76c   :  { %v4103_v4 = vpack.c.bf16 %v3869_v35, %v7142_v1  ;;  %v7148_v51 = vsel %vm7147_vm15, nan, %v5079_v16  ;;  %vm7151_vm6 = vnez %v6982_v12  ;;  %vm7153_vm10 = vnez %v6988_v40  ;;  %v7184_v35 = vld [vmem:[#allocation337_spill] sm:$0xff] }
 0x76d   :  { %v7152_v5 = vsel %vm7151_vm6, nan, %v5399_v24  ;;  %v7154_v2 = vsel %vm7153_vm10, nan, %v5419_v19  ;;  %vm7159_vm12 = vnez %v6739_v60  ;;  %vm7161_vm3 = vnez %v6745_v0  ;;  %v7168_v19 = vld [vmem:[#allocation233_spill] sm:$0xff] }
 0x76e   :  { %v4014_v31 = vld [vmem:[#allocation137 + $0x6] sm:$0x3]  ;;  %4160 = vmatpush.bf16.msra.mxu2 %v4087_v9  ;;  %v4085_v8 = vpack.c.bf16 %v7154_v2, %v7152_v5  ;;  %v7160_v16 = vsel %vm7159_vm12, nan, %v4719_v50  ;;  %v7162_v40 = vsel %vm7161_vm3, nan, %v4739_v43  ;;  %vm7163_vm0 = vnez %v6851_v58  ;;  %v7210_v9 = vld [vmem:[#allocation324_spill] sm:$0xff] }
 0x76f   :  { %v4015_v44 = vunpack.c.0.f8e4m3b11 %v4014_v31  ;;  %4174 = vmatpush.bf16.msra.mxu3 %v4103_v4  ;;  %v4051_v12 = vpack.c.bf16 %v7162_v40, %v7160_v16  ;;  %v7172_v60 = vld [vmem:[#allocation281_spill] sm:$0xff]  ;;  %vm7175_vm5 = vnez %v7174_v46  ;;  %vm7187_vm15 = vnez %v7186_v57  ;;  %v7188_v31 = vld [vmem:[#allocation174_spill] sm:$0xff] }
 0x770   :  { %v7176_v0 = vld [vmem:[#allocation285_spill] sm:$0xff]  ;;  %vm7199_vm10 = vnez %v7198_v45  ;;  %vm7211_vm12 = vnez %v7210_v9  ;;  %v7228_v16 = vld [vmem:[#allocation214_spill] sm:$0xff]  ;;  %v7278_v9 = vld [vmem:[#allocation312_spill] sm:$0xff] }
 0x771   :  { %v4019_v36 = vand.u32 2147483647, %v4015_v44  ;;  %vm4021_vm8 = vcmp.ne.f32.partialorder %v4015_v44, %v4015_v44  ;;  %v4022_v15 = vmul.f32 16.0, %v4015_v44  ;;  %v7130_v44 = vsel %vm5155_vm2, nan, %v5159_v18  ;;  %v7180_v58 = vld [vmem:[#allocation333_spill] sm:$0xff] }
 0x772   :  { %v4055_v18 = vpack.c.bf16 %v7135_v14, %v7134_v11  ;;  %vm7149_vm2 = vnez %v6872_v56  ;;  %4161 = vmatpush.bf16.msra.mxu2 %v4085_v8  ;;  %v7177_v43 = vsel %vm7175_vm5, nan, %v7176_v0  ;;  %v7201_v6 = vsel %vm7199_vm10, nan, %v7200_v10  ;;  %v7202_v14 = vld [vmem:[#allocation272_spill] sm:$0xff]  ;;  %v7212_v1 = vld [vmem:[#allocation325_spill] sm:$0xff]  ;;  %v7224_v8 = vld [vmem:[#allocation170_spill] sm:$0xff] }
 0x773   :  { %vm5810_vm7 = vcmp.gt.f32.partialorder %v4019_v36, 29.0  ;;  %v5814_v38 = vsel %vm4021_vm8, -0.0, %v4022_v15  ;;  %v7131_v15 = vsel %vm5175_vm14, nan, %v5179_v52  ;;  %v7136_v52 = vsel %vm5115_vm4, nan, %v5119_v17  ;;  %v7222_v2 = vld [vmem:[#allocation169_spill] sm:$0xff]  ;;  %v7242_v0 = vld [vmem:[#allocation316_spill] sm:$0xff] }
 0x774   :  { %v4024_v55 = vsel %vm5810_vm7, nan, %v5814_v38  ;;  %v4073_v30 = vpack.c.bf16 %v7131_v15, %v7130_v44  ;;  %v4071_v21 = vpack.c.bf16 %v7137_v23, %v7136_v52  ;;  %4132 = vmatpush.bf16.msra.mxu0 %v4055_v18  ;;  %v7146_v17 = vsel %vm7145_vm13, nan, %v4779_v41  ;;  %v7194_v15 = vld [vmem:[#allocation221_spill] sm:$0xff]  ;;  %v7206_v23 = vld [vmem:[#allocation276_spill] sm:$0xff] }
 0x775   :  { %v4053_v3 = vpack.c.bf16 %v7146_v17, %v7144_v48  ;;  %v7150_v20 = vsel %vm7149_vm2, nan, %v5099_v54  ;;  %vm7155_vm14 = vnez %v7098_v22  ;;  %vm7157_vm4 = vnez %v7104_v47  ;;  %v7164_v54 = vld [vmem:[#allocation229_spill] sm:$0xff]  ;;  %v7166_v22 = vld [vmem:[#allocation232_spill] sm:$0xff] }
 0x776   :  { %4145 = vmatpush.bf16.msra.mxu1 %v4073_v30  ;;  %v4069_v25 = vpack.c.bf16 %v7150_v20, %v7148_v51  ;;  %v7156_v41 = vsel %vm7155_vm14, nan, %v5719_v32  ;;  %v7158_v56 = vsel %vm7157_vm4, nan, %v5739_v27  ;;  %v7165_v24 = vsel %vm7163_vm0, nan, %v7164_v54  ;;  %v7170_v47 = vld [vmem:[#allocation280_spill] sm:$0xff]  ;;  %v7196_v30 = vld [vmem:[#allocation222_spill] sm:$0xff]  ;;  %v7204_v18 = vld [vmem:[#allocation273_spill] sm:$0xff] }
 0x777   :  { %v4101_v13 = vpack.c.bf16 %v7158_v56, %v7156_v41  ;;  %vm7167_vm8 = vnez %v7166_v22  ;;  %vm7171_vm1 = vnez %v7170_v47  ;;  %v7178_v32 = vld [vmem:[#allocation332_spill] sm:$0xff]  ;;  %vm7183_vm13 = vnez %v7182_v33  ;;  %v7216_v17 = vld [vmem:[#allocation329_spill] sm:$0xff]  ;;  %v7232_v54 = vld [vmem:[#allocation218_spill] sm:$0xff] }
 0x778   :  { %4133 = vmatpush.bf16.msra.mxu0 %v4053_v3  ;;  %v7169_v61 = vsel %vm7167_vm8, nan, %v7168_v19  ;;  %v7173_v50 = vsel %vm7171_vm1, nan, %v7172_v60  ;;  %vm7179_vm9 = vnez %v7178_v32  ;;  %v7185_v34 = vsel %vm7183_vm13, nan, %v7184_v35  ;;  %v7214_v48 = vld [vmem:[#allocation328_spill] sm:$0xff]  ;;  %v7218_v20 = vld [vmem:[#allocation165_spill] sm:$0xff] }
 0x779   :  { %v4067_v26 = vpack.c.bf16 %v7169_v61, %v7165_v24  ;;  %4175 = vmatpush.bf16.msra.mxu3 %v4101_v13  ;;  %v4083_v28 = vpack.c.bf16 %v7177_v43, %v7173_v50  ;;  %v7181_v27 = vsel %vm7179_vm9, nan, %v7180_v58  ;;  %v7189_v36 = vsel %vm7187_vm15, nan, %v7188_v31  ;;  %v7226_v13 = vld [vmem:[#allocation213_spill] sm:$0xff]  ;;  %v7234_v19 = vld [vmem:[#allocation264_spill] sm:$0xff]  ;;  %v7256_v31 = vld [vmem:[#allocation162_spill] sm:$0xff] }
 0x77a   :  { %4146 = vmatpush.bf16.msra.mxu1 %v4071_v21  ;;  %v4099_v37 = vpack.c.bf16 %v7185_v34, %v7181_v27  ;;  %vm7191_vm2 = vnez %v7190_v53  ;;  %vm7195_vm6 = vnez %v7194_v15  ;;  %vm7203_vm14 = vnez %v7202_v14  ;;  %v7208_v21 = vld [vmem:[#allocation277_spill] sm:$0xff]  ;;  %v7238_v47 = vld [vmem:[#allocation268_spill] sm:$0xff]  ;;  %v7252_v34 = vld [vmem:[#allocation158_spill] sm:$0xff] }
 0x77b   :  { %v7193_v49 = vsel %vm7191_vm2, nan, %v7192_v39  ;;  %v7197_v59 = vsel %vm7195_vm6, nan, %v7196_v30  ;;  %4162 = vmatpush.bf16.msra.mxu2 %v4083_v28  ;;  %v7205_v52 = vsel %vm7203_vm14, nan, %v7204_v18  ;;  %vm7207_vm4 = vnez %v7206_v23  ;;  %v7236_v61 = vld [vmem:[#allocation265_spill] sm:$0xff]  ;;  %v7246_v32 = vld [vmem:[#allocation320_spill] sm:$0xff]  ;;  %v7264_v30 = vld [vmem:[#allocation210_spill] sm:$0xff] }
 0x77c   :  { %4134 = vmatpush.bf16.msra.mxu0 %v4051_v12  ;;  %v4049_v44 = vpack.c.bf16 %v7193_v49, %v7189_v36  ;;  %v4065_v11 = vpack.c.bf16 %v7201_v6, %v7197_v59  ;;  %v7209_v42 = vsel %vm7207_vm4, nan, %v7208_v21  ;;  %v7213_v4 = vsel %vm7211_vm12, nan, %v7212_v1  ;;  %v7230_v12 = vld [vmem:[#allocation217_spill] sm:$0xff]  ;;  %v7260_v49 = vld [vmem:[#allocation206_spill] sm:$0xff]  ;;  %v7266_v10 = vld [vmem:[#allocation256_spill] sm:$0xff] }
 0x77d   :  { %4176 = vmatpush.bf16.msra.mxu3 %v4099_v37  ;;  %v4081_v7 = vpack.c.bf16 %v7209_v42, %v7205_v52  ;;  %vm7215_vm3 = vnez %v7214_v48  ;;  %vm7219_vm0 = vnez %v7218_v20  ;;  %vm7223_vm8 = vnez %v7222_v2  ;;  %v7240_v60 = vld [vmem:[#allocation269_spill] sm:$0xff]  ;;  %v7270_v14 = vld [vmem:[#allocation260_spill] sm:$0xff] }
 0x77e   :  { %4147 = vmatpush.bf16.msra.mxu1 %v4069_v25  ;;  %v7217_v3 = vsel %vm7215_vm3, nan, %v7216_v17  ;;  %v7220_v25 = vld [vmem:[#allocation166_spill] sm:$0xff]  ;;  %v7225_v41 = vsel %vm7223_vm8, nan, %v7224_v8  ;;  %vm7227_vm1 = vnez %v7226_v13  ;;  %vm7231_vm5 = vnez %v7230_v12  ;;  %v7244_v43 = vld [vmem:[#allocation317_spill] sm:$0xff]  ;;  %v7274_v21 = vld [vmem:[#allocation308_spill] sm:$0xff] }
 0x77f   :  { %v4097_v51 = vpack.c.bf16 %v7217_v3, %v7213_v4  ;;  %v7221_v5 = vsel %vm7219_vm0, nan, %v7220_v25  ;;  %v7229_v40 = vsel %vm7227_vm1, nan, %v7228_v16  ;;  %v7233_v24 = vsel %vm7231_vm5, nan, %v7232_v54  ;;  %4163 = vmatpush.bf16.msra.mxu2 %v4081_v7  ;;  %v7248_v58 = vld [vmem:[#allocation321_spill] sm:$0xff]  ;;  %v7284_v3 = vld [vmem:[#allocation150_spill] sm:$0xff]  ;;  %v7298_v54 = vld [vmem:[#allocation248_spill] sm:$0xff] }
 0x780   :  { %4135 = vmatpush.bf16.msra.mxu0 %v4049_v44  ;;  %v4047_v56 = vpack.c.bf16 %v7225_v41, %v7221_v5  ;;  %v4063_v22 = vpack.c.bf16 %v7233_v24, %v7229_v40  ;;  %vm7235_vm9 = vnez %v7234_v19  ;;  %vm7239_vm13 = vnez %v7238_v47  ;;  %v7250_v35 = vld [vmem:[#allocation157_spill] sm:$0xff]  ;;  %v7288_v25 = vld [vmem:[#allocation154_spill] sm:$0xff]  ;;  %v7302_v19 = vld [vmem:[#allocation252_spill] sm:$0xff] }
 0x781   :  { %4177 = vmatpush.bf16.msra.mxu3 %v4097_v51  ;;  %v7241_v50 = vsel %vm7239_vm13, nan, %v7240_v60  ;;  %vm7243_vm15 = vnez %v7242_v0  ;;  %vm7247_vm2 = vnez %v7246_v32  ;;  %vm7251_vm6 = vnez %v7250_v35  ;;  %v7254_v57 = vld [vmem:[#allocation161_spill] sm:$0xff]  ;;  %v7292_v41 = vld [vmem:[#allocation198_spill] sm:$0xff]  ;;  %v7306_v60 = vld [vmem:[#allocation300_spill] sm:$0xff] }
 0x782   :  { %4148 = vmatpush.bf16.msra.mxu1 %v4067_v26  ;;  %v7237_v26 = vsel %vm7235_vm9, nan, %v7236_v61  ;;  %v7245_v28 = vsel %vm7243_vm15, nan, %v7244_v43  ;;  %v7249_v27 = vsel %vm7247_vm2, nan, %v7248_v58  ;;  %v7253_v37 = vsel %vm7251_vm6, nan, %v7252_v34  ;;  %v7258_v39 = vld [vmem:[#allocation205_spill] sm:$0xff]  ;;  %v7296_v16 = vld [vmem:[#allocation202_spill] sm:$0xff] }
 0x783   :  { %v4079_v46 = vpack.c.bf16 %v7241_v50, %v7237_v26  ;;  %v4095_v33 = vpack.c.bf16 %v7249_v27, %v7245_v28  ;;  %vm7255_vm10 = vnez %v7254_v57  ;;  %vm7259_vm14 = vnez %v7258_v39  ;;  %v7262_v15 = vld [vmem:[#allocation209_spill] sm:$0xff]  ;;  %v7310_v0 = vld [vmem:[#allocation304_spill] sm:$0xff]  ;;  %v7316_v27 = vld [vmem:[#allocation194_spill] sm:$0xff] }
 0x784   :  { %4136 = vmatpush.bf16.msra.mxu0 %v4047_v56  ;;  %v7257_v36 = vsel %vm7255_vm10, nan, %v7256_v31  ;;  %v7261_v44 = vsel %vm7259_vm14, nan, %v7260_v49  ;;  %vm7263_vm4 = vnez %v7262_v15  ;;  %vm7267_vm12 = vnez %v7266_v10  ;;  %v7268_v6 = vld [vmem:[#allocation257_spill] sm:$0xff]  ;;  %v7318_v35 = vld [vmem:[#allocation195_spill] sm:$0xff]  ;;  %v7320_v34 = vld [vmem:[#allocation196_spill] sm:$0xff] }
 0x785   :  { %v4045_v53 = vpack.c.bf16 %v7257_v36, %v7253_v37  ;;  %v7265_v59 = vsel %vm7263_vm4, nan, %v7264_v30  ;;  %4164 = vmatpush.bf16.msra.mxu2 %v4079_v46  ;;  %4178 = vmatpush.bf16.msra.mxu3 %v4095_v33  ;;  %vm7271_vm3 = vnez %v7270_v14  ;;  %v7272_v18 = vld [vmem:[#allocation261_spill] sm:$0xff]  ;;  %vm7275_vm0 = vnez %v7274_v21  ;;  %v7322_v31 = vld [vmem:[#allocation244_spill] sm:$0xff]  ;;  %v7326_v39 = vld [vmem:[#allocation246_spill] sm:$0xff] }
 0x786   :  { %4149 = vmatpush.bf16.msra.mxu1 %v4065_v11  ;;  %v4061_v45 = vpack.c.bf16 %v7265_v59, %v7261_v44  ;;  %v7269_v11 = vsel %vm7267_vm12, nan, %v7268_v6  ;;  %v7273_v52 = vsel %vm7271_vm3, nan, %v7272_v18  ;;  %v7276_v42 = vld [vmem:[#allocation309_spill] sm:$0xff]  ;;  %vm7279_vm8 = vnez %v7278_v9  ;;  %v7328_v49 = vld [vmem:[#allocation247_spill] sm:$0xff]  ;;  %v7330_v30 = vld [vmem:[#allocation296_spill] sm:$0xff] }
 0x787   :  { %v4077_v23 = vpack.c.bf16 %v7273_v52, %v7269_v11  ;;  %v7277_v7 = vsel %vm7275_vm0, nan, %v7276_v42  ;;  %v7280_v1 = vld [vmem:[#allocation313_spill] sm:$0xff]  ;;  %vm7299_vm15 = vnez %v7298_v54  ;;  %vm7303_vm2 = vnez %v7302_v19  ;;  %v7334_v10 = vld [vmem:[#allocation298_spill] sm:$0xff]  ;;  %v7336_v6 = vld [vmem:[#allocation299_spill] sm:$0xff] }
 0x788   :  { %v7281_v4 = vsel %vm7279_vm8, nan, %v7280_v1  ;;  %4137 = vmatpush.bf16.msra.mxu0 %v4045_v53  ;;  %v7282_v17 = vld [vmem:[#allocation149_spill] sm:$0xff]  ;;  %vm7307_vm6 = vnez %v7306_v60  ;;  %vm7311_vm10 = vnez %v7310_v0  ;;  %vm7319_vm4 = vnez %v7318_v35  ;;  %v7340_v21 = vld [vmem:[#allocation148_spill] sm:$0xff]  ;;  %v7342_v9 = vld [vmem:[#allocation143_spill] sm:$0xff] }
 0x789   :  { %v4093_v48 = vpack.c.bf16 %v7281_v4, %v7277_v7  ;;  %vm7283_vm1 = vnez %v7282_v17  ;;  %v7286_v20 = vld [vmem:[#allocation153_spill] sm:$0xff]  ;;  %4165 = vmatpush.bf16.msra.mxu2 %v4077_v23  ;;  %v7321_v37 = vsel %vm7319_vm4, nan, %v7320_v34  ;;  %vm7323_vm12 = vnez %v7322_v31  ;;  %v7339_v23 = vld [vmem:[#allocation144_spill] sm:$0xff]  ;;  %v7341_v7 = vld [vmem:[#allocation147_spill] sm:$0xff] }
 0x78a   :  { %4150 = vmatpush.bf16.msra.mxu1 %v4063_v22  ;;  %v7285_v51 = vsel %vm7283_vm1, nan, %v7284_v3  ;;  %vm7287_vm5 = vnez %v7286_v20  ;;  %v7290_v8 = vld [vmem:[#allocation197_spill] sm:$0xff]  ;;  %vm7327_vm3 = vnez %v7326_v39  ;;  %vm7331_vm0 = vnez %v7330_v30  ;;  %v7343_v4 = vld [vmem:[#allocation142_spill] sm:$0xff]  ;;  %v7353_v20 = vld [vmem:[#allocation192_spill] sm:$0xff] }
 0x78b   :  { %v7289_v5 = vsel %vm7287_vm5, nan, %v7288_v25  ;;  %vm7291_vm9 = vnez %v7290_v8  ;;  %v7294_v13 = vld [vmem:[#allocation201_spill] sm:$0xff]  ;;  %4179 = vmatpush.bf16.msra.mxu3 %v4093_v48  ;;  %v7329_v44 = vsel %vm7327_vm3, nan, %v7328_v49  ;;  %vm7335_vm8 = vnez %v7334_v10  ;;  %v7344_v48 = vld [vmem:[#allocation146_spill] sm:$0xff]  ;;  %v7369_v19 = vld [vmem:[#allocation295_spill] sm:$0xff] }
 0x78c   :  { %v4043_v2 = vpack.c.bf16 %v7289_v5, %v7285_v51  ;;  %v7293_v56 = vsel %vm7291_vm9, nan, %v7292_v41  ;;  %vm7295_vm13 = vnez %v7294_v13  ;;  %v7300_v24 = vld [vmem:[#allocation249_spill] sm:$0xff]  ;;  %v7337_v11 = vsel %vm7335_vm8, nan, %v7336_v6  ;;  %v7351_v51 = vld [vmem:[#allocation191_spill] sm:$0xff]  ;;  %v7385_v35 = vld [vmem:[#allocation188_spill] sm:$0xff] }
 0x78d   :  { %v7297_v40 = vsel %vm7295_vm13, nan, %v7296_v16  ;;  %v7301_v22 = vsel %vm7299_vm15, nan, %v7300_v24  ;;  %v7304_v61 = vld [vmem:[#allocation253_spill] sm:$0xff]  ;;  %v4106_v52 = vpack.c.bf16 %v4024_v55, %v3962_v29  ;;  %v6097_v42 = vor.u32 %v7340_v21, %v7339_v23  ;;  %v7349_v55 = vld [vmem:[#allocation190_spill] sm:$0xff]  ;;  %v7361_v13 = vld [vmem:[#allocation243_spill] sm:$0xff] }
 0x78e   :  { %4151 = vmatpush.bf16.msra.mxu1 %v4061_v45  ;;  %v4059_v12 = vpack.c.bf16 %v7297_v40, %v7293_v56  ;;  %v7305_v26 = vsel %vm7303_vm2, nan, %v7304_v61  ;;  %v7308_v50 = vld [vmem:[#allocation301_spill] sm:$0xff]  ;;  %4138 = vmatpush.bf16.msra.mxu0 %v4043_v2  ;;  %v6101_v1 = vor.u32 %v7342_v9, %v7341_v7  ;;  %v6105_v63 = vor.u32 %v7344_v48, %v7343_v4  ;;  %v7355_v2 = vld [vmem:[#allocation240_spill] sm:$0xff]  ;;  %v7359_v56 = vld [vmem:[#allocation242_spill] sm:$0xff] }
 0x78f   :  { %v4075_v47 = vpack.c.bf16 %v7305_v26, %v7301_v22  ;;  %v7309_v46 = vsel %vm7307_vm6, nan, %v7308_v50  ;;  %v7312_v43 = vld [vmem:[#allocation305_spill] sm:$0xff]  ;;  %vm7352_vm11 = vnez %v7351_v51  ;;  %vm7356_vm1 = vnez %v7355_v2  ;;  %v7367_v22 = vld [vmem:[#allocation294_spill] sm:$0xff]  ;;  %v7377_v0 = vld [vmem:[#allocation347_spill] sm:$0xff] }
 0x790   :  { %v7313_v28 = vsel %vm7311_vm10, nan, %v7312_v43  ;;  %v7314_v58 = vld [vmem:[#allocation193_spill] sm:$0xff]  ;;  %v7354_v25 = vsel %vm7352_vm11, nan, %v7353_v20  ;;  %vm7360_vm5 = vnez %v7359_v56  ;;  %vm7368_vm13 = vnez %v7367_v22  ;;  %v7393_v39 = vld [vmem:[#allocation239_spill] sm:$0xff]  ;;  %v7407_v23 = vld [vmem:[#allocation342_spill] sm:$0xff] }
 0x791   :  { %v4091_v32 = vpack.c.bf16 %v7313_v28, %v7309_v46  ;;  %vm7315_vm14 = vnez %v7314_v58  ;;  %v7324_v36 = vld [vmem:[#allocation245_spill] sm:$0xff]  ;;  %4166 = vmatpush.bf16.msra.mxu2 %v4075_v47  ;;  %v7362_v16 = vsel %vm7360_vm5, nan, %v7361_v13  ;;  %v7370_v61 = vsel %vm7368_vm13, nan, %v7369_v19  ;;  %v7371_v47 = vld [vmem:[#allocation344_spill] sm:$0xff]  ;;  %v7375_v46 = vld [vmem:[#allocation346_spill] sm:$0xff]  ;;  %4139 = vmatmul.bf16.vlgmr.msra.gmra.mxu0 %v6105_v63 }
 0x792   :  { %v7317_v33 = vsel %vm7315_vm14, nan, %v7316_v27  ;;  %v7325_v53 = vsel %vm7323_vm12, nan, %v7324_v36  ;;  %v7332_v59 = vld [vmem:[#allocation297_spill] sm:$0xff]  ;;  %4152 = vmatpush.bf16.msra.mxu1 %v4059_v12  ;;  %v7363_v12 = vld [vmem:[#allocation292_spill] sm:$0xff]  ;;  %vm7372_vm15 = vnez %v7371_v47  ;;  %vm7376_vm2 = vnez %v7375_v46  ;;  %v7381_v58 = vld [vmem:[#allocation186_spill] sm:$0xff] }
 0x793   :  { %v4058_v57 = vpack.c.bf16 %v7321_v37, %v7317_v33  ;;  %v4074_v15 = vpack.c.bf16 %v7329_v44, %v7325_v53  ;;  %v7333_v45 = vsel %vm7331_vm0, nan, %v7332_v59  ;;  %4180 = vmatpush.bf16.msra.mxu3 %v4091_v32  ;;  %v7346_v17 = vld [vmem:[#allocation141_spill] sm:$0xff]  ;;  %vm7364_vm9 = vnez %v7363_v12  ;;  %v7383_v33 = vld [vmem:[#allocation187_spill] sm:$0xff]  ;;  %v7391_v53 = vld [vmem:[#allocation238_spill] sm:$0xff] }
 0x794   :  { %v4090_v14 = vpack.c.bf16 %v7337_v11, %v7333_v45  ;;  %v6109_v38 = vor.u32 %v7346_v17, %v7345_v62  ;;  %v7347_v29 = vld [vmem:[#allocation189_spill] sm:$0xff]  ;;  %v7378_v43 = vsel %vm7376_vm2, nan, %v7377_v0  ;;  %4167 = vmatmul.bf16.vlgmr.msra.gmra.mxu2 %v6097_v42  ;;  %vm7384_vm10 = vnez %v7383_v33  ;;  %v7399_v45 = vld [vmem:[#allocation290_spill] sm:$0xff]  ;;  %v7401_v10 = vld [vmem:[#allocation291_spill] sm:$0xff] }
 0x795   :  { %4187 = vmatpush.bf16.msrb.mxu0 %v4058_v57  ;;  %vm7348_vm7 = vnez %v7347_v29  ;;  %v7357_v8 = vld [vmem:[#allocation241_spill] sm:$0xff]  ;;  %v7386_v34 = vsel %vm7384_vm10, nan, %v7385_v35  ;;  %v7387_v57 = vld [vmem:[#allocation236_spill] sm:$0xff]  ;;  %vm7392_vm4 = vnez %v7391_v53  ;;  %vm7400_vm3 = vnez %v7399_v45  ;;  %v7409_v21 = vld [vmem:[#allocation343_spill] sm:$0xff] }
 0x796   :  { %4201 = vmatpush.bf16.msrb.mxu1 %v4074_v15  ;;  %v7350_v3 = vsel %vm7348_vm7, nan, %v7349_v55  ;;  %v7358_v41 = vsel %vm7356_vm1, nan, %v7357_v8  ;;  %4215 = vmatpush.bf16.msrb.mxu2 %v4090_v14  ;;  %v7365_v54 = vld [vmem:[#allocation293_spill] sm:$0xff]  ;;  %vm7388_vm14 = vnez %v7387_v57  ;;  %v7394_v49 = vsel %vm7392_vm4, nan, %v7393_v39  ;;  %v7395_v15 = vld [vmem:[#allocation288_spill] sm:$0xff]  ;;  %v7413_v48 = vld [vmem:[#allocation182_spill] sm:$0xff] }
 0x797   :  { %v4056_v5 = vpack.c.bf16 %v7354_v25, %v7350_v3  ;;  %v4072_v40 = vpack.c.bf16 %v7362_v16, %v7358_v41  ;;  %4229 = vmatpush.bf16.msrb.mxu3 %v4106_v52  ;;  %v7366_v24 = vsel %vm7364_vm9, nan, %v7365_v54  ;;  %v7373_v60 = vld [vmem:[#allocation345_spill] sm:$0xff]  ;;  %4153 = vmatmul.bf16.vlgmr.msra.gmra.mxu1 %v6109_v38  ;;  %vm7396_vm12 = vnez %v7395_v15  ;;  %v7403_v14 = vld [vmem:[#allocation340_spill] sm:$0xff]  ;;  %v7415_v17 = vld [vmem:[#allocation183_spill] sm:$0xff] }
 0x798   :  { %v4088_v26 = vpack.c.bf16 %v7370_v61, %v7366_v24  ;;  %v7374_v50 = vsel %vm7372_vm15, nan, %v7373_v60  ;;  %4181 = vmatmul.bf16.vlgmr.msra.gmra.mxu3 %v6101_v1  ;;  %v7379_v32 = vld [vmem:[#allocation185_spill] sm:$0xff]  ;;  %v7402_v6 = vsel %vm7400_vm3, nan, %v7401_v10  ;;  %vm7404_vm0 = vnez %v7403_v14  ;;  %v7417_v29 = vld [vmem:[#allocation184_spill] sm:$0xff]  ;;  %v7419_v51 = vld [vmem:[#allocation230_spill] sm:$0xff] }
 0x799   :  { %v4104_v28 = vpack.c.bf16 %v7378_v43, %v7374_v50  ;;  %4188 = vmatpush.bf16.msrb.mxu0 %v4056_v5  ;;  %vm7380_vm6 = vnez %v7379_v32  ;;  %v7389_v31 = vld [vmem:[#allocation237_spill] sm:$0xff]  ;;  %vm7408_vm8 = vnez %v7407_v23  ;;  %vm7416_vm11 = vnez %v7415_v17  ;;  %v7421_v20 = vld [vmem:[#allocation231_spill] sm:$0xff]  ;;  %v7423_v5 = vld [vmem:[#allocation234_spill] sm:$0xff] }
 0x79a   :  { %4202 = vmatpush.bf16.msrb.mxu1 %v4072_v40  ;;  %v7382_v27 = vsel %vm7380_vm6, nan, %v7381_v58  ;;  %v7390_v36 = vsel %vm7388_vm14, nan, %v7389_v31  ;;  %4216 = vmatpush.bf16.msrb.mxu2 %v4088_v26  ;;  %v7397_v30 = vld [vmem:[#allocation289_spill] sm:$0xff]  ;;  %v7410_v7 = vsel %vm7408_vm8, nan, %v7409_v21  ;;  %v7418_v55 = vsel %vm7416_vm11, nan, %v7417_v29  ;;  %v7425_v2 = vld [vmem:[#allocation235_spill] sm:$0xff] }
 0x79b   :  { %v4054_v37 = vpack.c.bf16 %v7386_v34, %v7382_v27  ;;  %v4070_v44 = vpack.c.bf16 %v7394_v49, %v7390_v36  ;;  %4230 = vmatpush.bf16.msrb.mxu3 %v4104_v28  ;;  %v7398_v59 = vsel %vm7396_vm12, nan, %v7397_v30  ;;  %v7405_v18 = vld [vmem:[#allocation341_spill] sm:$0xff]  ;;  %vm7420_vm1 = vnez %v7419_v51  ;;  %v7427_v56 = vld [vmem:[#allocation282_spill] sm:$0xff]  ;;  %v7429_v13 = vld [vmem:[#allocation283_spill] sm:$0xff] }
 0x79c   :  { %v4086_v11 = vpack.c.bf16 %v7402_v6, %v7398_v59  ;;  %v7406_v52 = vsel %vm7404_vm0, nan, %v7405_v18  ;;  %v7411_v4 = vld [vmem:[#allocation181_spill] sm:$0xff]  ;;  %v7422_v25 = vsel %vm7420_vm1, nan, %v7421_v20  ;;  %vm7424_vm5 = vnez %v7423_v5  ;;  %v7431_v40 = vld [vmem:[#allocation286_spill] sm:$0xff]  ;;  %v7433_v12 = vld [vmem:[#allocation287_spill] sm:$0xff] }
 0x79d   :  { %v4102_v9 = vpack.c.bf16 %v7410_v7, %v7406_v52  ;;  %4189 = vmatpush.bf16.msrb.mxu0 %v4054_v37  ;;  %vm7412_vm7 = vnez %v7411_v4  ;;  %v7426_v8 = vsel %vm7424_vm5, nan, %v7425_v2  ;;  %vm7428_vm9 = vnez %v7427_v56  ;;  %v7435_v22 = vld [vmem:[#allocation334_spill] sm:$0xff]  ;;  %v7437_v19 = vld [vmem:[#allocation335_spill] sm:$0xff]  ;;  %v7445_v0 = vld [vmem:[#allocation176_spill] sm:$0xff] }
 0x79e   :  { %4203 = vmatpush.bf16.msrb.mxu1 %v4070_v44  ;;  %v7414_v62 = vsel %vm7412_vm7, nan, %v7413_v48  ;;  %v4068_v41 = vpack.c.bf16 %v7426_v8, %v7422_v25  ;;  %4217 = vmatpush.bf16.msrb.mxu2 %v4086_v11  ;;  %v7430_v16 = vsel %vm7428_vm9, nan, %v7429_v13  ;;  %vm7432_vm13 = vnez %v7431_v40  ;;  %v7439_v26 = vld [vmem:[#allocation338_spill] sm:$0xff]  ;;  %v7441_v47 = vld [vmem:[#allocation339_spill] sm:$0xff]  ;;  %v7449_v32 = vld [vmem:[#allocation180_spill] sm:$0xff] }
 0x79f   :  { %v4052_v3 = vpack.c.bf16 %v7418_v55, %v7414_v62  ;;  %4231 = vmatpush.bf16.msrb.mxu3 %v4102_v9  ;;  %v7434_v54 = vsel %vm7432_vm13, nan, %v7433_v12  ;;  %vm7436_vm15 = vnez %v7435_v22  ;;  %vm7440_vm2 = vnez %v7439_v26  ;;  %v7443_v46 = vld [vmem:[#allocation175_spill] sm:$0xff]  ;;  %v7453_v35 = vld [vmem:[#allocation224_spill] sm:$0xff]  ;;  %v7459_v53 = vld [vmem:[#allocation274_spill] sm:$0xff] }
 0x7a0   :  { %v4084_v24 = vpack.c.bf16 %v7434_v54, %v7430_v16  ;;  %v7438_v61 = vsel %vm7436_vm15, nan, %v7437_v19  ;;  %v7442_v60 = vsel %vm7440_vm2, nan, %v7441_v47  ;;  %vm7444_vm6 = vnez %v7443_v46  ;;  %v7447_v28 = vld [vmem:[#allocation179_spill] sm:$0xff]  ;;  %v7457_v57 = vld [vmem:[#allocation228_spill] sm:$0xff]  ;;  %v7463_v44 = vld [vmem:[#allocation278_spill] sm:$0xff] }
 0x7a1   :  { %v4100_v50 = vpack.c.bf16 %v7442_v60, %v7438_v61  ;;  %4190 = vmatpush.bf16.msrb.mxu0 %v4052_v3  ;;  %v7446_v43 = vsel %vm7444_vm6, nan, %v7445_v0  ;;  %vm7448_vm10 = vnez %v7447_v28  ;;  %v7451_v33 = vld [vmem:[#allocation223_spill] sm:$0xff]  ;;  %vm7460_vm12 = vnez %v7459_v53  ;;  %v7467_v45 = vld [vmem:[#allocation326_spill] sm:$0xff]  ;;  %v7477_v21 = vld [vmem:[#allocation168_spill] sm:$0xff] }
 0x7a2   :  { %4204 = vmatpush.bf16.msrb.mxu1 %v4068_v41  ;;  %v7450_v58 = vsel %vm7448_vm10, nan, %v7449_v32  ;;  %vm7452_vm14 = vnez %v7451_v33  ;;  %v7455_v37 = vld [vmem:[#allocation227_spill] sm:$0xff]  ;;  %4218 = vmatpush.bf16.msrb.mxu2 %v4084_v24  ;;  %vm7464_vm3 = vnez %v7463_v44  ;;  %vm7468_vm0 = vnez %v7467_v45  ;;  %v7471_v11 = vld [vmem:[#allocation330_spill] sm:$0xff]  ;;  %v7481_v4 = vld [vmem:[#allocation172_spill] sm:$0xff] }
 0x7a3   :  { %v4050_v27 = vpack.c.bf16 %v7450_v58, %v7446_v43  ;;  %v7454_v34 = vsel %vm7452_vm14, nan, %v7453_v35  ;;  %vm7456_vm4 = vnez %v7455_v37  ;;  %4232 = vmatpush.bf16.msrb.mxu3 %v4100_v50  ;;  %v7461_v39 = vld [vmem:[#allocation275_spill] sm:$0xff]  ;;  %vm7472_vm8 = vnez %v7471_v11  ;;  %v7485_v29 = vld [vmem:[#allocation216_spill] sm:$0xff]  ;;  %v7491_v5 = vld [vmem:[#allocation266_spill] sm:$0xff] }
 0x7a4   :  { %v7458_v31 = vsel %vm7456_vm4, nan, %v7457_v57  ;;  %v7462_v49 = vsel %vm7460_vm12, nan, %v7461_v39  ;;  %v7465_v15 = vld [vmem:[#allocation279_spill] sm:$0xff]  ;;  %v7489_v51 = vld [vmem:[#allocation220_spill] sm:$0xff]  ;;  %vm7492_vm9 = vnez %v7491_v5  ;;  %v7495_v41 = vld [vmem:[#allocation270_spill] sm:$0xff] }
 0x7a5   :  { %v4066_v36 = vpack.c.bf16 %v7458_v31, %v7454_v34  ;;  %v7466_v30 = vsel %vm7464_vm3, nan, %v7465_v15  ;;  %v7469_v10 = vld [vmem:[#allocation327_spill] sm:$0xff]  ;;  %4191 = vmatpush.bf16.msrb.mxu0 %v4050_v27  ;;  %vm7496_vm13 = vnez %v7495_v41  ;;  %v7499_v40 = vld [vmem:[#allocation318_spill] sm:$0xff]  ;;  %v7509_v47 = vld [vmem:[#allocation160_spill] sm:$0xff] }
 0x7a6   :  { %v4082_v59 = vpack.c.bf16 %v7466_v30, %v7462_v49  ;;  %v7470_v6 = vsel %vm7468_vm0, nan, %v7469_v10  ;;  %v7473_v14 = vld [vmem:[#allocation331_spill] sm:$0xff]  ;;  %vm7500_vm15 = vnez %v7499_v40  ;;  %v7503_v24 = vld [vmem:[#allocation322_spill] sm:$0xff]  ;;  %v7513_v46 = vld [vmem:[#allocation164_spill] sm:$0xff] }
 0x7a7   :  { %v7474_v18 = vsel %vm7472_vm8, nan, %v7473_v14  ;;  %4205 = vmatpush.bf16.msrb.mxu1 %v4066_v36  ;;  %v7475_v23 = vld [vmem:[#allocation167_spill] sm:$0xff]  ;;  %vm7504_vm2 = vnez %v7503_v24  ;;  %v7517_v32 = vld [vmem:[#allocation208_spill] sm:$0xff]  ;;  %v7523_v37 = vld [vmem:[#allocation258_spill] sm:$0xff] }
 0x7a8   :  { %v4098_v52 = vpack.c.bf16 %v7474_v18, %v7470_v6  ;;  %vm7476_vm7 = vnez %v7475_v23  ;;  %v7479_v9 = vld [vmem:[#allocation171_spill] sm:$0xff]  ;;  %4219 = vmatpush.bf16.msrb.mxu2 %v4082_v59  ;;  %v7521_v33 = vld [vmem:[#allocation212_spill] sm:$0xff]  ;;  %vm7524_vm12 = vnez %v7523_v37  ;;  %v7527_v36 = vld [vmem:[#allocation262_spill] sm:$0xff] }
 0x7a9   :  { %v7478_v7 = vsel %vm7476_vm7, nan, %v7477_v21  ;;  %vm7480_vm11 = vnez %v7479_v9  ;;  %v7483_v17 = vld [vmem:[#allocation215_spill] sm:$0xff]  ;;  %vm7528_vm3 = vnez %v7527_v36  ;;  %v7531_v44 = vld [vmem:[#allocation310_spill] sm:$0xff]  ;;  %v7541_v14 = vld [vmem:[#allocation152_spill] sm:$0xff] }
 0x7aa   :  { %v7482_v48 = vsel %vm7480_vm11, nan, %v7481_v4  ;;  %vm7484_vm1 = vnez %v7483_v17  ;;  %v7487_v3 = vld [vmem:[#allocation219_spill] sm:$0xff]  ;;  %4233 = vmatpush.bf16.msrb.mxu3 %v4098_v52  ;;  %vm7532_vm0 = vnez %v7531_v44  ;;  %v7535_v59 = vld [vmem:[#allocation314_spill] sm:$0xff]  ;;  %v7545_v23 = vld [vmem:[#allocation156_spill] sm:$0xff] }
 0x7ab   :  { %v4048_v62 = vpack.c.bf16 %v7482_v48, %v7478_v7  ;;  %v7486_v55 = vsel %vm7484_vm1, nan, %v7485_v29  ;;  %vm7488_vm5 = vnez %v7487_v3  ;;  %v7493_v2 = vld [vmem:[#allocation267_spill] sm:$0xff]  ;;  %vm7536_vm8 = vnez %v7535_v59  ;;  %v7549_v4 = vld [vmem:[#allocation200_spill] sm:$0xff]  ;;  %v7555_v3 = vld [vmem:[#allocation250_spill] sm:$0xff] }
 0x7ac   :  { %v7490_v20 = vsel %vm7488_vm5, nan, %v7489_v51  ;;  %v7494_v8 = vsel %vm7492_vm9, nan, %v7493_v2  ;;  %v7497_v56 = vld [vmem:[#allocation271_spill] sm:$0xff]  ;;  %v7553_v17 = vld [vmem:[#allocation204_spill] sm:$0xff]  ;;  %vm7556_vm9 = vnez %v7555_v3  ;;  %v7563_v41 = vld [vmem:[#allocation302_spill] sm:$0xff] }
 0x7ad   :  { %v4064_v25 = vpack.c.bf16 %v7490_v20, %v7486_v55  ;;  %v7498_v13 = vsel %vm7496_vm13, nan, %v7497_v56  ;;  %v7501_v12 = vld [vmem:[#allocation319_spill] sm:$0xff]  ;;  %4192 = vmatpush.bf16.msrb.mxu0 %v4048_v62 }
 0x7ae   :  { %v4080_v16 = vpack.c.bf16 %v7498_v13, %v7494_v8  ;;  %v7502_v54 = vsel %vm7500_vm15, nan, %v7501_v12  ;;  %v7505_v22 = vld [vmem:[#allocation323_spill] sm:$0xff]  ;;  %vm7564_vm15 = vnez %v7563_v41 }
 0x7af   :  { %v7506_v19 = vsel %vm7504_vm2, nan, %v7505_v22  ;;  %4206 = vmatpush.bf16.msrb.mxu1 %v4064_v25  ;;  %v7507_v26 = vld [vmem:[#allocation159_spill] sm:$0xff]  ;;  %v7559_v25 = vld [vmem:[#allocation254_spill] sm:$0xff] }
 0x7b0   :  { %v4096_v61 = vpack.c.bf16 %v7506_v19, %v7502_v54  ;;  %vm7508_vm6 = vnez %v7507_v26  ;;  %v7511_v50 = vld [vmem:[#allocation163_spill] sm:$0xff]  ;;  %4220 = vmatpush.bf16.msrb.mxu2 %v4080_v16  ;;  %vm7560_vm13 = vnez %v7559_v25  ;;  %v7567_v16 = vld [vmem:[#allocation306_spill] sm:$0xff] }
 0x7b1   :  { %v7510_v60 = vsel %vm7508_vm6, nan, %v7509_v47  ;;  %vm7512_vm10 = vnez %v7511_v50  ;;  %v7515_v28 = vld [vmem:[#allocation207_spill] sm:$0xff]  ;;  %vm7568_vm2 = vnez %v7567_v16 }
 0x7b2   :  { %v7514_v0 = vsel %vm7512_vm10, nan, %v7513_v46  ;;  %vm7516_vm14 = vnez %v7515_v28  ;;  %v7519_v27 = vld [vmem:[#allocation211_spill] sm:$0xff]  ;;  %4234 = vmatpush.bf16.msrb.mxu3 %v4096_v61 }
 0x7b3   :  { %v4046_v43 = vpack.c.bf16 %v7514_v0, %v7510_v60  ;;  %v7518_v58 = vsel %vm7516_vm14, nan, %v7517_v32  ;;  %vm7520_vm4 = vnez %v7519_v27  ;;  %v7525_v57 = vld [vmem:[#allocation259_spill] sm:$0xff]  ;;  %v4258_v32 = vld [vmem:[#allocation8] sm:$0x3] }
 0x7b4   :  { %v7522_v35 = vsel %vm7520_vm4, nan, %v7521_v33  ;;  %v7526_v31 = vsel %vm7524_vm12, nan, %v7525_v57  ;;  %v7529_v53 = vld [vmem:[#allocation263_spill] sm:$0xff] }
 0x7b5   :  { %v4062_v34 = vpack.c.bf16 %v7522_v35, %v7518_v58  ;;  %v7530_v39 = vsel %vm7528_vm3, nan, %v7529_v53  ;;  %v7533_v15 = vld [vmem:[#allocation311_spill] sm:$0xff]  ;;  %4193 = vmatpush.bf16.msrb.mxu0 %v4046_v43 }
 0x7b6   :  { %v4078_v49 = vpack.c.bf16 %v7530_v39, %v7526_v31  ;;  %v7534_v30 = vsel %vm7532_vm0, nan, %v7533_v15  ;;  %v7537_v45 = vld [vmem:[#allocation315_spill] sm:$0xff] }
 0x7b7   :  { %v7538_v10 = vsel %vm7536_vm8, nan, %v7537_v45  ;;  %4207 = vmatpush.bf16.msrb.mxu1 %v4062_v34  ;;  %v7539_v11 = vld [vmem:[#allocation151_spill] sm:$0xff]  ;;  %v4261_v34 = vperm.slane %v4258_v32, 1 }
 0x7b8   :  { %v4094_v6 = vpack.c.bf16 %v7538_v10, %v7534_v30  ;;  %vm7540_vm7 = vnez %v7539_v11  ;;  %v7543_v52 = vld [vmem:[#allocation155_spill] sm:$0xff]  ;;  %4221 = vmatpush.bf16.msrb.mxu2 %v4078_v49 }
 0x7b9   :  { %v7542_v18 = vsel %vm7540_vm7, nan, %v7541_v14  ;;  %vm7544_vm11 = vnez %v7543_v52  ;;  %v7547_v9 = vld [vmem:[#allocation199_spill] sm:$0xff] }
 0x7ba   :  { %v7546_v21 = vsel %vm7544_vm11, nan, %v7545_v23  ;;  %vm7548_vm1 = vnez %v7547_v9  ;;  %v7551_v62 = vld [vmem:[#allocation203_spill] sm:$0xff]  ;;  %4235 = vmatpush.bf16.msrb.mxu3 %v4094_v6 }
 0x7bb   :  { %v4044_v7 = vpack.c.bf16 %v7546_v21, %v7542_v18  ;;  %v7550_v48 = vsel %vm7548_vm1, nan, %v7549_v4  ;;  %vm7552_vm5 = vnez %v7551_v62  ;;  %v7557_v51 = vld [vmem:[#allocation251_spill] sm:$0xff] }
 0x7bc   :  { %v7554_v29 = vsel %vm7552_vm5, nan, %v7553_v17  ;;  %v7558_v20 = vsel %vm7556_vm9, nan, %v7557_v51  ;;  %v7561_v5 = vld [vmem:[#allocation255_spill] sm:$0xff] }
 0x7bd   :  { %v4060_v55 = vpack.c.bf16 %v7554_v29, %v7550_v48  ;;  %v7562_v2 = vsel %vm7560_vm13, nan, %v7561_v5  ;;  %v7565_v56 = vld [vmem:[#allocation303_spill] sm:$0xff]  ;;  %4194 = vmatpush.bf16.msrb.mxu0 %v4044_v7 }
 0x7be   :  { %v4076_v8 = vpack.c.bf16 %v7562_v2, %v7558_v20  ;;  %v7566_v13 = vsel %vm7564_vm15, nan, %v7565_v56  ;;  %v7569_v40 = vld [vmem:[#allocation307_spill] sm:$0xff] }
 0x7bf   :  { %v7570_v12 = vsel %vm7568_vm2, nan, %v7569_v40  ;;  %4208 = vmatpush.bf16.msrb.mxu1 %v4060_v55 }
 0x7c0   :  { %v4092_v54 = vpack.c.bf16 %v7570_v12, %v7566_v13  ;;  %4222 = vmatpush.bf16.msrb.mxu2 %v4076_v8  ;;  %4195 = vmatmul.bf16.vlgmr.msrb.gmra.mxu0 %v6105_v63 }
 0x7c2   :  { %4236 = vmatpush.bf16.msrb.mxu3 %v4092_v54  ;;  %4209 = vmatmul.bf16.vlgmr.msrb.gmra.mxu1 %v6109_v38  ;;  %v4260_v38 = vperm.slane %v4258_v32, 0 }
 0x7c3   :  { %4223 = vmatmul.bf16.vlgmr.msrb.gmra.mxu2 %v6097_v42  ;;  %v4268_v42 = vld [vmem:[%s6352_s3] sm:$0x3]  ;;  %s4437_s3 = smov [#allocation9]  }
 0x7c4   :  { %v4270_v37 = vperm.slane %v4268_v42, 0  ;;  %v4271_v53 = vperm.slane %v4268_v42, 1  ;;  %s4286_s5 = sshll.u32 %s4437_s3, 4  ;;  %s4287_s5 = int_to_ptr.vmem [resolvable:$true] %s4286_s5 }
 0x7c5   :  { %4237 = vmatmul.bf16.vlgmr.msrb.gmra.mxu3 %v6101_v1 }
 0x80e   :  { %v4140_v24 = vpop.f32.mrf.mxu0 }
 0x814   :  { %v4154_v22 = vpop.f32.mrf.mxu1 }
 0x815   :  { %v4155_v60 = vadd.f32 %v4154_v22, %v4140_v24 }
 0x816   :  { %v4142_v26 = vpop.f32.mrf.mxu0 }
 0x817   :  { %v4168_v19 = vpop.f32.mrf.mxu2 }
 0x818   :  { %v4169_v28 = vadd.f32 %v4168_v19, %v4155_v60 }
 0x81b   :  { %v4182_v61 = vpop.f32.mrf.mxu3 }
 0x81c   :  { %v4156_v47 = vpop.f32.mrf.mxu1  ;;  %v4183_v58 = vadd.f32 %v4182_v61, %v4169_v28 }
 0x81d   :  { %v4157_v1 = vadd.f32 %v4156_v47, %v4142_v26 }
 0x81e   :  { %v4264_v57 = vmul.f32 %v4260_v38, %v4183_v58 }
 0x81f   :  { %v4170_v50 = vpop.f32.mrf.mxu2 }
 0x820   :  { %v4171_v31 = vadd.f32 %v4170_v50, %v4157_v1  ;;  %v4274_v15 = vadd.f32 %v4270_v37, %v4264_v57 }
 0x823   :  { %v4184_v46 = vpop.f32.mrf.mxu3 }
 0x824   :  { %v4185_v30 = vadd.f32 %v4184_v46, %v4171_v31 }
 0x826   :  { %v4266_v18 = vmul.f32 %v4260_v38, %v4185_v30 }
 0x828   :  { %v4276_v21 = vadd.f32 %v4270_v37, %v4266_v18 }
 0x83d   :  { %v4196_v0 = vpop.f32.mrf.mxu0 }
 0x83f   :  { %v4210_v43 = vpop.f32.mrf.mxu1 }
 0x840   :  { %v4211_v63 = vadd.f32 %v4210_v43, %v4196_v0 }
 0x845   :  { %v4198_v39 = vpop.f32.mrf.mxu0 }
 0x846   :  { %v4224_v27 = vpop.f32.mrf.mxu2 }
 0x847   :  { %v4225_v35 = vadd.f32 %v4224_v27, %v4211_v63  ;;  %v4212_v49 = vpop.f32.mrf.mxu1 }
 0x848   :  { %v4238_v33 = vpop.f32.mrf.mxu3  ;;  %v4213_v45 = vadd.f32 %v4212_v49, %v4198_v39 }
 0x849   :  { %v4239_v36 = vadd.f32 %v4238_v33, %v4225_v35 }
 0x84b   :  { %v4265_v44 = vmul.f32 %v4261_v34, %v4239_v36 }
 0x84d   :  { %v4275_v59 = vadd.f32 %v4271_v53, %v4265_v44 }
 0x84e   :  { %v4226_v10 = vpop.f32.mrf.mxu2 }
 0x84f   :  { %v4278_v6 = vpack.c.bf16 %v4275_v59, %v4274_v15  ;;  %v4227_v11 = vadd.f32 %v4226_v10, %v4213_v45 }
 0x850   :  { %v4240_v14 = vpop.f32.mrf.mxu3 }
 0x851   :  { %4280 = vst [vmem:[#allocation9] sm:$0xff] %v4278_v6  ;;  %v4241_v52 = vadd.f32 %v4240_v14, %v4227_v11 }
 0x853   :  { %v4267_v23 = vmul.f32 %v4261_v34, %v4241_v52 }
 0x855   :  { %v4277_v7 = vadd.f32 %v4271_v53, %v4267_v23 }
 0x857   :  { %v4279_v9 = vpack.c.bf16 %v4277_v7, %v4276_v21 }
 0x859   :  { %4281 = vst [vmem:[#allocation9 + $0x8] sm:$0xff] %v4279_v9 }
 0x85a   :  { %4294 = dma.vmem_to_hbm [thread:$0]  %s4287_s5, 256, %s4289_s8, [#allocation5], %s4438_s9, %s4438_s9, %s4439_s10  }
 0x85b   :  { %4430 = dma.done.wait [#allocation5], 256  }
 0x85c   :  { %4431 = vsyncadd [#allocation5], 4294967040 }
 0x85d   :  { %4299 = vsyncpa [#allocation4], 1 }
 0x85e   :  { %4300 = vsyncpa [#allocation7], 1 }
 0x85f   :  { %4301 = vsyncpa [#allocation5], 1 }

</bundles_post_ra>
